<compile_context>
chip_gen: v6e
topology: v6e:2x2x1
jax: 0.10.0
libtpu: 0.0.40
codegen_flags: <defaults>
</compile_context>

<pallas_src>
import functools

import numpy as np
import jax
import jax.numpy as jnp
from jax import lax
from jax.experimental import pallas as pl
from jax.experimental.pallas import tpu as pltpu


_VMEM_LIMIT = 32 * 1024 * 1024        # honest scoped-VMEM budget (actual use ~2 MiB)
_MXU_DTYPE = jnp.bfloat16             # MXU input dtype; use jnp.float32 for strict parity
_SUBLANE_PAD = 16 if _MXU_DTYPE is jnp.bfloat16 else 8
_NEG_INF = -1e30


def _round_up(x, m):
    return (x + m - 1) // m * m


# --------------------------------------------------------------------------- #
# In-kernel math helpers
# --------------------------------------------------------------------------- #
# XLA's f32 rational erf approximation, so the fused GELU matches
# nn.GELU(approximate='none') to f32 precision using only VPU/EUP-friendly ops.
_ERF_ALPHA = (-2.72614225801306e-10, 2.77068142495902e-08, -2.10102402082508e-06,
              -5.69250639462346e-05, -7.34990630326855e-04, -2.954600054904e-03,
              -1.60960333262415e-02)
_ERF_BETA = (-1.45660718464996e-05, -2.13374055278905e-04, -1.68282697438203e-03,
             -7.37332916720468e-03, -1.42647390514189e-02)


def _erf_f32(x):
    x = jnp.clip(x, -4.0, 4.0)
    x2 = x * x
    p = jnp.float32(_ERF_ALPHA[0])
    for c in _ERF_ALPHA[1:]:
        p = p * x2 + jnp.float32(c)
    q = jnp.float32(_ERF_BETA[0])
    for c in _ERF_BETA[1:]:
        q = q * x2 + jnp.float32(c)
    # divide -> EUP reciprocal + one Newton refinement (~f32 exact, frees VPU slot)
    r = pl.reciprocal(q, approx=True)
    r = r * (2.0 - q * r)
    return x * p * r


def _gelu_exact(x):
    return x * 0.5 * (1.0 + _erf_f32(x * np.float32(0.7071067811865476)))


def _layer_norm(x, gamma, beta, eps):
    mu = jnp.mean(x, axis=-1, keepdims=True)
    xc = x - mu
    var = jnp.mean(xc * xc, axis=-1, keepdims=True)
    return xc * lax.rsqrt(var + eps) * gamma + beta


def _mxu_dot(a, b):
    """MXU matmul with (optionally) bf16 inputs and f32 accumulation."""
    return jnp.dot(a.astype(_MXU_DTYPE), b.astype(_MXU_DTYPE),
                   preferred_element_type=jnp.float32)


# --------------------------------------------------------------------------- #
# Fused transformer block: one pallas_call per layer, grid=(B,)
# --------------------------------------------------------------------------- #
def _block_kernel(x_ref, ln1_g_ref, ln1_b_ref, qkv_w_ref, qkv_b_ref,
                  proj_w_ref, proj_b_ref, ln2_g_ref, ln2_b_ref,
                  fc1_w_ref, fc1_b_ref, fc2_w_ref, fc2_b_ref,
                  o_ref, attn_ref, *, num_heads, head_dim, seq_len, eps):
    """Whole pre-LN ViT block for one batch element (drop_path = 0 -> identity)."""
    f32 = jnp.float32
    x = x_ref[0].astype(f32)                                    # (Sp, D)
    sp = x.shape[0]
    d = num_heads * head_dim
    scale = head_dim ** -0.5

    # ---- LN1 + qkv projection ----
    y = _layer_norm(x, ln1_g_ref[...].astype(f32), ln1_b_ref[...].astype(f32), eps)
    qkv = _mxu_dot(y, qkv_w_ref[...]) + qkv_b_ref[...].astype(f32)   # (Sp, 3D)

    # ---- multi-head self-attention ----
    # TODO(synk): whole-(Sp,3D) attention with full SpxSp scores per head; add a
    # flash-style key-block tiling path before reusing with long sequences (the
    # quadratic score growth hits v7x's 64 MiB VMEM first).
    key_valid = lax.broadcasted_iota(jnp.int32, (1, sp), 1) < seq_len
    for h in range(num_heads):
        lo = h * head_dim
        q = qkv[:, lo:lo + head_dim]
        k = qkv[:, d + lo:d + lo + head_dim]
        v = qkv[:, 2 * d + lo:2 * d + lo + head_dim]
        s = lax.dot_general(q.astype(_MXU_DTYPE), k.astype(_MXU_DTYPE),
                            (((1,), (1,)), ((), ())),
                            preferred_element_type=f32) * scale
        s = jnp.where(key_valid, s, _NEG_INF)
        s = s - jnp.max(s, axis=-1, keepdims=True)
        p = jnp.exp(s)
        denom = jnp.sum(p, axis=-1, keepdims=True)
        inv = pl.reciprocal(denom, approx=True)
        inv = inv * (2.0 - denom * inv)                         # Newton step -> ~f32 exact
        o_h = _mxu_dot(p, v) * inv
        # write each head straight into the (Sp, D) VMEM slab (no concatenate pass)
        attn_ref[:, lo:lo + head_dim] = o_h

    # ---- attention output projection + residual ----
    x = x + _mxu_dot(attn_ref[...], proj_w_ref[...]) + proj_b_ref[...].astype(f32)

    # ---- LN2 + fc1 + GELU + fc2 + residual ----
    y2 = _layer_norm(x, ln2_g_ref[...].astype(f32), ln2_b_ref[...].astype(f32), eps)
    h1 = _mxu_dot(y2, fc1_w_ref[...]) + fc1_b_ref[...].astype(f32)
    h1 = _gelu_exact(h1)
    out = x + _mxu_dot(h1, fc2_w_ref[...]) + fc2_b_ref[...].astype(f32)
    o_ref[0] = out.astype(o_ref.dtype)


def transformer_block_pallas(x, blk, *, num_heads, seq_len, eps=1e-6):
    """x: (B, Sp, D) -> (B, Sp, D). One fused pallas_call per layer, grid=(B,)."""
    B, Sp, D = x.shape
    hidden = blk["fc1_w"].shape[1]
    head_dim = D // num_heads
    row = lambda a: a.reshape(1, -1)
    const = lambda b: (0, 0)

    return pl.pallas_call(
        functools.partial(_block_kernel, num_heads=num_heads, head_dim=head_dim,
                          seq_len=seq_len, eps=eps),
        out_shape=jax.ShapeDtypeStruct((B, Sp, D), x.dtype),
        grid=(B,),
        in_specs=[
            pl.BlockSpec((1, Sp, D), lambda b: (b, 0, 0)),       # x
            pl.BlockSpec((1, D), const),                         # ln1_g
            pl.BlockSpec((1, D), const),                         # ln1_b
            pl.BlockSpec((D, 3 * D), const),                     # qkv_w
            pl.BlockSpec((1, 3 * D), const),                     # qkv_b
            pl.BlockSpec((D, D), const),                         # proj_w
            pl.BlockSpec((1, D), const),                         # proj_b
            pl.BlockSpec((1, D), const),                         # ln2_g
            pl.BlockSpec((1, D), const),                         # ln2_b
            pl.BlockSpec((D, hidden), const),                    # fc1_w
            pl.BlockSpec((1, hidden), const),                    # fc1_b
            pl.BlockSpec((hidden, D), const),                    # fc2_w
            pl.BlockSpec((1, D), const),                         # fc2_b
        ],
        out_specs=pl.BlockSpec((1, Sp, D), lambda b: (b, 0, 0)),
        scratch_shapes=[pltpu.VMEM((Sp, D), jnp.float32)],       # attention slab
        compiler_params=pltpu.CompilerParams(
            dimension_semantics=("parallel",),
            vmem_limit_bytes=_VMEM_LIMIT),
    )(x, row(blk["ln1_g"]), row(blk["ln1_b"]), blk["qkv_w"], row(blk["qkv_b"]),
      blk["proj_w"], row(blk["proj_b"]), row(blk["ln2_g"]), row(blk["ln2_b"]),
      blk["fc1_w"], row(blk["fc1_b"]), blk["fc2_w"], row(blk["fc2_b"]))


# --------------------------------------------------------------------------- #
# Fused final LayerNorm + 'avg' pooling + pooled LayerNorm (one call, 2 outputs)
# --------------------------------------------------------------------------- #
def _final_norm_pool_kernel(x_ref, g_ref, b_ref, xo_ref, emb_ref, *, seq_len, eps):
    f32 = jnp.float32
    x = x_ref[0].astype(f32)                                    # (Sp, D)
    g = g_ref[...].astype(f32)
    b = b_ref[...].astype(f32)
    xn = _layer_norm(x, g, b, eps)
    xo_ref[0] = xn.astype(xo_ref.dtype)
    # 'avg' pooling over real (non-cls, non-padded) tokens, then norm again
    pooled = jnp.mean(xn[1:seq_len], axis=0, keepdims=True)     # (1, D)
    emb_ref[0] = _layer_norm(pooled, g, b, eps).astype(emb_ref.dtype)


def final_norm_pool_pallas(x, gamma, beta, *, seq_len, eps=1e-6):
    B, Sp, D = x.shape
    xn, emb = pl.pallas_call(
        functools.partial(_final_norm_pool_kernel, seq_len=seq_len, eps=eps),
        out_shape=(jax.ShapeDtypeStruct((B, Sp, D), x.dtype),
                   jax.ShapeDtypeStruct((B, 1, D), x.dtype)),
        grid=(B,),
        in_specs=[pl.BlockSpec((1, Sp, D), lambda b: (b, 0, 0)),
                  pl.BlockSpec((1, D), lambda b: (0, 0)),
                  pl.BlockSpec((1, D), lambda b: (0, 0))],
        out_specs=(pl.BlockSpec((1, Sp, D), lambda b: (b, 0, 0)),
                   pl.BlockSpec((1, 1, D), lambda b: (b, 0, 0))),
        compiler_params=pltpu.CompilerParams(
            dimension_semantics=("parallel",),
            vmem_limit_bytes=_VMEM_LIMIT),
    )(x, gamma.reshape(1, D), beta.reshape(1, D))
    return xn, emb[:, 0]


# --------------------------------------------------------------------------- #
# Parameter construction (deterministic, in-script)
# --------------------------------------------------------------------------- #
def xavier_uniform(key, fan_in, fan_out):
    bound = float(np.sqrt(6.0 / (fan_in + fan_out)))
    return jax.random.uniform(key, (fan_in, fan_out), jnp.float32, -bound, bound)


def trunc_normal(key, shape, std=0.02):
    return std * jax.random.truncated_normal(key, -2.0, 2.0, shape, jnp.float32)


def build_2d_sinusoidal_pos_embed(length, embed_dim, use_class_token=True):
    """Standard MAE-style 2D sin-cos positional embedding, (1, P(+1), D)."""
    def _1d(dim, pos):
        omega = np.arange(dim // 2, dtype=np.float64) / (dim / 2.0)
        omega = 1.0 / (10000.0 ** omega)
        out = np.einsum("m,d->md", pos.reshape(-1), omega)
        return np.concatenate([np.sin(out), np.cos(out)], axis=1)

    grid_h = np.arange(length, dtype=np.float64)
    grid_w = np.arange(length, dtype=np.float64)
    grid = np.meshgrid(grid_w, grid_h)
    grid = np.stack(grid, axis=0).reshape(2, length, length)
    emb = np.concatenate([_1d(embed_dim // 2, grid[0]),
                          _1d(embed_dim // 2, grid[1])], axis=1)   # (P, D)
    if use_class_token:
        emb = np.concatenate([np.zeros((1, embed_dim)), emb], axis=0)
    return jnp.asarray(emb[None], dtype=jnp.float32)


def init_params(key, *, img_size, patch_size, in_chans, embed_dim, depth,
                num_heads, mlp_ratio):
    num_patches = (img_size // patch_size) ** 2
    hidden = int(embed_dim * mlp_ratio)
    patch_dim = patch_size ** 2
    keys = jax.random.split(key, 3 + depth)
    params = {
        # ContextPatchEmbed ~ per-channel patch projection + channel-context embedding
        "proj": {"w": xavier_uniform(keys[0], patch_dim, embed_dim),
                 "b": jnp.zeros((embed_dim,), jnp.float32)},
        "chan_embed": trunc_normal(keys[1], (in_chans, embed_dim)),
        "cls_token": trunc_normal(keys[2], (1, 1, embed_dim)),
        "pos_embed": build_2d_sinusoidal_pos_embed(int(num_patches ** 0.5),
                                                   embed_dim, use_class_token=True),
        "norm_g": jnp.ones((embed_dim,), jnp.float32),
        "norm_b": jnp.zeros((embed_dim,), jnp.float32),
        "blocks": [],
    }
    for i in range(depth):
        bk = jax.random.split(keys[3 + i], 4)
        params["blocks"].append({
            "ln1_g": jnp.ones((embed_dim,), jnp.float32),
            "ln1_b": jnp.zeros((embed_dim,), jnp.float32),
            "qkv_w": xavier_uniform(bk[0], embed_dim, 3 * embed_dim),
            "qkv_b": jnp.zeros((3 * embed_dim,), jnp.float32),
            "proj_w": xavier_uniform(bk[1], embed_dim, embed_dim),
            "proj_b": jnp.zeros((embed_dim,), jnp.float32),
            "ln2_g": jnp.ones((embed_dim,), jnp.float32),
            "ln2_b": jnp.zeros((embed_dim,), jnp.float32),
            "fc1_w": xavier_uniform(bk[2], embed_dim, hidden),
            "fc1_b": jnp.zeros((hidden,), jnp.float32),
            "fc2_w": xavier_uniform(bk[3], hidden, embed_dim),
            "fc2_b": jnp.zeros((embed_dim,), jnp.float32),
        })
    return params


# --------------------------------------------------------------------------- #
# Forward pass (glue in plain JAX; the hot path is the fused per-layer kernel)
# --------------------------------------------------------------------------- #
def random_patch_dropout_sync(x, mask_ratio, key):
    """RandomPatchDropout with sync_mask=True: identical patch mask across channels."""
    B, C, P, D = x.shape
    len_keep = int(P * (1.0 - mask_ratio))
    noise = jax.random.uniform(key, (B, P))
    ids_shuffle = jnp.argsort(noise, axis=-1)
    ids_restore = jnp.argsort(ids_shuffle, axis=-1)
    ids_keep = ids_shuffle[:, :len_keep]
    gather_idx = jnp.broadcast_to(ids_keep[:, None, :, None], (B, C, len_keep, D))
    x_keep = jnp.take_along_axis(x, gather_idx, axis=2)
    mask = jnp.ones((B, P), jnp.float32).at[:, :len_keep].set(0.0)
    mask = jnp.take_along_axis(mask, ids_restore, axis=-1)
    return (x_keep,
            jnp.broadcast_to(ids_restore[:, None], (B, C, P)),
            jnp.broadcast_to(mask[:, None], (B, C, P)),
            jnp.broadcast_to(ids_keep[:, None], (B, C, len_keep)))


def masked_encoder_forward(params, data, mask_key, *, patch_size, num_heads,
                           mask_ratio, training=True):
    imgs = data["inputs"]                              # (B, C, H, W)
    chan_idx = data["inputs_channel_idx"]              # (B, C) int
    B, C, H, W = imgs.shape
    p = patch_size
    hp, wp = H // p, W // p
    P = hp * wp
    D = params["proj"]["w"].shape[1]

    # ---- ContextPatchEmbed: per-channel patchify + shared projection ----
    # K=16 projection stays in plain JAX: a Pallas launch + DMA costs more than the math.
    # TODO(synk): exact ContextPatchEmbed source not provided; modeled as a shared
    # per-channel patch projection plus a channel-context embedding lookup, and
    # sample_chans (random channel sub-sampling) is not applied, so target_imgs == imgs.
    patches = imgs.reshape(B, C, hp, p, wp, p).transpose(0, 1, 2, 4, 3, 5)
    patches = patches.reshape(B, C, P, p * p)
    tok = jnp.einsum("bcpk,kd->bcpd", patches, params["proj"]["w"]) + params["proj"]["b"]
    tok = tok + params["chan_embed"][chan_idx][:, :, None, :]

    # ---- pos embed + random (sync) patch dropout ----
    pos = params["pos_embed"]                          # (1, P+1, D)
    x = tok + pos[:, 1:][:, None]
    if training and mask_ratio > 0.0:
        x, ids_restore, mask, ids_keep = random_patch_dropout_sync(x, mask_ratio, mask_key)
    else:
        ids = jnp.broadcast_to(jnp.arange(P)[None, None], (B, C, P))
        ids_restore, ids_keep = ids, ids
        mask = jnp.zeros((B, C, P), jnp.float32)
    len_keep = x.shape[2]

    x = x.reshape(B, C * len_keep, D)
    cls = params["cls_token"] + pos[:, :1]
    x = jnp.concatenate([jnp.broadcast_to(cls, (B, 1, D)), x], axis=1)

    # pad the token axis once to a sublane multiple (16 for bf16 MXU inputs);
    # padded key rows are masked inside attention, padded activations are
    # sliced off at the end and excluded from pooling.
    S = x.shape[1]
    Sp = _round_up(S, _SUBLANE_PAD)
    if Sp != S:
        x = jnp.pad(x, ((0, 0), (0, Sp - S), (0, 0)))

    # ---- transformer blocks: one fused pallas_call per layer ----
    for blk in params["blocks"]:
        x = transformer_block_pallas(x, blk, num_heads=num_heads, seq_len=S)

    # ---- fused final norm + 'avg' pooling + pooled norm; head = Identity ----
    x, embeddings = final_norm_pool_pallas(x, params["norm_g"], params["norm_b"],
                                           seq_len=S)
    x = x[:, :S]

    sub_chans = C
    target_imgs = imgs
    return x, ids_restore, mask, sub_chans, target_imgs, embeddings


# --------------------------------------------------------------------------- #
if __name__ == "__main__":
    # small config consistent with the module (TPU-friendly feature dims)
    img_size = 16
    patch_size = 4          # -> num_patches = 16
    in_chans = 2
    embed_dim = 128
    depth = 2
    num_heads = 4           # head_dim = 32
    mlp_ratio = 4.0         # hidden = 512
    mask_ratio = 0.5        # len_keep = 8
    B = 2

    key = jax.random.PRNGKey(0)
    kp, kx, km = jax.random.split(key, 3)

    params = init_params(kp, img_size=img_size, patch_size=patch_size,
                         in_chans=in_chans, embed_dim=embed_dim, depth=depth,
                         num_heads=num_heads, mlp_ratio=mlp_ratio)

    imgs = jax.random.normal(kx, (B, in_chans, img_size, img_size), jnp.float32)
    data = {"inputs": imgs,
            "inputs_channel_idx": jnp.tile(jnp.arange(in_chans)[None], (B, 1))}

    fwd = jax.jit(functools.partial(masked_encoder_forward,
                                    patch_size=patch_size, num_heads=num_heads,
                                    mask_ratio=mask_ratio, training=True))
    x, ids_restore, mask, sub_chans, target_imgs, embeddings = fwd(params, data, km)
    jax.block_until_ready((x, ids_restore, mask, target_imgs, embeddings))

    P = (img_size // patch_size) ** 2
    len_keep = int(P * (1.0 - mask_ratio))
    S = 1 + in_chans * len_keep
    assert x.shape == (B, S, embed_dim), x.shape
    assert ids_restore.shape == (B, in_chans, P), ids_restore.shape
    assert mask.shape == (B, in_chans, P), mask.shape
    assert embeddings.shape == (B, embed_dim), embeddings.shape
    assert target_imgs.shape == imgs.shape
    assert int(sub_chans) == in_chans
    assert bool(jnp.all(jnp.isfinite(x)))
    assert bool(jnp.all(jnp.isfinite(embeddings)))
    print("KERNEL_OK")
</pallas_src>

<mosaic_0001>
module attributes {stable_mosaic.version = 11 : i64} {
  func.func @_block_kernel(%arg0: i32, %arg1: memref<1x32x128xf32, #tpu.memory_space<vmem>>, %arg2: memref<1x128xf32, #tpu.memory_space<vmem>>, %arg3: memref<1x128xf32, #tpu.memory_space<vmem>>, %arg4: memref<128x384xf32, #tpu.memory_space<vmem>>, %arg5: memref<1x384xf32, #tpu.memory_space<vmem>>, %arg6: memref<128x128xf32, #tpu.memory_space<vmem>>, %arg7: memref<1x128xf32, #tpu.memory_space<vmem>>, %arg8: memref<1x128xf32, #tpu.memory_space<vmem>>, %arg9: memref<1x128xf32, #tpu.memory_space<vmem>>, %arg10: memref<128x512xf32, #tpu.memory_space<vmem>>, %arg11: memref<1x512xf32, #tpu.memory_space<vmem>>, %arg12: memref<512x128xf32, #tpu.memory_space<vmem>>, %arg13: memref<1x128xf32, #tpu.memory_space<vmem>>, %arg14: memref<1x32x128xf32, #tpu.memory_space<vmem>>, %arg15: memref<32x128xf32, #tpu.memory_space<vmem>>) attributes {dimension_semantics = [#tpu.dimension_semantics<parallel>], iteration_bounds = array<i64: 2>, scalar_prefetch = 0 : i64, scratch_operands = 1 : i64, tpu.core_type = #tpu.core_type<tc>, window_params = [{transform_indices = @transform_0, window_bounds = array<i64: 1, 32, 128>}, {pipeline_mode = #tpu.pipeline_mode<synchronous>, transform_indices = @transform_1, window_bounds = array<i64: 1, 128>}, {pipeline_mode = #tpu.pipeline_mode<synchronous>, transform_indices = @transform_2, window_bounds = array<i64: 1, 128>}, {pipeline_mode = #tpu.pipeline_mode<synchronous>, transform_indices = @transform_3, window_bounds = array<i64: 128, 384>}, {pipeline_mode = #tpu.pipeline_mode<synchronous>, transform_indices = @transform_4, window_bounds = array<i64: 1, 384>}, {pipeline_mode = #tpu.pipeline_mode<synchronous>, transform_indices = @transform_5, window_bounds = array<i64: 128, 128>}, {pipeline_mode = #tpu.pipeline_mode<synchronous>, transform_indices = @transform_6, window_bounds = array<i64: 1, 128>}, {pipeline_mode = #tpu.pipeline_mode<synchronous>, transform_indices = @transform_7, window_bounds = array<i64: 1, 128>}, {pipeline_mode = #tpu.pipeline_mode<synchronous>, transform_indices = @transform_8, window_bounds = array<i64: 1, 128>}, {pipeline_mode = #tpu.pipeline_mode<synchronous>, transform_indices = @transform_9, window_bounds = array<i64: 128, 512>}, {pipeline_mode = #tpu.pipeline_mode<synchronous>, transform_indices = @transform_10, window_bounds = array<i64: 1, 512>}, {pipeline_mode = #tpu.pipeline_mode<synchronous>, transform_indices = @transform_11, window_bounds = array<i64: 512, 128>}, {pipeline_mode = #tpu.pipeline_mode<synchronous>, transform_indices = @transform_12, window_bounds = array<i64: 1, 128>}, {transform_indices = @transform_13, window_bounds = array<i64: 1, 32, 128>}]} {
    %c0 = arith.constant 0 : index
    %c0_0 = arith.constant 0 : index
    %c0_1 = arith.constant 0 : index
    %0 = vector.load %arg1[%c0, %c0_0, %c0_1] : memref<1x32x128xf32, #tpu.memory_space<vmem>>, vector<1x32x128xf32>
    %1 = vector.shape_cast %0 : vector<1x32x128xf32> to vector<32x128xf32>
    %c0_2 = arith.constant 0 : index
    %c0_3 = arith.constant 0 : index
    %2 = vector.load %arg2[%c0_2, %c0_3] : memref<1x128xf32, #tpu.memory_space<vmem>>, vector<1x128xf32>
    %c0_4 = arith.constant 0 : index
    %c0_5 = arith.constant 0 : index
    %3 = vector.load %arg3[%c0_4, %c0_5] : memref<1x128xf32, #tpu.memory_space<vmem>>, vector<1x128xf32>
    %cst = arith.constant dense<0.000000e+00> : vector<32xf32>
    %4 = vector.multi_reduction <add>, %1, %cst [1] : vector<32x128xf32> to vector<32xf32>
    %5 = vector.shape_cast %4 : vector<32xf32> to vector<32x1xf32>
    %cst_6 = arith.constant 1.280000e+02 : f32
    %6 = vector.broadcast %cst_6 : f32 to vector<32x1xf32>
    %7 = arith.divf %5, %6 : vector<32x1xf32>
    %8 = vector.broadcast %7 : vector<32x1xf32> to vector<32x128xf32>
    %9 = arith.subf %1, %8 : vector<32x128xf32>
    %10 = arith.mulf %9, %9 : vector<32x128xf32>
    %cst_7 = arith.constant dense<0.000000e+00> : vector<32xf32>
    %11 = vector.multi_reduction <add>, %10, %cst_7 [1] : vector<32x128xf32> to vector<32xf32>
    %12 = vector.shape_cast %11 : vector<32xf32> to vector<32x1xf32>
    %cst_8 = arith.constant 1.280000e+02 : f32
    %13 = vector.broadcast %cst_8 : f32 to vector<32x1xf32>
    %14 = arith.divf %12, %13 : vector<32x1xf32>
    %cst_9 = arith.constant 9.99999997E-7 : f32
    %15 = vector.broadcast %cst_9 : f32 to vector<32x1xf32>
    %16 = arith.addf %14, %15 : vector<32x1xf32>
    %17 = math.rsqrt %16 : vector<32x1xf32>
    %18 = vector.broadcast %17 : vector<32x1xf32> to vector<32x128xf32>
    %19 = arith.mulf %9, %18 : vector<32x128xf32>
    %20 = vector.broadcast %2 : vector<1x128xf32> to vector<32x128xf32>
    %21 = arith.mulf %19, %20 : vector<32x128xf32>
    %22 = vector.broadcast %3 : vector<1x128xf32> to vector<32x128xf32>
    %23 = arith.addf %21, %22 : vector<32x128xf32>
    %c0_10 = arith.constant 0 : index
    %c0_11 = arith.constant 0 : index
    %24 = vector.load %arg4[%c0_10, %c0_11] : memref<128x384xf32, #tpu.memory_space<vmem>>, vector<128x384xf32>
    %25 = arith.truncf %23 : vector<32x128xf32> to vector<32x128xbf16>
    %26 = arith.truncf %24 : vector<128x384xf32> to vector<128x384xbf16>
    %cst_12 = arith.constant dense<0.000000e+00> : vector<32x384xf32>
    %27 = tpu.matmul %25, %26, %cst_12 {dimension_numbers = #tpu.dot_dimension_numbers<[1], [0], [0], [1], [0, 0, 1, 1], [], []>} : vector<32x128xbf16>, vector<128x384xbf16>, vector<32x384xf32> -> vector<32x384xf32>
    %c0_13 = arith.constant 0 : index
    %c0_14 = arith.constant 0 : index
    %28 = vector.load %arg5[%c0_13, %c0_14] : memref<1x384xf32, #tpu.memory_space<vmem>>, vector<1x384xf32>
    %29 = vector.broadcast %28 : vector<1x384xf32> to vector<32x384xf32>
    %30 = arith.addf %27, %29 : vector<32x384xf32>
    %31 = tpu.iota {dimensions = array<i32: 1>} : vector<1x32xi32>
    %c17_i32 = arith.constant 17 : i32
    %32 = vector.broadcast %c17_i32 : i32 to vector<1x32xi32>
    %33 = arith.cmpi slt, %31, %32 : vector<1x32xi32>
    %34 = vector.extract_strided_slice %30 {offsets = [0, 0], sizes = [32, 32], strides = [1, 1]} : vector<32x384xf32> to vector<32x32xf32>
    %35 = vector.extract_strided_slice %30 {offsets = [0, 128], sizes = [32, 32], strides = [1, 1]} : vector<32x384xf32> to vector<32x32xf32>
    %36 = vector.extract_strided_slice %30 {offsets = [0, 256], sizes = [32, 32], strides = [1, 1]} : vector<32x384xf32> to vector<32x32xf32>
    %37 = arith.truncf %34 : vector<32x32xf32> to vector<32x32xbf16>
    %38 = arith.truncf %35 : vector<32x32xf32> to vector<32x32xbf16>
    %cst_15 = arith.constant dense<0.000000e+00> : vector<32x32xf32>
    %39 = tpu.matmul %37, %38, %cst_15 {dimension_numbers = #tpu.dot_dimension_numbers<[1], [1], [0], [0], [0, 0, 1, 0], [], []>} : vector<32x32xbf16>, vector<32x32xbf16>, vector<32x32xf32> -> vector<32x32xf32>
    %cst_16 = arith.constant 0.176776692 : f32
    %40 = vector.broadcast %cst_16 : f32 to vector<32x32xf32>
    %41 = arith.mulf %39, %40 : vector<32x32xf32>
    %cst_17 = arith.constant -1.000000e+30 : f32
    %42 = vector.shape_cast %33 : vector<1x32xi1> to vector<1x32xi1>
    %43 = vector.broadcast %42 : vector<1x32xi1> to vector<32x32xi1>
    %44 = vector.broadcast %cst_17 : f32 to vector<32x32xf32>
    %45 = arith.select %43, %41, %44 : vector<32x32xi1>, vector<32x32xf32>
    %cst_18 = arith.constant dense<0xFF800000> : vector<32xf32>
    %46 = vector.multi_reduction <maximumf>, %45, %cst_18 [1] : vector<32x32xf32> to vector<32xf32>
    %47 = vector.shape_cast %46 : vector<32xf32> to vector<32x1xf32>
    %48 = vector.broadcast %47 : vector<32x1xf32> to vector<32x32xf32>
    %49 = arith.subf %45, %48 : vector<32x32xf32>
    %50 = math.exp %49 : vector<32x32xf32>
    %cst_19 = arith.constant dense<0.000000e+00> : vector<32xf32>
    %51 = vector.multi_reduction <add>, %50, %cst_19 [1] : vector<32x32xf32> to vector<32xf32>
    %52 = vector.shape_cast %51 : vector<32xf32> to vector<32x1xf32>
    %53 = tpu.reciprocal %52 {approx = true} : vector<32x1xf32> -> vector<32x1xf32>
    %54 = arith.mulf %52, %53 : vector<32x1xf32>
    %cst_20 = arith.constant 2.000000e+00 : f32
    %55 = vector.broadcast %cst_20 : f32 to vector<32x1xf32>
    %56 = arith.subf %55, %54 : vector<32x1xf32>
    %57 = arith.mulf %53, %56 : vector<32x1xf32>
    %58 = arith.truncf %50 : vector<32x32xf32> to vector<32x32xbf16>
    %59 = arith.truncf %36 : vector<32x32xf32> to vector<32x32xbf16>
    %cst_21 = arith.constant dense<0.000000e+00> : vector<32x32xf32>
    %60 = tpu.matmul %58, %59, %cst_21 {dimension_numbers = #tpu.dot_dimension_numbers<[1], [0], [0], [1], [0, 0, 1, 1], [], []>} : vector<32x32xbf16>, vector<32x32xbf16>, vector<32x32xf32> -> vector<32x32xf32>
    %61 = vector.broadcast %57 : vector<32x1xf32> to vector<32x32xf32>
    %62 = arith.mulf %60, %61 : vector<32x32xf32>
    %c0_22 = arith.constant 0 : index
    %c0_23 = arith.constant 0 : index
    %63 = vector.load %arg15[%c0_22, %c0_23] : memref<32x128xf32, #tpu.memory_space<vmem>>, vector<32x32xf32>
    tpu.vector_store %arg15[%c0_22, %c0_23], %62 {strides = array<i32>} : memref<32x128xf32, #tpu.memory_space<vmem>>, vector<32x32xf32>,
    %64 = vector.extract_strided_slice %30 {offsets = [0, 32], sizes = [32, 32], strides = [1, 1]} : vector<32x384xf32> to vector<32x32xf32>
    %65 = vector.extract_strided_slice %30 {offsets = [0, 160], sizes = [32, 32], strides = [1, 1]} : vector<32x384xf32> to vector<32x32xf32>
    %66 = vector.extract_strided_slice %30 {offsets = [0, 288], sizes = [32, 32], strides = [1, 1]} : vector<32x384xf32> to vector<32x32xf32>
    %67 = arith.truncf %64 : vector<32x32xf32> to vector<32x32xbf16>
    %68 = arith.truncf %65 : vector<32x32xf32> to vector<32x32xbf16>
    %cst_24 = arith.constant dense<0.000000e+00> : vector<32x32xf32>
    %69 = tpu.matmul %67, %68, %cst_24 {dimension_numbers = #tpu.dot_dimension_numbers<[1], [1], [0], [0], [0, 0, 1, 0], [], []>} : vector<32x32xbf16>, vector<32x32xbf16>, vector<32x32xf32> -> vector<32x32xf32>
    %cst_25 = arith.constant 0.176776692 : f32
    %70 = vector.broadcast %cst_25 : f32 to vector<32x32xf32>
    %71 = arith.mulf %69, %70 : vector<32x32xf32>
    %cst_26 = arith.constant -1.000000e+30 : f32
    %72 = vector.shape_cast %33 : vector<1x32xi1> to vector<1x32xi1>
    %73 = vector.broadcast %72 : vector<1x32xi1> to vector<32x32xi1>
    %74 = vector.broadcast %cst_26 : f32 to vector<32x32xf32>
    %75 = arith.select %73, %71, %74 : vector<32x32xi1>, vector<32x32xf32>
    %cst_27 = arith.constant dense<0xFF800000> : vector<32xf32>
    %76 = vector.multi_reduction <maximumf>, %75, %cst_27 [1] : vector<32x32xf32> to vector<32xf32>
    %77 = vector.shape_cast %76 : vector<32xf32> to vector<32x1xf32>
    %78 = vector.broadcast %77 : vector<32x1xf32> to vector<32x32xf32>
    %79 = arith.subf %75, %78 : vector<32x32xf32>
    %80 = math.exp %79 : vector<32x32xf32>
    %cst_28 = arith.constant dense<0.000000e+00> : vector<32xf32>
    %81 = vector.multi_reduction <add>, %80, %cst_28 [1] : vector<32x32xf32> to vector<32xf32>
    %82 = vector.shape_cast %81 : vector<32xf32> to vector<32x1xf32>
    %83 = tpu.reciprocal %82 {approx = true} : vector<32x1xf32> -> vector<32x1xf32>
    %84 = arith.mulf %82, %83 : vector<32x1xf32>
    %cst_29 = arith.constant 2.000000e+00 : f32
    %85 = vector.broadcast %cst_29 : f32 to vector<32x1xf32>
    %86 = arith.subf %85, %84 : vector<32x1xf32>
    %87 = arith.mulf %83, %86 : vector<32x1xf32>
    %88 = arith.truncf %80 : vector<32x32xf32> to vector<32x32xbf16>
    %89 = arith.truncf %66 : vector<32x32xf32> to vector<32x32xbf16>
    %cst_30 = arith.constant dense<0.000000e+00> : vector<32x32xf32>
    %90 = tpu.matmul %88, %89, %cst_30 {dimension_numbers = #tpu.dot_dimension_numbers<[1], [0], [0], [1], [0, 0, 1, 1], [], []>} : vector<32x32xbf16>, vector<32x32xbf16>, vector<32x32xf32> -> vector<32x32xf32>
    %91 = vector.broadcast %87 : vector<32x1xf32> to vector<32x32xf32>
    %92 = arith.mulf %90, %91 : vector<32x32xf32>
    %c0_31 = arith.constant 0 : index
    %c32 = arith.constant 32 : index
    %93 = vector.load %arg15[%c0_31, %c32] : memref<32x128xf32, #tpu.memory_space<vmem>>, vector<32x32xf32>
    tpu.vector_store %arg15[%c0_31, %c32], %92 {strides = array<i32>} : memref<32x128xf32, #tpu.memory_space<vmem>>, vector<32x32xf32>,
    %94 = vector.extract_strided_slice %30 {offsets = [0, 64], sizes = [32, 32], strides = [1, 1]} : vector<32x384xf32> to vector<32x32xf32>
    %95 = vector.extract_strided_slice %30 {offsets = [0, 192], sizes = [32, 32], strides = [1, 1]} : vector<32x384xf32> to vector<32x32xf32>
    %96 = vector.extract_strided_slice %30 {offsets = [0, 320], sizes = [32, 32], strides = [1, 1]} : vector<32x384xf32> to vector<32x32xf32>
    %97 = arith.truncf %94 : vector<32x32xf32> to vector<32x32xbf16>
    %98 = arith.truncf %95 : vector<32x32xf32> to vector<32x32xbf16>
    %cst_32 = arith.constant dense<0.000000e+00> : vector<32x32xf32>
    %99 = tpu.matmul %97, %98, %cst_32 {dimension_numbers = #tpu.dot_dimension_numbers<[1], [1], [0], [0], [0, 0, 1, 0], [], []>} : vector<32x32xbf16>, vector<32x32xbf16>, vector<32x32xf32> -> vector<32x32xf32>
    %cst_33 = arith.constant 0.176776692 : f32
    %100 = vector.broadcast %cst_33 : f32 to vector<32x32xf32>
    %101 = arith.mulf %99, %100 : vector<32x32xf32>
    %cst_34 = arith.constant -1.000000e+30 : f32
    %102 = vector.shape_cast %33 : vector<1x32xi1> to vector<1x32xi1>
    %103 = vector.broadcast %102 : vector<1x32xi1> to vector<32x32xi1>
    %104 = vector.broadcast %cst_34 : f32 to vector<32x32xf32>
    %105 = arith.select %103, %101, %104 : vector<32x32xi1>, vector<32x32xf32>
    %cst_35 = arith.constant dense<0xFF800000> : vector<32xf32>
    %106 = vector.multi_reduction <maximumf>, %105, %cst_35 [1] : vector<32x32xf32> to vector<32xf32>
    %107 = vector.shape_cast %106 : vector<32xf32> to vector<32x1xf32>
    %108 = vector.broadcast %107 : vector<32x1xf32> to vector<32x32xf32>
    %109 = arith.subf %105, %108 : vector<32x32xf32>
    %110 = math.exp %109 : vector<32x32xf32>
    %cst_36 = arith.constant dense<0.000000e+00> : vector<32xf32>
    %111 = vector.multi_reduction <add>, %110, %cst_36 [1] : vector<32x32xf32> to vector<32xf32>
    %112 = vector.shape_cast %111 : vector<32xf32> to vector<32x1xf32>
    %113 = tpu.reciprocal %112 {approx = true} : vector<32x1xf32> -> vector<32x1xf32>
    %114 = arith.mulf %112, %113 : vector<32x1xf32>
    %cst_37 = arith.constant 2.000000e+00 : f32
    %115 = vector.broadcast %cst_37 : f32 to vector<32x1xf32>
    %116 = arith.subf %115, %114 : vector<32x1xf32>
    %117 = arith.mulf %113, %116 : vector<32x1xf32>
    %118 = arith.truncf %110 : vector<32x32xf32> to vector<32x32xbf16>
    %119 = arith.truncf %96 : vector<32x32xf32> to vector<32x32xbf16>
    %cst_38 = arith.constant dense<0.000000e+00> : vector<32x32xf32>
    %120 = tpu.matmul %118, %119, %cst_38 {dimension_numbers = #tpu.dot_dimension_numbers<[1], [0], [0], [1], [0, 0, 1, 1], [], []>} : vector<32x32xbf16>, vector<32x32xbf16>, vector<32x32xf32> -> vector<32x32xf32>
    %121 = vector.broadcast %117 : vector<32x1xf32> to vector<32x32xf32>
    %122 = arith.mulf %120, %121 : vector<32x32xf32>
    %c0_39 = arith.constant 0 : index
    %c64 = arith.constant 64 : index
    %123 = vector.load %arg15[%c0_39, %c64] : memref<32x128xf32, #tpu.memory_space<vmem>>, vector<32x32xf32>
    tpu.vector_store %arg15[%c0_39, %c64], %122 {strides = array<i32>} : memref<32x128xf32, #tpu.memory_space<vmem>>, vector<32x32xf32>,
    %124 = vector.extract_strided_slice %30 {offsets = [0, 96], sizes = [32, 32], strides = [1, 1]} : vector<32x384xf32> to vector<32x32xf32>
    %125 = vector.extract_strided_slice %30 {offsets = [0, 224], sizes = [32, 32], strides = [1, 1]} : vector<32x384xf32> to vector<32x32xf32>
    %126 = vector.extract_strided_slice %30 {offsets = [0, 352], sizes = [32, 32], strides = [1, 1]} : vector<32x384xf32> to vector<32x32xf32>
    %127 = arith.truncf %124 : vector<32x32xf32> to vector<32x32xbf16>
    %128 = arith.truncf %125 : vector<32x32xf32> to vector<32x32xbf16>
    %cst_40 = arith.constant dense<0.000000e+00> : vector<32x32xf32>
    %129 = tpu.matmul %127, %128, %cst_40 {dimension_numbers = #tpu.dot_dimension_numbers<[1], [1], [0], [0], [0, 0, 1, 0], [], []>} : vector<32x32xbf16>, vector<32x32xbf16>, vector<32x32xf32> -> vector<32x32xf32>
    %cst_41 = arith.constant 0.176776692 : f32
    %130 = vector.broadcast %cst_41 : f32 to vector<32x32xf32>
    %131 = arith.mulf %129, %130 : vector<32x32xf32>
    %cst_42 = arith.constant -1.000000e+30 : f32
    %132 = vector.shape_cast %33 : vector<1x32xi1> to vector<1x32xi1>
    %133 = vector.broadcast %132 : vector<1x32xi1> to vector<32x32xi1>
    %134 = vector.broadcast %cst_42 : f32 to vector<32x32xf32>
    %135 = arith.select %133, %131, %134 : vector<32x32xi1>, vector<32x32xf32>
    %cst_43 = arith.constant dense<0xFF800000> : vector<32xf32>
    %136 = vector.multi_reduction <maximumf>, %135, %cst_43 [1] : vector<32x32xf32> to vector<32xf32>
    %137 = vector.shape_cast %136 : vector<32xf32> to vector<32x1xf32>
    %138 = vector.broadcast %137 : vector<32x1xf32> to vector<32x32xf32>
    %139 = arith.subf %135, %138 : vector<32x32xf32>
    %140 = math.exp %139 : vector<32x32xf32>
    %cst_44 = arith.constant dense<0.000000e+00> : vector<32xf32>
    %141 = vector.multi_reduction <add>, %140, %cst_44 [1] : vector<32x32xf32> to vector<32xf32>
    %142 = vector.shape_cast %141 : vector<32xf32> to vector<32x1xf32>
    %143 = tpu.reciprocal %142 {approx = true} : vector<32x1xf32> -> vector<32x1xf32>
    %144 = arith.mulf %142, %143 : vector<32x1xf32>
    %cst_45 = arith.constant 2.000000e+00 : f32
    %145 = vector.broadcast %cst_45 : f32 to vector<32x1xf32>
    %146 = arith.subf %145, %144 : vector<32x1xf32>
    %147 = arith.mulf %143, %146 : vector<32x1xf32>
    %148 = arith.truncf %140 : vector<32x32xf32> to vector<32x32xbf16>
    %149 = arith.truncf %126 : vector<32x32xf32> to vector<32x32xbf16>
    %cst_46 = arith.constant dense<0.000000e+00> : vector<32x32xf32>
    %150 = tpu.matmul %148, %149, %cst_46 {dimension_numbers = #tpu.dot_dimension_numbers<[1], [0], [0], [1], [0, 0, 1, 1], [], []>} : vector<32x32xbf16>, vector<32x32xbf16>, vector<32x32xf32> -> vector<32x32xf32>
    %151 = vector.broadcast %147 : vector<32x1xf32> to vector<32x32xf32>
    %152 = arith.mulf %150, %151 : vector<32x32xf32>
    %c0_47 = arith.constant 0 : index
    %c96 = arith.constant 96 : index
    %153 = vector.load %arg15[%c0_47, %c96] : memref<32x128xf32, #tpu.memory_space<vmem>>, vector<32x32xf32>
    tpu.vector_store %arg15[%c0_47, %c96], %152 {strides = array<i32>} : memref<32x128xf32, #tpu.memory_space<vmem>>, vector<32x32xf32>,
    %c0_48 = arith.constant 0 : index
    %c0_49 = arith.constant 0 : index
    %154 = vector.load %arg15[%c0_48, %c0_49] : memref<32x128xf32, #tpu.memory_space<vmem>>, vector<32x128xf32>
    %c0_50 = arith.constant 0 : index
    %c0_51 = arith.constant 0 : index
    %155 = vector.load %arg6[%c0_50, %c0_51] : memref<128x128xf32, #tpu.memory_space<vmem>>, vector<128x128xf32>
    %156 = arith.truncf %154 : vector<32x128xf32> to vector<32x128xbf16>
    %157 = arith.truncf %155 : vector<128x128xf32> to vector<128x128xbf16>
    %cst_52 = arith.constant dense<0.000000e+00> : vector<32x128xf32>
    %158 = tpu.matmul %156, %157, %cst_52 {dimension_numbers = #tpu.dot_dimension_numbers<[1], [0], [0], [1], [0, 0, 1, 1], [], []>} : vector<32x128xbf16>, vector<128x128xbf16>, vector<32x128xf32> -> vector<32x128xf32>
    %159 = arith.addf %1, %158 : vector<32x128xf32>
    %c0_53 = arith.constant 0 : index
    %c0_54 = arith.constant 0 : index
    %160 = vector.load %arg7[%c0_53, %c0_54] : memref<1x128xf32, #tpu.memory_space<vmem>>, vector<1x128xf32>
    %161 = vector.broadcast %160 : vector<1x128xf32> to vector<32x128xf32>
    %162 = arith.addf %159, %161 : vector<32x128xf32>
    %c0_55 = arith.constant 0 : index
    %c0_56 = arith.constant 0 : index
    %163 = vector.load %arg8[%c0_55, %c0_56] : memref<1x128xf32, #tpu.memory_space<vmem>>, vector<1x128xf32>
    %c0_57 = arith.constant 0 : index
    %c0_58 = arith.constant 0 : index
    %164 = vector.load %arg9[%c0_57, %c0_58] : memref<1x128xf32, #tpu.memory_space<vmem>>, vector<1x128xf32>
    %cst_59 = arith.constant dense<0.000000e+00> : vector<32xf32>
    %165 = vector.multi_reduction <add>, %162, %cst_59 [1] : vector<32x128xf32> to vector<32xf32>
    %166 = vector.shape_cast %165 : vector<32xf32> to vector<32x1xf32>
    %cst_60 = arith.constant 1.280000e+02 : f32
    %167 = vector.broadcast %cst_60 : f32 to vector<32x1xf32>
    %168 = arith.divf %166, %167 : vector<32x1xf32>
    %169 = vector.broadcast %168 : vector<32x1xf32> to vector<32x128xf32>
    %170 = arith.subf %162, %169 : vector<32x128xf32>
    %171 = arith.mulf %170, %170 : vector<32x128xf32>
    %cst_61 = arith.constant dense<0.000000e+00> : vector<32xf32>
    %172 = vector.multi_reduction <add>, %171, %cst_61 [1] : vector<32x128xf32> to vector<32xf32>
    %173 = vector.shape_cast %172 : vector<32xf32> to vector<32x1xf32>
    %cst_62 = arith.constant 1.280000e+02 : f32
    %174 = vector.broadcast %cst_62 : f32 to vector<32x1xf32>
    %175 = arith.divf %173, %174 : vector<32x1xf32>
    %cst_63 = arith.constant 9.99999997E-7 : f32
    %176 = vector.broadcast %cst_63 : f32 to vector<32x1xf32>
    %177 = arith.addf %175, %176 : vector<32x1xf32>
    %178 = math.rsqrt %177 : vector<32x1xf32>
    %179 = vector.broadcast %178 : vector<32x1xf32> to vector<32x128xf32>
    %180 = arith.mulf %170, %179 : vector<32x128xf32>
    %181 = vector.broadcast %163 : vector<1x128xf32> to vector<32x128xf32>
    %182 = arith.mulf %180, %181 : vector<32x128xf32>
    %183 = vector.broadcast %164 : vector<1x128xf32> to vector<32x128xf32>
    %184 = arith.addf %182, %183 : vector<32x128xf32>
    %c0_64 = arith.constant 0 : index
    %c0_65 = arith.constant 0 : index
    %185 = vector.load %arg10[%c0_64, %c0_65] : memref<128x512xf32, #tpu.memory_space<vmem>>, vector<128x512xf32>
    %186 = arith.truncf %184 : vector<32x128xf32> to vector<32x128xbf16>
    %187 = arith.truncf %185 : vector<128x512xf32> to vector<128x512xbf16>
    %cst_66 = arith.constant dense<0.000000e+00> : vector<32x512xf32>
    %188 = tpu.matmul %186, %187, %cst_66 {dimension_numbers = #tpu.dot_dimension_numbers<[1], [0], [0], [1], [0, 0, 1, 1], [], []>} : vector<32x128xbf16>, vector<128x512xbf16>, vector<32x512xf32> -> vector<32x512xf32>
    %c0_67 = arith.constant 0 : index
    %c0_68 = arith.constant 0 : index
    %189 = vector.load %arg11[%c0_67, %c0_68] : memref<1x512xf32, #tpu.memory_space<vmem>>, vector<1x512xf32>
    %190 = vector.broadcast %189 : vector<1x512xf32> to vector<32x512xf32>
    %191 = arith.addf %188, %190 : vector<32x512xf32>
    %cst_69 = arith.constant 5.000000e-01 : f32
    %192 = vector.broadcast %cst_69 : f32 to vector<32x512xf32>
    %193 = arith.mulf %191, %192 : vector<32x512xf32>
    %cst_70 = arith.constant 0.707106769 : f32
    %194 = vector.broadcast %cst_70 : f32 to vector<32x512xf32>
    %195 = arith.mulf %191, %194 : vector<32x512xf32>
    %cst_71 = arith.constant -4.000000e+00 : f32
    %cst_72 = arith.constant 4.000000e+00 : f32
    %196 = vector.broadcast %cst_71 : f32 to vector<32x512xf32>
    %197 = arith.maximumf %196, %195 : vector<32x512xf32>
    %198 = vector.broadcast %cst_72 : f32 to vector<32x512xf32>
    %199 = arith.minimumf %198, %197 : vector<32x512xf32>
    %200 = arith.mulf %199, %199 : vector<32x512xf32>
    %cst_73 = arith.constant -2.72614237E-10 : f32
    %201 = vector.broadcast %cst_73 : f32 to vector<32x512xf32>
    %202 = arith.mulf %201, %200 : vector<32x512xf32>
    %cst_74 = arith.constant 2.77068146E-8 : f32
    %203 = vector.broadcast %cst_74 : f32 to vector<32x512xf32>
    %204 = arith.addf %202, %203 : vector<32x512xf32>
    %205 = arith.mulf %204, %200 : vector<32x512xf32>
    %cst_75 = arith.constant -2.10102394E-6 : f32
    %206 = vector.broadcast %cst_75 : f32 to vector<32x512xf32>
    %207 = arith.addf %205, %206 : vector<32x512xf32>
    %208 = arith.mulf %207, %200 : vector<32x512xf32>
    %cst_76 = arith.constant -5.69250624E-5 : f32
    %209 = vector.broadcast %cst_76 : f32 to vector<32x512xf32>
    %210 = arith.addf %208, %209 : vector<32x512xf32>
    %211 = arith.mulf %210, %200 : vector<32x512xf32>
    %cst_77 = arith.constant -7.34990637E-4 : f32
    %212 = vector.broadcast %cst_77 : f32 to vector<32x512xf32>
    %213 = arith.addf %211, %212 : vector<32x512xf32>
    %214 = arith.mulf %213, %200 : vector<32x512xf32>
    %cst_78 = arith.constant -0.00295460015 : f32
    %215 = vector.broadcast %cst_78 : f32 to vector<32x512xf32>
    %216 = arith.addf %214, %215 : vector<32x512xf32>
    %217 = arith.mulf %216, %200 : vector<32x512xf32>
    %cst_79 = arith.constant -0.0160960332 : f32
    %218 = vector.broadcast %cst_79 : f32 to vector<32x512xf32>
    %219 = arith.addf %217, %218 : vector<32x512xf32>
    %cst_80 = arith.constant -1.45660715E-5 : f32
    %220 = vector.broadcast %cst_80 : f32 to vector<32x512xf32>
    %221 = arith.mulf %220, %200 : vector<32x512xf32>
    %cst_81 = arith.constant -2.13374049E-4 : f32
    %222 = vector.broadcast %cst_81 : f32 to vector<32x512xf32>
    %223 = arith.addf %221, %222 : vector<32x512xf32>
    %224 = arith.mulf %223, %200 : vector<32x512xf32>
    %cst_82 = arith.constant -0.00168282702 : f32
    %225 = vector.broadcast %cst_82 : f32 to vector<32x512xf32>
    %226 = arith.addf %224, %225 : vector<32x512xf32>
    %227 = arith.mulf %226, %200 : vector<32x512xf32>
    %cst_83 = arith.constant -0.00737332925 : f32
    %228 = vector.broadcast %cst_83 : f32 to vector<32x512xf32>
    %229 = arith.addf %227, %228 : vector<32x512xf32>
    %230 = arith.mulf %229, %200 : vector<32x512xf32>
    %cst_84 = arith.constant -0.0142647391 : f32
    %231 = vector.broadcast %cst_84 : f32 to vector<32x512xf32>
    %232 = arith.addf %230, %231 : vector<32x512xf32>
    %233 = tpu.reciprocal %232 {approx = true} : vector<32x512xf32> -> vector<32x512xf32>
    %234 = arith.mulf %232, %233 : vector<32x512xf32>
    %cst_85 = arith.constant 2.000000e+00 : f32
    %235 = vector.broadcast %cst_85 : f32 to vector<32x512xf32>
    %236 = arith.subf %235, %234 : vector<32x512xf32>
    %237 = arith.mulf %233, %236 : vector<32x512xf32>
    %238 = arith.mulf %199, %219 : vector<32x512xf32>
    %239 = arith.mulf %238, %237 : vector<32x512xf32>
    %cst_86 = arith.constant 1.000000e+00 : f32
    %240 = vector.broadcast %cst_86 : f32 to vector<32x512xf32>
    %241 = arith.addf %240, %239 : vector<32x512xf32>
    %242 = arith.mulf %193, %241 : vector<32x512xf32>
    %c0_87 = arith.constant 0 : index
    %c0_88 = arith.constant 0 : index
    %243 = vector.load %arg12[%c0_87, %c0_88] : memref<512x128xf32, #tpu.memory_space<vmem>>, vector<512x128xf32>
    %244 = arith.truncf %242 : vector<32x512xf32> to vector<32x512xbf16>
    %245 = arith.truncf %243 : vector<512x128xf32> to vector<512x128xbf16>
    %cst_89 = arith.constant dense<0.000000e+00> : vector<32x128xf32>
    %246 = tpu.matmul %244, %245, %cst_89 {dimension_numbers = #tpu.dot_dimension_numbers<[1], [0], [0], [1], [0, 0, 1, 1], [], []>} : vector<32x512xbf16>, vector<512x128xbf16>, vector<32x128xf32> -> vector<32x128xf32>
    %247 = arith.addf %162, %246 : vector<32x128xf32>
    %c0_90 = arith.constant 0 : index
    %c0_91 = arith.constant 0 : index
    %248 = vector.load %arg13[%c0_90, %c0_91] : memref<1x128xf32, #tpu.memory_space<vmem>>, vector<1x128xf32>
    %249 = vector.broadcast %248 : vector<1x128xf32> to vector<32x128xf32>
    %250 = arith.addf %247, %249 : vector<32x128xf32>
    %c0_92 = arith.constant 0 : index
    %c0_93 = arith.constant 0 : index
    %c0_94 = arith.constant 0 : index
    %251 = vector.load %arg14[%c0_92, %c0_93, %c0_94] : memref<1x32x128xf32, #tpu.memory_space<vmem>>, vector<1x32x128xf32>
    %252 = vector.shape_cast %251 : vector<1x32x128xf32> to vector<32x128xf32>
    %253 = vector.shape_cast %250 : vector<32x128xf32> to vector<1x32x128xf32>
    tpu.vector_store %arg14[%c0_92, %c0_93, %c0_94], %253 {strides = array<i32>} : memref<1x32x128xf32, #tpu.memory_space<vmem>>, vector<1x32x128xf32>,
    return
  }
  func.func @transform_0(%arg0: i32) -> (i32, i32, i32) {
    %c0_i32 = arith.constant 0 : i32
    %c0_i32_0 = arith.constant 0 : i32
    %c0_i32_1 = arith.constant 0 : i32
    return %arg0, %c0_i32, %c0_i32_0 : i32, i32, i32
  }
  func.func @transform_1(%arg0: i32) -> (i32, i32) {
    %c0_i32 = arith.constant 0 : i32
    %c0_i32_0 = arith.constant 0 : i32
    %c0_i32_1 = arith.constant 0 : i32
    return %c0_i32, %c0_i32_0 : i32, i32
  }
  func.func @transform_2(%arg0: i32) -> (i32, i32) {
    %c0_i32 = arith.constant 0 : i32
    %c0_i32_0 = arith.constant 0 : i32
    %c0_i32_1 = arith.constant 0 : i32
    return %c0_i32, %c0_i32_0 : i32, i32
  }
  func.func @transform_3(%arg0: i32) -> (i32, i32) {
    %c0_i32 = arith.constant 0 : i32
    %c0_i32_0 = arith.constant 0 : i32
    %c0_i32_1 = arith.constant 0 : i32
    return %c0_i32, %c0_i32_0 : i32, i32
  }
  func.func @transform_4(%arg0: i32) -> (i32, i32) {
    %c0_i32 = arith.constant 0 : i32
    %c0_i32_0 = arith.constant 0 : i32
    %c0_i32_1 = arith.constant 0 : i32
    return %c0_i32, %c0_i32_0 : i32, i32
  }
  func.func @transform_5(%arg0: i32) -> (i32, i32) {
    %c0_i32 = arith.constant 0 : i32
    %c0_i32_0 = arith.constant 0 : i32
    %c0_i32_1 = arith.constant 0 : i32
    return %c0_i32, %c0_i32_0 : i32, i32
  }
  func.func @transform_6(%arg0: i32) -> (i32, i32) {
    %c0_i32 = arith.constant 0 : i32
    %c0_i32_0 = arith.constant 0 : i32
    %c0_i32_1 = arith.constant 0 : i32
    return %c0_i32, %c0_i32_0 : i32, i32
  }
  func.func @transform_7(%arg0: i32) -> (i32, i32) {
    %c0_i32 = arith.constant 0 : i32
    %c0_i32_0 = arith.constant 0 : i32
    %c0_i32_1 = arith.constant 0 : i32
    return %c0_i32, %c0_i32_0 : i32, i32
  }
  func.func @transform_8(%arg0: i32) -> (i32, i32) {
    %c0_i32 = arith.constant 0 : i32
    %c0_i32_0 = arith.constant 0 : i32
    %c0_i32_1 = arith.constant 0 : i32
    return %c0_i32, %c0_i32_0 : i32, i32
  }
  func.func @transform_9(%arg0: i32) -> (i32, i32) {
    %c0_i32 = arith.constant 0 : i32
    %c0_i32_0 = arith.constant 0 : i32
    %c0_i32_1 = arith.constant 0 : i32
    return %c0_i32, %c0_i32_0 : i32, i32
  }
  func.func @transform_10(%arg0: i32) -> (i32, i32) {
    %c0_i32 = arith.constant 0 : i32
    %c0_i32_0 = arith.constant 0 : i32
    %c0_i32_1 = arith.constant 0 : i32
    return %c0_i32, %c0_i32_0 : i32, i32
  }
  func.func @transform_11(%arg0: i32) -> (i32, i32) {
    %c0_i32 = arith.constant 0 : i32
    %c0_i32_0 = arith.constant 0 : i32
    %c0_i32_1 = arith.constant 0 : i32
    return %c0_i32, %c0_i32_0 : i32, i32
  }
  func.func @transform_12(%arg0: i32) -> (i32, i32) {
    %c0_i32 = arith.constant 0 : i32
    %c0_i32_0 = arith.constant 0 : i32
    %c0_i32_1 = arith.constant 0 : i32
    return %c0_i32, %c0_i32_0 : i32, i32
  }
  func.func @transform_13(%arg0: i32) -> (i32, i32, i32) {
    %c0_i32 = arith.constant 0 : i32
    %c0_i32_0 = arith.constant 0 : i32
    %c0_i32_1 = arith.constant 0 : i32
    return %arg0, %c0_i32, %c0_i32_0 : i32, i32, i32
  }
}

module attributes {stable_mosaic.version = 11 : i64} {
  func.func @_final_norm_pool_kernel(%arg0: i32, %arg1: memref<1x32x128xf32, #tpu.memory_space<vmem>>, %arg2: memref<1x128xf32, #tpu.memory_space<vmem>>, %arg3: memref<1x128xf32, #tpu.memory_space<vmem>>, %arg4: memref<1x32x128xf32, #tpu.memory_space<vmem>>, %arg5: memref<1x1x128xf32, #tpu.memory_space<vmem>>) attributes {dimension_semantics = [#tpu.dimension_semantics<parallel>], iteration_bounds = array<i64: 2>, scalar_prefetch = 0 : i64, scratch_operands = 0 : i64, tpu.core_type = #tpu.core_type<tc>, window_params = [{transform_indices = @transform_0, window_bounds = array<i64: 1, 32, 128>}, {pipeline_mode = #tpu.pipeline_mode<synchronous>, transform_indices = @transform_1, window_bounds = array<i64: 1, 128>}, {pipeline_mode = #tpu.pipeline_mode<synchronous>, transform_indices = @transform_2, window_bounds = array<i64: 1, 128>}, {transform_indices = @transform_3, window_bounds = array<i64: 1, 32, 128>}, {transform_indices = @transform_4, window_bounds = array<i64: 1, 1, 128>}]} {
    %c0 = arith.constant 0 : index
    %c0_0 = arith.constant 0 : index
    %c0_1 = arith.constant 0 : index
    %0 = vector.load %arg1[%c0, %c0_0, %c0_1] : memref<1x32x128xf32, #tpu.memory_space<vmem>>, vector<1x32x128xf32>
    %1 = vector.shape_cast %0 : vector<1x32x128xf32> to vector<32x128xf32>
    %c0_2 = arith.constant 0 : index
    %c0_3 = arith.constant 0 : index
    %2 = vector.load %arg2[%c0_2, %c0_3] : memref<1x128xf32, #tpu.memory_space<vmem>>, vector<1x128xf32>
    %c0_4 = arith.constant 0 : index
    %c0_5 = arith.constant 0 : index
    %3 = vector.load %arg3[%c0_4, %c0_5] : memref<1x128xf32, #tpu.memory_space<vmem>>, vector<1x128xf32>
    %cst = arith.constant dense<0.000000e+00> : vector<32xf32>
    %4 = vector.multi_reduction <add>, %1, %cst [1] : vector<32x128xf32> to vector<32xf32>
    %5 = vector.shape_cast %4 : vector<32xf32> to vector<32x1xf32>
    %cst_6 = arith.constant 1.280000e+02 : f32
    %6 = vector.broadcast %cst_6 : f32 to vector<32x1xf32>
    %7 = arith.divf %5, %6 : vector<32x1xf32>
    %8 = vector.broadcast %7 : vector<32x1xf32> to vector<32x128xf32>
    %9 = arith.subf %1, %8 : vector<32x128xf32>
    %10 = arith.mulf %9, %9 : vector<32x128xf32>
    %cst_7 = arith.constant dense<0.000000e+00> : vector<32xf32>
    %11 = vector.multi_reduction <add>, %10, %cst_7 [1] : vector<32x128xf32> to vector<32xf32>
    %12 = vector.shape_cast %11 : vector<32xf32> to vector<32x1xf32>
    %cst_8 = arith.constant 1.280000e+02 : f32
    %13 = vector.broadcast %cst_8 : f32 to vector<32x1xf32>
    %14 = arith.divf %12, %13 : vector<32x1xf32>
    %cst_9 = arith.constant 9.99999997E-7 : f32
    %15 = vector.broadcast %cst_9 : f32 to vector<32x1xf32>
    %16 = arith.addf %14, %15 : vector<32x1xf32>
    %17 = math.rsqrt %16 : vector<32x1xf32>
    %18 = vector.broadcast %17 : vector<32x1xf32> to vector<32x128xf32>
    %19 = arith.mulf %9, %18 : vector<32x128xf32>
    %20 = vector.broadcast %2 : vector<1x128xf32> to vector<32x128xf32>
    %21 = arith.mulf %19, %20 : vector<32x128xf32>
    %22 = vector.broadcast %3 : vector<1x128xf32> to vector<32x128xf32>
    %23 = arith.addf %21, %22 : vector<32x128xf32>
    %c0_10 = arith.constant 0 : index
    %c0_11 = arith.constant 0 : index
    %c0_12 = arith.constant 0 : index
    %24 = vector.load %arg4[%c0_10, %c0_11, %c0_12] : memref<1x32x128xf32, #tpu.memory_space<vmem>>, vector<1x32x128xf32>
    %25 = vector.shape_cast %24 : vector<1x32x128xf32> to vector<32x128xf32>
    %26 = vector.shape_cast %23 : vector<32x128xf32> to vector<1x32x128xf32>
    tpu.vector_store %arg4[%c0_10, %c0_11, %c0_12], %26 {strides = array<i32>} : memref<1x32x128xf32, #tpu.memory_space<vmem>>, vector<1x32x128xf32>,
    %27 = vector.extract_strided_slice %23 {offsets = [1, 0], sizes = [16, 128], strides = [1, 1]} : vector<32x128xf32> to vector<16x128xf32>
    %cst_13 = arith.constant dense<0.000000e+00> : vector<128xf32>
    %28 = vector.multi_reduction <add>, %27, %cst_13 [0] : vector<16x128xf32> to vector<128xf32>
    %29 = vector.shape_cast %28 : vector<128xf32> to vector<1x128xf32>
    %cst_14 = arith.constant 1.600000e+01 : f32
    %30 = vector.broadcast %cst_14 : f32 to vector<1x128xf32>
    %31 = arith.divf %29, %30 : vector<1x128xf32>
    %cst_15 = arith.constant dense<0.000000e+00> : vector<1xf32>
    %32 = vector.multi_reduction <add>, %31, %cst_15 [1] : vector<1x128xf32> to vector<1xf32>
    %33 = vector.shape_cast %32 : vector<1xf32> to vector<1x1xf32>
    %cst_16 = arith.constant 1.280000e+02 : f32
    %34 = vector.broadcast %cst_16 : f32 to vector<1x1xf32>
    %35 = arith.divf %33, %34 : vector<1x1xf32>
    %36 = vector.broadcast %35 : vector<1x1xf32> to vector<1x128xf32>
    %37 = arith.subf %31, %36 : vector<1x128xf32>
    %38 = arith.mulf %37, %37 : vector<1x128xf32>
    %cst_17 = arith.constant dense<0.000000e+00> : vector<1xf32>
    %39 = vector.multi_reduction <add>, %38, %cst_17 [1] : vector<1x128xf32> to vector<1xf32>
    %40 = vector.shape_cast %39 : vector<1xf32> to vector<1x1xf32>
    %cst_18 = arith.constant 1.280000e+02 : f32
    %41 = vector.broadcast %cst_18 : f32 to vector<1x1xf32>
    %42 = arith.divf %40, %41 : vector<1x1xf32>
    %cst_19 = arith.constant 9.99999997E-7 : f32
    %43 = vector.broadcast %cst_19 : f32 to vector<1x1xf32>
    %44 = arith.addf %42, %43 : vector<1x1xf32>
    %45 = math.rsqrt %44 : vector<1x1xf32>
    %46 = vector.broadcast %45 : vector<1x1xf32> to vector<1x128xf32>
    %47 = arith.mulf %37, %46 : vector<1x128xf32>
    %48 = arith.mulf %47, %2 : vector<1x128xf32>
    %49 = arith.addf %48, %3 : vector<1x128xf32>
    %c0_20 = arith.constant 0 : index
    %c0_21 = arith.constant 0 : index
    %c0_22 = arith.constant 0 : index
    %50 = vector.load %arg5[%c0_20, %c0_21, %c0_22] : memref<1x1x128xf32, #tpu.memory_space<vmem>>, vector<1x1x128xf32>
    %51 = vector.shape_cast %50 : vector<1x1x128xf32> to vector<1x128xf32>
    %52 = vector.shape_cast %49 : vector<1x128xf32> to vector<1x1x128xf32>
    tpu.vector_store %arg5[%c0_20, %c0_21, %c0_22], %52 {strides = array<i32>} : memref<1x1x128xf32, #tpu.memory_space<vmem>>, vector<1x1x128xf32>,
    return
  }
  func.func @transform_0(%arg0: i32) -> (i32, i32, i32) {
    %c0_i32 = arith.constant 0 : i32
    %c0_i32_0 = arith.constant 0 : i32
    %c0_i32_1 = arith.constant 0 : i32
    return %arg0, %c0_i32, %c0_i32_0 : i32, i32, i32
  }
  func.func @transform_1(%arg0: i32) -> (i32, i32) {
    %c0_i32 = arith.constant 0 : i32
    %c0_i32_0 = arith.constant 0 : i32
    %c0_i32_1 = arith.constant 0 : i32
    return %c0_i32, %c0_i32_0 : i32, i32
  }
  func.func @transform_2(%arg0: i32) -> (i32, i32) {
    %c0_i32 = arith.constant 0 : i32
    %c0_i32_0 = arith.constant 0 : i32
    %c0_i32_1 = arith.constant 0 : i32
    return %c0_i32, %c0_i32_0 : i32, i32
  }
  func.func @transform_3(%arg0: i32) -> (i32, i32, i32) {
    %c0_i32 = arith.constant 0 : i32
    %c0_i32_0 = arith.constant 0 : i32
    %c0_i32_1 = arith.constant 0 : i32
    return %arg0, %c0_i32, %c0_i32_0 : i32, i32, i32
  }
  func.func @transform_4(%arg0: i32) -> (i32, i32, i32) {
    %c0_i32 = arith.constant 0 : i32
    %c0_i32_0 = arith.constant 0 : i32
    %c0_i32_1 = arith.constant 0 : i32
    return %arg0, %c0_i32, %c0_i32_0 : i32, i32, i32
  }
}

</mosaic_0001>

<bundles_post_ra>
// kernel: masked_encoder_forward.5
= control target key start
LH: loop header
LB: loop body
LE: loop exit
PB: predicated region body
PF: predicated region fallthrough
CT: control target
= control target key end

     0   :  { %10 = vsyncpa [#allocation3], 0  ;;  %s677_s0 = inlined_call_operand.vmem [shape: f32[2,32,128], index: 0, kind: input, shape index: {}]   ;;  %s678_s1 = inlined_call_operand.vmem [shape: f32[1,128], index: 1, kind: input, shape index: {}]   ;;  %s679_s2 = inlined_call_operand.vmem [shape: f32[1,128], index: 2, kind: input, shape index: {}]   ;;  %s680_s3 = inlined_call_operand.vmem [shape: f32[2,32,128], index: 3, kind: output, shape index: {0}]   ;;  %s681_s4 = inlined_call_operand.hbm [shape: f32[2,1,128], index: 4, kind: output, shape index: {1}]  }
   0x1   :  { %12 = vsyncpa [#allocation3 + $0x1], 0  ;;  %s568_s15 = smov 0   ;;  %s570_s16 = smov 0  }
   0x2   :  { %s572_s17 = smov 0   ;;  %s574_s18 = smov 0  }
   0x3 LB: > { %s589_s19 = sadd.s32 4294967295, %s540_s18   ;;  %s418_s20 = sadd.s32 4294967294, %s540_s18   ;;  %s540_s18 = sphi %s574_s18, %s687_s18   ;;  %s536_s17 = sphi %s572_s17, %s686_s17   ;;  %s532_s16 = sphi %s570_s16, %s685_s16   ;;  %s528_s15 = sphi %s568_s15, %s684_s15  }
   0x4   : > { %s593_s21 = sadd.s32 1, %s540_s18   ;;  %s119_s22 = sadd.s32 1, %s536_s17 }
   0x5   : > { %s116_s23 = ssub.s32 %s540_s18, %s593_s21  ;;  %p129_p0 = scmp.ne.s32.totalorder %s536_s17, %s532_s16 }
   0x6   : > { %p117_p1 = scmp.eq.s32.totalorder %s116_s23, 0  ;;  %p130_p2 = scmp.eq.s32.totalorder %s589_s19, 1 }
   0x7   : > { %p135_p3 = scmp.ne.s32.totalorder %s532_s16, %s528_s15  ;;  %p136_p4 = scmp.eq.s32.totalorder %s418_s20, 1 }
   0x8   : > { %s604_s24 = scalar_select %p117_p1, %s536_s17, %s119_s22  }
   0x9   : > { %p606_p5 = por %p130_p2, %p129_p0  ;;  %p610_p6 = por %p136_p4, %p135_p3 }
   0xa   : > { %p421_p7 = scmp.ge.s32.totalorder %s540_s18, 1  ;;  %p168_p8 = scmp.lt.s32.totalorder %s540_s18, 3 }
   0xc   : > { %p169_p9 = pnand %p421_p7, %p168_p8 }
   0xd   : > { %p198_p10 = scmp.lt.s32.totalorder (!%p169_p9), %s589_s19, 1  ;;  %s196_s13 = sand.u32 (!%p169_p9), 1, %s532_s16  }
   0xe   : > { %172 = sbr.rel (%p169_p9) target bundleno = 673 (0x2a1), region = 32  ;;  %s426_s14 = sshll.u32 (!%p169_p9), %s589_s19, 4 }
   0xf   : > { %s197_s20 = scalar_lea.vmem (!%p169_p9), [#allocation2], %s196_s13  ;;  %s323_s29 = scalar_lea.sflag (!%p169_p9), [#allocation3], %s196_s13 }
  0x10   : > { %s338_s22 = sshll.u32 (!%p169_p9), %s197_s20, 4  ;;  %s339_s22 = int_to_ptr.vmem [resolvable:$true] %s338_s22 }
  0x11   : > { %s480_s30 = scalar_lea.vmem (!%p169_p9), %s339_s22, 16 }
  0x12   : > { %p481_p11 = scmp.ne.s32.totalorder (!%p169_p9), %s339_s22, %s480_s30 }
  0x13   : > { %s618_s27 = scalar_select %p198_p10, %s589_s19, 1  ;;  %v260_v23 = vlaneseq  ;;  %v212_v32 = vld [vmem:[%s678_s1] sm:$0x1]  ;;  %vm286_vm0 = vcmask 1046528  }
  0x14   : > { %v213_v33 = vld [vmem:[%s679_s2] sm:$0x1]  ;;  %p482_p12 = pnand %p481_p11, %p606_p5 }
  0x15   : > { %s429_s28 = sshll.u32 %s618_s27, 5  ;;  %v261_v28 = vshrl.u32 %v260_v23, 7 }
  0x16   : > { %s202_s5 = scalar_lea.vmem %s677_s0, %s429_s28  ;;  %s637_s12 = scalar_lea.vmem %s680_s3, %s429_s28 }
  0x17   : > { %v208_v0 = vld [vmem:[%s202_s5] sm:$0xff]  ;;  %v210_v1 = vld [vmem:[%s202_s5 + $0x10] sm:$0xff]  ;;  %v209_v2 = vld [vmem:[%s202_s5 + $0x8] sm:$0xff]  ;;  %v262_v31 = vsub.s32 0, %v261_v28  ;;  %s336_s28 = scalar_lea.hbm %s681_s4, %s426_s14  ;;  %p483_p13 = pneg %p482_p12 }
  0x18   : > { %214 = vadd.xlane.f32.xlu0 %v208_v0  ;;  %218 = vadd.xlane.f32.xlu1 %v210_v1  ;;  %v211_v15 = vld [vmem:[%s202_s5 + $0x18] sm:$0xff]  ;;  %s542_s5 = smov [#allocation2]  }
  0x19   : > { %v263_v34 = vrot.slane %v212_v32, %v262_v31  ;;  %v273_v37 = vrot.slane %v213_v33, %v262_v31  ;;  %s484_s6 = sshll.u32 %s542_s5, 4  ;;  %s485_s6 = int_to_ptr.vmem [resolvable:$false] %s484_s6 }
  0x1a   : > { %s486_s19 = scalar_lea.vmem %s485_s6, 32  ;;  %p487_p0 = scmp.lt.s32.totalorder %s339_s22, %s485_s6 }
  0x1b   : > { %p488_p1 = scmp.lt.s32.totalorder %s486_s19, %s480_s30 }
  0x1c   : > { %216 = vadd.xlane.f32.xlu0 %v209_v2 }
  0x1d   : > { %p489_p2 = por %p488_p1, %p487_p0 }
  0x1f   : > { %p490_p3 = pnand %p489_p2, %p483_p13 }
  0xa1   : > { %v215_v3 = vpop.xlane.xlu0 %214  ;;  %v219_v4 = vpop.xlane.xlu1 %218 }
  0xa2   : > { %v223_v5 = vmul.f32 0.0078125, %v215_v3  ;;  %v225_v6 = vmul.f32 0.0078125, %v219_v4 }
  0xa4   : > { %v227_v7 = vsub.f32 %v208_v0, %v223_v5  ;;  %v229_v8 = vsub.f32 %v210_v1, %v225_v6 }
  0xa5   : > { %v217_v9 = vpop.xlane.xlu0 %216 }
  0xa6   : > { %v224_v10 = vmul.f32 0.0078125, %v217_v9  ;;  %v231_v11 = vmul.f32 %v227_v7, %v227_v7  ;;  %v233_v13 = vmul.f32 %v229_v8, %v229_v8 }
  0xa8   : > { %v228_v12 = vsub.f32 %v209_v2, %v224_v10  ;;  %235 = vadd.xlane.f32.xlu1 %v231_v11 }
  0xaa   : > { %v232_v14 = vmul.f32 %v228_v12, %v228_v12 }
  0xac   : > { %239 = vadd.xlane.f32.xlu1 %v233_v13  ;;  %237 = vadd.xlane.f32.xlu0 %v232_v14 }
  0xb0   : > { %220 = vadd.xlane.f32.xlu1 %v211_v15 }
 0x131   : > { %v236_v16 = vpop.xlane.xlu1 %235 }
 0x132   : > { %v243_v17 = vmul.f32 0.0078125, %v236_v16 }
 0x134   : > { %v247_v18 = vadd.f32 1e-06, %v243_v17 }
 0x135   : > { %v240_v19 = vpop.xlane.xlu1 %239  ;;  %v238_v20 = vpop.xlane.xlu0 %237 }
 0x136   : > { %470 = vrsqrt.f32 %v247_v18  ;;  %v245_v21 = vmul.f32 0.0078125, %v240_v19  ;;  %v244_v22 = vmul.f32 0.0078125, %v238_v20 }
 0x138   : > { %v249_v24 = vadd.f32 1e-06, %v245_v21  ;;  %v248_v25 = vadd.f32 1e-06, %v244_v22 }
 0x139   : > { %v221_v26 = vpop.xlane.xlu1 %220 }
 0x13a   : > { %472 = vrsqrt.f32 %v249_v24  ;;  %v226_v27 = vmul.f32 0.0078125, %v221_v26 }
 0x13b   : > { %474 = vrsqrt.f32 %v248_v25 }
 0x13c   : > { %v230_v29 = vsub.f32 %v211_v15, %v226_v27 }
 0x13e   : > { %v234_v30 = vmul.f32 %v230_v29, %v230_v29 }
 0x140   : > { %241 = vadd.xlane.f32.xlu1 %v234_v30 }
 0x143   : > { %v471_v35 = vpop.eup %470 }
 0x144   : > { %v255_v36 = vmul.f32 %v471_v35, %v227_v7 }
 0x146   : > { %v265_v38 = vmul.f32 %v263_v34, %v255_v36 }
 0x147   : > { %v473_v39 = vpop.eup %472 }
 0x148   : > { %v475_v40 = vpop.eup %474  ;;  %v257_v41 = vmul.f32 %v473_v39, %v229_v8  ;;  %v275_v42 = vadd.f32 %v273_v37, %v265_v38 }
 0x149   : > { %v256_v43 = vmul.f32 %v475_v40, %v228_v12 }
 0x14a   : > { %v267_v44 = vmul.f32 %v263_v34, %v257_v41  ;;  %279 = vst [vmem:[%s637_s12] sm:$0xff] %v275_v42  ;;  %v287_v49 = vrot.slane %v275_v42, 1 }
 0x14b   : > { %v266_v45 = vmul.f32 %v263_v34, %v256_v43 }
 0x14c   : > { %v277_v46 = vadd.f32 %v273_v37, %v267_v44 }
 0x14d   : > { %v276_v47 = vadd.f32 %v273_v37, %v266_v45 }
 0x14e   : > { %281 = vst [vmem:[%s637_s12 + $0x10] sm:$0xff] %v277_v46  ;;  %v290_v48 = vrot.slane %v277_v46, 1 }
 0x14f   : > { %v288_v50 = vrot.slane %v276_v47, 1  ;;  %280 = vst [vmem:[%s637_s12 + $0x8] sm:$0xff] %v276_v47 }
 0x151   : > { %v289_v51 = vsel %vm286_vm0, %v287_v49, %v288_v50  ;;  %v291_v52 = vsel %vm286_vm0, %v288_v50, %v290_v48 }
 0x152   : > { %v294_v53 = vadd.f32 %v291_v52, %v289_v51 }
 0x154   : > { %v295_v54 = vrot.slane %v294_v53, 4 }
 0x156   : > { %v296_v55 = vadd.f32 %v295_v54, %v294_v53 }
 0x158   : > { %v297_v56 = vrot.slane %v296_v55, 2 }
 0x15a   : > { %v298_v57 = vadd.f32 %v297_v56, %v296_v55 }
 0x15c   : > { %v299_v58 = vrot.slane %v298_v57, 1 }
 0x15e   : > { %v300_v59 = vadd.f32 %v299_v58, %v298_v57 }
 0x160   : > { %v302_v60 = vmul.f32 0.0625, %v300_v59 }
 0x162   : > { %303 = vadd.xlane.f32.xlu0 %v302_v60 }
 0x1c9   : > { %v242_v61 = vpop.xlane.xlu1 %241 }
 0x1ca   : > { %v246_v62 = vmul.f32 0.0078125, %v242_v61 }
 0x1cc   : > { %v250_v63 = vadd.f32 1e-06, %v246_v62 }
 0x1ce   : > { %476 = vrsqrt.f32 %v250_v63 }
 0x1db   : > { %v477_v0 = vpop.eup %476 }
 0x1dc   : > { %v258_v1 = vmul.f32 %v477_v0, %v230_v29 }
 0x1de   : > { %v268_v2 = vmul.f32 %v263_v34, %v258_v1 }
 0x1e0   : > { %v278_v3 = vadd.f32 %v273_v37, %v268_v2 }
 0x1e2   : > { %282 = vst [vmem:[%s637_s12 + $0x18] sm:$0xff] %v278_v3 }
 0x1eb   : > { %v304_v4 = vpop.xlane.xlu0 %303 }
 0x1ec   : > { %v305_v5 = vmul.f32 0.0078125, %v304_v4 }
 0x1ee   : > { %v306_v6 = vsub.f32 %v302_v60, %v305_v5 }
 0x1f0   : > { %v307_v7 = vmul.f32 %v306_v6, %v306_v6 }
 0x1f2   : > { %308 = vadd.xlane.f32.xlu0 %v307_v7 }
 0x27b   : > { %v309_v8 = vpop.xlane.xlu0 %308 }
 0x27c   : > { %v310_v9 = vmul.f32 0.0078125, %v309_v8 }
 0x27e   : > { %v311_v10 = vadd.f32 1e-06, %v310_v9 }
 0x280   : > { %478 = vrsqrt.f32 %v311_v10 }
 0x28d   : > { %v479_v11 = vpop.eup %478 }
 0x28e   : > { %v313_v12 = vmul.f32 %v479_v11, %v306_v6 }
 0x290   : > { %v314_v13 = vmul.f32 %v313_v12, %v212_v32 }
 0x292   : > { %v315_v14 = vadd.f32 %v314_v13, %v213_v33 }
 0x294   : > { %316 = vst [vmem:[%s197_s20] sm:$0x1] %v315_v14 }
 0x295   : > { %493 = shalt.err (!%p490_p3)
}
 0x296   : > { %s494_s7 = scalar_lea.hbm %s336_s28, 16  ;;  %s498_s10 = scalar_lea.hbm %s681_s4, 32 }
 0x297   : > { %p495_p4 = scmp.ne.s32.totalorder %s336_s28, %s494_s7  ;;  %p499_p9 = scmp.lt.s32.totalorder %s336_s28, %s681_s4 }
 0x298   : > { %p500_p10 = scmp.lt.s32.totalorder %s498_s10, %s494_s7 }
 0x299   : > { %p496_p7 = pnand %p495_p4, %p606_p5 }
 0x29a   : > { %p501_p11 = por %p500_p10, %p499_p9 }
 0x29b   : > { %p497_p8 = pneg %p496_p7 }
 0x29d   : > { %p502_p12 = pnand %p501_p11, %p497_p8 }
 0x29f   : > { %505 = shalt.err (!%p502_p12)
}
 0x2a0   : > { %431 = dma.vmem_to_hbm [thread:$0]  (%p606_p5), %s339_s22, 16, %s336_s28, %s323_s29  }
 0x2a1 PF: > { %p437_p13 = scmp.ge.s32.totalorder %s540_s18, 2  ;;  %s358_s13 = sand.u32 1, %s528_s15  }
 0x2a2   : > { %s359_s14 = scalar_lea.sflag [#allocation3], %s358_s13 }
 0x2a3   : > { %p434_p0 = pnand %p437_p13, %p610_p6 }
 0x2a5   : > { %p435_p1 = pneg %p434_p0 }
 0x2a7   : > { %523 = dma.done.wait (%p435_p1), %s359_s14, 16  }
 0x2a8   : > { %525 = vsyncadd (%p435_p1), %s359_s14, 4294967280  ;;  %p15_p2 = scmp.ge.s32.totalorder %s593_s21, 4   ;;  %s684_s15 = smov %s532_s16 }
 0x2a9   : > { %s685_s16 = smov %s536_s17  ;;  %s686_s17 = smov %s604_s24 }
 0x2aa   : > { %s687_s18 = smov %s593_s21  ;;  %17 = sbr.rel (!%p15_p2) target bundleno = 3 (0x3), region = 79 }
 0x2af   :  { %363 = vsyncpa [#allocation3], 1 }
 0x2b0   :  { %365 = vsyncpa [#allocation3 + $0x1], 1 }

// kernel: masked_encoder_forward.3
= control target key start
LH: loop header
LB: loop body
LE: loop exit
PB: predicated region body
PF: predicated region fallthrough
CT: control target
= control target key end

     0   :  { %s3232_s25 = smov 0   ;;  %s4766_s0 = inlined_call_operand.vmem [shape: f32[2,32,128], index: 0, kind: input, shape index: {}]   ;;  %s4767_s1 = inlined_call_operand.vmem [shape: f32[1,128], index: 1, kind: input, shape index: {}]   ;;  %s4768_s2 = inlined_call_operand.vmem [shape: f32[1,128], index: 2, kind: input, shape index: {}]   ;;  %s4769_s3 = inlined_call_operand.vmem [shape: f32[128,384], index: 3, kind: input, shape index: {}]   ;;  %s4770_s4 = inlined_call_operand.vmem [shape: f32[1,384], index: 4, kind: input, shape index: {}]   ;;  %s4771_s5 = inlined_call_operand.vmem [shape: f32[128,128], index: 5, kind: input, shape index: {}]   ;;  %s4772_s6 = inlined_call_operand.vmem [shape: f32[1,128], index: 6, kind: input, shape index: {}]   ;;  %s4773_s7 = inlined_call_operand.vmem [shape: f32[1,128], index: 7, kind: input, shape index: {}]   ;;  %s4774_s8 = inlined_call_operand.vmem [shape: f32[1,128], index: 8, kind: input, shape index: {}]   ;;  %s4775_s9 = inlined_call_operand.vmem [shape: f32[128,512], index: 9, kind: input, shape index: {}]   ;;  %s4776_s10 = inlined_call_operand.vmem [shape: f32[1,512], index: 10, kind: input, shape index: {}]   ;;  %s4777_s11 = inlined_call_operand.vmem [shape: f32[512,128], index: 11, kind: input, shape index: {}]   ;;  %s4778_s12 = inlined_call_operand.vmem [shape: f32[1,128], index: 12, kind: input, shape index: {}]   ;;  %s4779_s13 = inlined_call_operand.vmem [shape: f32[2,32,128], index: 13, kind: output, shape index: {}]  }
   0x1 LB: > { %s2751_s26 = sadd.s32 4294967295, %s3156_s25   ;;  %p2755_p0 = scmp.ge.s32.totalorder %s3156_s25, 1  ;;  %s3156_s25 = sphi %s3232_s25, %s23_s25  }
   0x2   : > { %p387_p1 = scmp.lt.s32.totalorder %s3156_s25, 3 }
   0x4   : > { %p388_p2 = pnand %p2755_p0, %p387_p1 }
   0x6   : > { %391 = sbr.rel (%p388_p2) target bundleno = 3100 (0xc1c), region = 72 }
   0xb   : > { %p431_p3 = scmp.lt.s32.totalorder %s2751_s26, 1  ;;  %v556_v4 = vld [vmem:[%s4769_s3 + $0x158] sm:$0xff]  ;;  %v559_v5 = vld [vmem:[%s4769_s3 + $0x170] sm:$0xff]  ;;  %v558_v8 = vld [vmem:[%s4769_s3 + $0x168] sm:$0xff]  ;;  %v3158_v60 = vmov 0   ;;  %vm713_vm0 = vcmask 261120  }
   0xc   : > { %v555_v6 = vld [vmem:[%s4769_s3 + $0x150] sm:$0xff]  ;;  %v585_v7 = vpack.c.bf16 %v559_v5, %v556_v4  ;;  %v550_v26 = vld [vmem:[%s4769_s3 + $0x128] sm:$0xff]  ;;  %v553_v27 = vld [vmem:[%s4769_s3 + $0x140] sm:$0xff]  ;;  %636 = vmatprep.mubr.bf16.mxu0 %v3158_v60  ;;  %s3159_s28 = smov 96   ;;  %s3160_s29 = smov 64   ;;  %vm1122_vm2 = vcmask 523520  }
   0xd   : > { %s4820_s26 = smov (!%p431_p3, %s2751_s26), 1  ;;  %v584_v9 = vpack.c.bf16 %v558_v8, %v555_v6  ;;  %v557_v28 = vld [vmem:[%s4769_s3 + $0x160] sm:$0xff]  ;;  %v582_v29 = vpack.c.bf16 %v553_v27, %v550_v26  ;;  %v560_v30 = vld [vmem:[%s4769_s3 + $0x178] sm:$0xff]  ;;  %v547_v36 = vld [vmem:[%s4769_s3 + $0x110] sm:$0xff]  ;;  %s3161_s14 = smov 32   ;;  %vm1339_vm3 = vcmask 785920  }
   0xe   : > { %s2800_s27 = sshll.u32 %s4820_s26, 5  ;;  %604 = vmatprep.subr.bf16.mxu0 %v585_v7  ;;  %v549_v31 = vld [vmem:[%s4769_s3 + $0x120] sm:$0xff]  ;;  %v552_v32 = vld [vmem:[%s4769_s3 + $0x138] sm:$0xff]  ;;  %v586_v33 = vpack.c.bf16 %v560_v30, %v557_v28  ;;  %v551_v37 = vld [vmem:[%s4769_s3 + $0x130] sm:$0xff]  ;;  %vm1556_vm4 = vcmask 1048320  }
   0xf   : > { %s3248_s30 = scalar_lea.vmem %s4766_s0, %s2800_s27  ;;  %605 = vmatpush1.bf16.msra.mxu0 %v584_v9  ;;  %v581_v34 = vpack.c.bf16 %v552_v32, %v549_v31  ;;  %v544_v35 = vld [vmem:[%s4769_s3 + $0xf8] sm:$0xff]  ;;  %v554_v39 = vld [vmem:[%s4769_s3 + $0x148] sm:$0xff]  ;;  %v543_v40 = vld [vmem:[%s4769_s3 + $0xf0] sm:$0xff]  ;;  %s440_s16 = scalar_lea.vmem %s4779_s13, %s2800_s27 }
  0x10   : > { %v442_v0 = vld [vmem:[%s3248_s30] sm:$0xff]  ;;  %v444_v1 = vld [vmem:[%s3248_s30 + $0x10] sm:$0xff]  ;;  %v443_v2 = vld [vmem:[%s3248_s30 + $0x8] sm:$0xff]  ;;  %606 = vmatprep.subr.bf16.mxu0 %v582_v29  ;;  %2910 = vmatprep.subr.bf16.mxu1 %v586_v33  ;;  %v579_v38 = vpack.c.bf16 %v547_v36, %v544_v35  ;;  %v583_v42 = vpack.c.bf16 %v554_v39, %v551_v37 }
  0x11   : > { %448 = vadd.xlane.f32.xlu0 %v442_v0  ;;  %452 = vadd.xlane.f32.xlu1 %v444_v1  ;;  %v445_v3 = vld [vmem:[%s3248_s30 + $0x18] sm:$0xff]  ;;  %v546_v41 = vld [vmem:[%s4769_s3 + $0x108] sm:$0xff]  ;;  %v541_v45 = vld [vmem:[%s4769_s3 + $0xe0] sm:$0xff] }
  0x12   : > { %2911 = vmatpush3.bf16.msra.mxu1 %v586_v33  ;;  %v578_v43 = vpack.c.bf16 %v546_v41, %v543_v40  ;;  %v538_v44 = vld [vmem:[%s4769_s3 + $0xc8] sm:$0xff]  ;;  %v545_v46 = vld [vmem:[%s4769_s3 + $0x100] sm:$0xff]  ;;  %v548_v48 = vld [vmem:[%s4769_s3 + $0x118] sm:$0xff] }
  0x13   : > { %607 = vmatpush1.bf16.msra.mxu0 %v581_v34  ;;  %2912 = vmatprep.subr.bf16.mxu1 %v583_v42  ;;  %v576_v47 = vpack.c.bf16 %v541_v45, %v538_v44  ;;  %v537_v49 = vld [vmem:[%s4769_s3 + $0xc0] sm:$0xff]  ;;  %v540_v50 = vld [vmem:[%s4769_s3 + $0xd8] sm:$0xff]  ;;  %v580_v51 = vpack.c.bf16 %v548_v48, %v545_v46  ;;  %v535_v54 = vld [vmem:[%s4769_s3 + $0xb0] sm:$0xff] }
  0x14   : > { %608 = vmatprep.subr.bf16.mxu0 %v579_v38  ;;  %v575_v52 = vpack.c.bf16 %v540_v50, %v537_v49  ;;  %v532_v53 = vld [vmem:[%s4769_s3 + $0x98] sm:$0xff]  ;;  %v539_v55 = vld [vmem:[%s4769_s3 + $0xd0] sm:$0xff]  ;;  %v542_v57 = vld [vmem:[%s4769_s3 + $0xe8] sm:$0xff] }
  0x15   : > { %450 = vadd.xlane.f32.xlu0 %v443_v2  ;;  %454 = vadd.xlane.f32.xlu1 %v445_v3  ;;  %v573_v56 = vpack.c.bf16 %v535_v54, %v532_v53  ;;  %v531_v58 = vld [vmem:[%s4769_s3 + $0x90] sm:$0xff]  ;;  %v534_v59 = vld [vmem:[%s4769_s3 + $0xa8] sm:$0xff]  ;;  %v577_v61 = vpack.c.bf16 %v542_v57, %v539_v55  ;;  %v525_v4 = vld [vmem:[%s4769_s3 + $0x60] sm:$0xff] }
  0x16   : > { %2913 = vmatpush3.bf16.msra.mxu1 %v583_v42  ;;  %v572_v62 = vpack.c.bf16 %v534_v59, %v531_v58  ;;  %v526_v63 = vld [vmem:[%s4769_s3 + $0x68] sm:$0xff]  ;;  %v528_v5 = vld [vmem:[%s4769_s3 + $0x78] sm:$0xff]  ;;  %v523_v9 = vld [vmem:[%s4769_s3 + $0x50] sm:$0xff] }
  0x17   : > { %609 = vmatpush1.bf16.msra.mxu0 %v578_v43  ;;  %2914 = vmatprep.subr.bf16.mxu1 %v580_v51  ;;  %v569_v7 = vpack.c.bf16 %v528_v5, %v525_v4  ;;  %v520_v8 = vld [vmem:[%s4769_s3 + $0x38] sm:$0xff]  ;;  %v513_v26 = vld [vmem:[%s4769_s3] sm:$0xff]  ;;  %v515_v30 = vld [vmem:[%s4769_s3 + $0x10] sm:$0xff] }
  0x18   : > { %610 = vmatprep.subr.bf16.mxu0 %v576_v47  ;;  %v516_v27 = vld [vmem:[%s4769_s3 + $0x18] sm:$0xff]  ;;  %v518_v31 = vld [vmem:[%s4769_s3 + $0x28] sm:$0xff]  ;;  %v2760_v47 = vld [vmem:[%s4767_s1] ss:$0 sm:$0xff] }
  0x19   : > { %v563_v29 = vpack.c.bf16 %v516_v27, %v513_v26  ;;  %v565_v32 = vpack.c.bf16 %v518_v31, %v515_v30 }
  0x1a   : > { %2915 = vmatpush3.bf16.msra.mxu1 %v580_v51 }
  0x1b   : > { %611 = vmatpush1.bf16.msra.mxu0 %v575_v52  ;;  %2916 = vmatprep.subr.bf16.mxu1 %v577_v61  ;;  %v2761_v52 = vld [vmem:[%s4768_s2] ss:$0 sm:$0xff] }
  0x1c   : > { %612 = vmatprep.subr.bf16.mxu0 %v573_v56 }
  0x1e   : > { %2917 = vmatpush3.bf16.msra.mxu1 %v577_v61 }
  0x1f   : > { %613 = vmatpush1.bf16.msra.mxu0 %v572_v62 }
  0x9a   : > { %v449_v10 = vpop.xlane.xlu0 %448  ;;  %v453_v11 = vpop.xlane.xlu1 %452 }
  0x9b   : > { %v457_v12 = vmul.f32 0.0078125, %v449_v10  ;;  %v459_v13 = vmul.f32 0.0078125, %v453_v11  ;;  %v527_v10 = vld [vmem:[%s4769_s3 + $0x70] sm:$0xff]  ;;  %v567_v11 = vpack.c.bf16 %v523_v9, %v520_v8 }
  0x9d   : > { %v3266_v14 = vsub.f32 %v442_v0, %v457_v12  ;;  %v3268_v15 = vsub.f32 %v444_v1, %v459_v13  ;;  %v529_v0 = vld [vmem:[%s4769_s3 + $0x80] sm:$0xff]  ;;  %v530_v12 = vld [vmem:[%s4769_s3 + $0x88] sm:$0xff]  ;;  %v519_v13 = vld [vmem:[%s4769_s3 + $0x30] sm:$0xff] }
  0x9e   : > { %v451_v16 = vpop.xlane.xlu0 %450  ;;  %v455_v17 = vpop.xlane.xlu1 %454  ;;  %v533_v1 = vld [vmem:[%s4769_s3 + $0xa0] sm:$0xff] }
  0x9f   : > { %v458_v18 = vmul.f32 0.0078125, %v451_v16  ;;  %v465_v19 = vmul.f32 %v3266_v14, %v3266_v14  ;;  %v460_v20 = vmul.f32 0.0078125, %v455_v17  ;;  %v467_v23 = vmul.f32 %v3268_v15, %v3268_v15  ;;  %v522_v16 = vld [vmem:[%s4769_s3 + $0x48] sm:$0xff] }
  0xa0   : > { %v571_v17 = vpack.c.bf16 %v530_v12, %v527_v10 }
  0xa1   : > { %v3272_v21 = vsub.f32 %v443_v2, %v458_v18  ;;  %469 = vadd.xlane.f32.xlu0 %v465_v19  ;;  %v3274_v22 = vsub.f32 %v445_v3, %v460_v20  ;;  %v570_v2 = vpack.c.bf16 %v529_v0, %v526_v63  ;;  %v536_v3 = vld [vmem:[%s4769_s3 + $0xb8] sm:$0xff]  ;;  %v514_v18 = vld [vmem:[%s4769_s3 + $0x8] sm:$0xff]  ;;  %v517_v19 = vld [vmem:[%s4769_s3 + $0x20] sm:$0xff]  ;;  %v589_v0 = vlaneseq }
  0xa2   : > { %v574_v6 = vpack.c.bf16 %v536_v3, %v533_v1  ;;  %v521_v20 = vld [vmem:[%s4769_s3 + $0x40] sm:$0xff] }
  0xa3   : > { %v466_v24 = vmul.f32 %v3272_v21, %v3272_v21  ;;  %v468_v25 = vmul.f32 %v3274_v22, %v3274_v22  ;;  %614 = vmatprep.subr.bf16.mxu0 %v570_v2 }
  0xa4   : > { %2918 = vmatprep.subr.bf16.mxu1 %v574_v6  ;;  %615 = vmatpush1.bf16.msra.mxu0 %v569_v7 }
  0xa5   : > { %473 = vadd.xlane.f32.xlu0 %v467_v23  ;;  %471 = vadd.xlane.f32.xlu1 %v466_v24  ;;  %v524_v23 = vld [vmem:[%s4769_s3 + $0x58] sm:$0xff]  ;;  %v566_v24 = vpack.c.bf16 %v522_v16, %v519_v13 }
  0xa6   : > { %2919 = vmatpush3.bf16.msra.mxu1 %v574_v6  ;;  %616 = vmatprep.subr.bf16.mxu0 %v567_v11  ;;  %v568_v28 = vpack.c.bf16 %v524_v23, %v521_v20 }
  0xa7   : > { %2920 = vmatprep.subr.bf16.mxu1 %v571_v17 }
  0xa8   : > { %617 = vmatpush1.bf16.msra.mxu0 %v566_v24 }
  0xa9   : > { %475 = vadd.xlane.f32.xlu1 %v468_v25  ;;  %v564_v25 = vpack.c.bf16 %v517_v19, %v514_v18 }
  0xaa   : > { %2921 = vmatpush3.bf16.msra.mxu1 %v571_v17 }
  0xab   : > { %618 = vmatprep.subr.bf16.mxu0 %v564_v25  ;;  %2922 = vmatprep.subr.bf16.mxu1 %v568_v28 }
  0xac   : > { %619 = vmatpush1.bf16.msra.mxu0 %v563_v29 }
  0xae   : > { %2923 = vmatpush3.bf16.msra.mxu1 %v568_v28 }
  0xaf   : > { %2924 = vmatprep.subr.bf16.mxu1 %v565_v32 }
  0xb2   : > { %2925 = vmatpush3.bf16.msra.mxu1 %v565_v32 }
 0x12a   : > { %v470_v33 = vpop.xlane.xlu0 %469 }
 0x12b   : > { %v477_v34 = vmul.f32 0.0078125, %v470_v33 }
 0x12d   : > { %v481_v35 = vadd.f32 1e-06, %v477_v34 }
 0x12e   : > { %v472_v36 = vpop.xlane.xlu1 %471  ;;  %v474_v37 = vpop.xlane.xlu0 %473 }
 0x12f   : > { %3034 = vrsqrt.f32 %v481_v35  ;;  %v478_v38 = vmul.f32 0.0078125, %v472_v36  ;;  %v479_v39 = vmul.f32 0.0078125, %v474_v37 }
 0x131   : > { %v482_v40 = vadd.f32 1e-06, %v478_v38  ;;  %v483_v41 = vadd.f32 1e-06, %v479_v39 }
 0x132   : > { %v476_v42 = vpop.xlane.xlu1 %475 }
 0x133   : > { %3036 = vrsqrt.f32 %v482_v40  ;;  %v480_v43 = vmul.f32 0.0078125, %v476_v42 }
 0x134   : > { %3038 = vrsqrt.f32 %v483_v41 }
 0x135   : > { %v484_v44 = vadd.f32 1e-06, %v480_v43  ;;  %v3468_v43 = vand.u32 127, %v589_v0 }
 0x137   : > { %3040 = vrsqrt.f32 %v484_v44  ;;  %vm708_vm1 = vcmp.lt.s32.totalorder %v3468_v43, 17 }
 0x13c   : > { %v3035_v45 = vpop.eup %3034 }
 0x13d   : > { %v489_v46 = vmul.f32 %v3035_v45, %v3266_v14 }
 0x13f   : > { %v499_v51 = vmul.f32 %v2760_v47, %v489_v46 }
 0x140   : > { %v3037_v48 = vpop.eup %3036 }
 0x141   : > { %v3039_v49 = vpop.eup %3038  ;;  %v490_v50 = vmul.f32 %v3037_v48, %v3272_v21  ;;  %v509_v56 = vadd.f32 %v2761_v52, %v499_v51 }
 0x142   : > { %v491_v53 = vmul.f32 %v3039_v49, %v3268_v15  ;;  %v3426_v15 = vshrl.u32 %v589_v0, 7 }
 0x143   : > { %v500_v54 = vmul.f32 %v2760_v47, %v490_v50 }
 0x144   : > { %v3041_v55 = vpop.eup %3040  ;;  %v501_v58 = vmul.f32 %v2760_v47, %v491_v53  ;;  %v591_v1 = vsub.s32 0, %v3426_v15  ;;  %v599_v4 = vsub.s32 2, %v3426_v15  ;;  %v595_v18 = vsub.s32 1, %v3426_v15 }
 0x145   : > { %v510_v57 = vadd.f32 %v2761_v52, %v500_v54  ;;  %v492_v14 = vmul.f32 %v3041_v55, %v3274_v22  ;;  %v587_v22 = vld [vmem:[%s4770_s4] sm:$0x7] }
 0x146   : > { %v511_v62 = vadd.f32 %v2761_v52, %v501_v58  ;;  %v592_v3 = vrot.slane %v587_v22, %v591_v1  ;;  %v600_v10 = vrot.slane %v587_v22, %v599_v4  ;;  %v596_v29 = vrot.slane %v587_v22, %v595_v18 }
 0x147   : > { %v561_v59 = vpack.c.bf16 %v510_v57, %v509_v56  ;;  %v502_v61 = vmul.f32 %v2760_v47, %v492_v14 }
 0x149   : > { %637 = vmatmul.mubr.bf16.vlgmr.msra.gmra.mxu0 %v561_v59  ;;  %2926 = vmatprep.mubr.bf16.mxu1 %v561_v59  ;;  %v512_v21 = vadd.f32 %v2761_v52, %v502_v61 }
 0x14a   : > { %646 = vmatprep.mubr.bf16.mxu0 %v3158_v60 }
 0x14b   : > { %v562_v63 = vpack.c.bf16 %v512_v21, %v511_v62 }
 0x14d   : > { %2927 = vmatmul.mubr.bf16.vlgmr.msra.gmra.mxu1 %v562_v63 }
 0x151   : > { %647 = vmatmul.mubr.bf16.gmra.mxu0 %v562_v63 }
 0x209   : > { %v638_v2 = vpop.f32.mrf.mxu0 }
 0x20a   : > { %v639_v8 = vadd.f32 %v638_v2, %v592_v3 }
 0x20b   : > { %v640_v5 = vpop.f32.mrf.mxu0 }
 0x20c   : > { %v641_v35 = vadd.f32 %v640_v5, %v596_v29 }
 0x20d   : > { %v642_v6 = vpop.f32.mrf.mxu0  ;;  %v2928_v7 = vpop.f32.mrf.mxu1 }
 0x20e   : > { %v643_v9 = vadd.f32 %v642_v6, %v592_v3  ;;  %v700_v19 = vadd.f32 %v2928_v7, %v600_v10 }
 0x20f   : > { %v644_v11 = vpop.f32.mrf.mxu0  ;;  %v691_v12 = vpop.f32.mrf.mxu1 }
 0x210   : > { %v3437_v13 = vpack.c.bf16 %v643_v9, %v639_v8  ;;  %v692_v25 = vadd.f32 %v691_v12, %v600_v10  ;;  %v645_v32 = vadd.f32 %v644_v11, %v596_v29 }
 0x211   : > { %v648_v16 = vpop.f32.mrf.mxu0  ;;  %v2929_v17 = vpop.f32.mrf.mxu1 }
 0x212   : > { %v703_v20 = vadd.f32 %v2929_v17, %v600_v10  ;;  %2934 = vmatprep.mubr.msk.bf16.mxu0 %vm713_vm0, %v3437_v13  ;;  %v3454_v37 = vpack.c.bf16 %v645_v32, %v641_v35  ;;  %v649_v41 = vadd.f32 %v648_v16, %v592_v3 }
 0x213   : > { %v650_v23 = vpop.f32.mrf.mxu0  ;;  %v694_v24 = vpop.f32.mrf.mxu1 }
 0x214   : > { %v3442_v26 = vpack.c.bf16 %v703_v20, %v700_v19  ;;  %v695_v27 = vadd.f32 %v694_v24, %v600_v10  ;;  %v651_v33 = vadd.f32 %v650_v23, %v596_v29  ;;  %v721_v39 = vsel %vm713_vm0, %v3454_v37, 0 }
 0x215   : > { %v652_v28 = vpop.f32.mrf.mxu0 }
 0x216   : > { %v3446_v30 = vpack.c.bf16 %v695_v27, %v692_v25  ;;  %2938 = vmatprep.subr.bf16.mxu1 %v3442_v26  ;;  %v653_v40 = vadd.f32 %v652_v28, %v592_v3 }
 0x217   : > { %v654_v31 = vpop.f32.mrf.mxu0  ;;  %2939 = vmatpush3.bf16.msra.mxu1 %v3442_v26 }
 0x218   : > { %v655_v34 = vadd.f32 %v654_v31, %v596_v29  ;;  %2940 = vmatprep.subr.bf16.mxu1 %v3446_v30  ;;  %v3464_v42 = vpack.c.bf16 %v653_v40, %v649_v41 }
 0x21a   : > { %v3451_v36 = vpack.c.bf16 %v655_v34, %v651_v33 }
 0x21b   : > { %2941 = vmatpush3.bf16.msra.mxu1 %v3446_v30 }
 0x21c   : > { %3014 = vmatprep.subr.msk.bf16.mxu0 %vm713_vm0, %v3451_v36  ;;  %v724_v38 = vsel %vm713_vm0, %v3451_v36, 0 }
 0x21d   : > { %2931 = vmatpush3.bf16.xpose.msra.mxu0 %v724_v38 }
 0x21e   : > { %3015 = vmatprep.subr.msk.bf16.mxu0 %vm713_vm0, %v3454_v37 }
 0x225   : > { %2933 = vmatpush3.bf16.xpose.msra.mxu0 %v721_v39 }
 0x22c   : > { %2935 = vmatmul.mubr.msk.bf16.vlgmr.msra.gmra.mxu0 %vm713_vm0, %v3464_v42 }
 0x2ec   : > { %v2936_v44 = vpop.f32.mrf.mxu0 }
 0x2ed   : > { %v777_v46 = vmul.f32 0.17677669, %v2936_v44 }
 0x2ee   : > { %v760_v45 = vpop.f32.mrf.mxu0 }
 0x2ef   : > { %v775_v47 = vmul.f32 0.17677669, %v760_v45  ;;  %v783_v54 = vsel %vm708_vm1, %v777_v46, -1e+30 }
 0x2f0   : > { %v2937_v48 = vpop.f32.mrf.mxu0  ;;  %v791_v56 = vsel %vm713_vm0, %v783_v54, -inf }
 0x2f1   : > { %v781_v49 = vsel %vm708_vm1, %v775_v47, -1e+30  ;;  %v778_v52 = vmul.f32 0.17677669, %v2937_v48 }
 0x2f2   : > { %v763_v50 = vpop.f32.mrf.mxu0  ;;  %v785_v51 = vsel %vm713_vm0, %v781_v49, -inf }
 0x2f3   : > { %v776_v53 = vmul.f32 0.17677669, %v763_v50  ;;  %786 = vmax.xlane.f32.xlu0 %v785_v51  ;;  %v784_v14 = vsel %vm708_vm1, %v778_v52, -1e+30 }
 0x2f4   : > { %v794_v58 = vsel %vm713_vm0, %v784_v14, -inf }
 0x2f5   : > { %v782_v55 = vsel %vm708_vm1, %v776_v53, -1e+30 }
 0x2f6   : > { %v788_v57 = vsel %vm713_vm0, %v782_v55, -inf }
 0x2f7   : > { %792 = vmax.xlane.f32.xlu0 %v791_v56  ;;  %789 = vmax.xlane.f32.xlu1 %v788_v57 }
 0x2fb   : > { %795 = vmax.xlane.f32.xlu1 %v794_v58 }
 0x30c   : > { %912 = vrot.lane.b32.xlu1 %v3454_v37, %s3159_s28 }
 0x30d   : > { %914 = vrot.lane.b32.xlu0 %v3451_v36, %s3159_s28 }
 0x310   : > { %906 = vrot.lane.b32.xlu1 %v3437_v13, %s3159_s28 }
 0x311   : > { %908 = vrot.lane.b32.xlu0 %v3464_v42, %s3159_s28 }
 0x314   : > { %1133 = vrot.lane.b32.xlu1 %v3451_v36, %s3160_s29 }
 0x315   : > { %1127 = vrot.lane.b32.xlu0 %v3437_v13, %s3160_s29 }
 0x318   : > { %1131 = vrot.lane.b32.xlu1 %v3454_v37, %s3160_s29 }
 0x31c   : > { %1129 = vrot.lane.b32.xlu1 %v3464_v42, %s3160_s29 }
 0x320   : > { %1258 = vrot.lane.b32.xlu1 %v3446_v30, %s3160_s29 }
 0x37c   : > { %v787_v59 = vpop.xlane.xlu0 %786 }
 0x37d   : > { %v797_v61 = vsub.f32 %v781_v49, %v787_v59 }
 0x37f   : > { %v801_v63 = vmul.f32 1.442695, %v797_v61 }
 0x380   : > { %v793_v62 = vpop.xlane.xlu0 %792  ;;  %v790_v21 = vpop.xlane.xlu1 %789 }
 0x381   : > { %v799_v0 = vsub.f32 %v783_v54, %v793_v62  ;;  %v798_v22 = vsub.f32 %v782_v55, %v790_v21  ;;  %3042 = vpow2.f32 %v801_v63 }
 0x383   : > { %v803_v2 = vmul.f32 1.442695, %v798_v22  ;;  %v805_v3 = vmul.f32 1.442695, %v799_v0 }
 0x384   : > { %v915_v5 = vpop.permute.xlu0 %914  ;;  %v796_v6 = vpop.xlane.xlu1 %795 }
 0x385   : > { %v800_v7 = vsub.f32 %v784_v14, %v796_v6  ;;  %3016 = vmatprep.subr.msk.bf16.mxu1 %vm713_vm0, %v915_v5  ;;  %3044 = vpow2.f32 %v803_v2  ;;  %v926_v20 = vsel %vm713_vm0, %v915_v5, 0 }
 0x386   : > { %3046 = vpow2.f32 %v805_v3 }
 0x387   : > { %v807_v8 = vmul.f32 1.442695, %v800_v7 }
 0x388   : > { %v913_v11 = vpop.permute.xlu1 %912  ;;  %v909_v27 = vpop.permute.xlu0 %908 }
 0x389   : > { %3048 = vpow2.f32 %v807_v8  ;;  %v923_v24 = vsel %vm713_vm0, %v913_v11, 0 }
 0x38c   : > { %v907_v23 = vpop.permute.xlu1 %906  ;;  %v1128_v28 = vpop.permute.xlu0 %1127 }
 0x38e   : > { %v3502_v9 = vpop.eup %3042 }
 0x390   : > { %v1134_v25 = vpop.permute.xlu1 %1133 }
 0x391   : > { %v1145_v29 = vsel %vm713_vm0, %v1134_v25, 0 }
 0x392   : > { %v3504_v10 = vpop.eup %3044 }
 0x393   : > { %v837_v12 = vpack.c.bf16 %v3504_v10, %v3502_v9  ;;  %v3508_v16 = vpop.eup %3046 }
 0x394   : > { %v1132_v31 = vpop.permute.xlu1 %1131 }
 0x395   : > { %2942 = vmatprep.mubr.msk.bf16.mxu1 %vm713_vm0, %v837_v12  ;;  %v1142_v32 = vsel %vm713_vm0, %v1132_v31, 0 }
 0x396   : > { %v3510_v17 = vpop.eup %3048 }
 0x397   : > { %v838_v19 = vpack.c.bf16 %v3510_v17, %v3508_v16 }
 0x398   : > { %v1130_v33 = vpop.permute.xlu1 %1129 }
 0x399   : > { %2943 = vmatmul.mubr.msk.bf16.vlgmr.msra.gmra.mxu1 %vm713_vm0, %v838_v19 }
 0x39a   : > { %2947 = vmatpush3.bf16.xpose.msra.mxu1 %v926_v20  ;;  %2950 = vmatprep.mubr.msk.bf16.mxu1 %vm713_vm0, %v907_v23 }
 0x39b   : > { %3017 = vmatprep.subr.msk.bf16.mxu1 %vm713_vm0, %v913_v11 }
 0x39c   : > { %v1259_v7 = vpop.permute.xlu1 %1258 }
 0x3a2   : > { %2949 = vmatpush3.bf16.xpose.msra.mxu1 %v923_v24 }
 0x3a3   : > { %3018 = vmatprep.subr.msk.bf16.mxu1 %vm713_vm0, %v1134_v25 }
 0x3a9   : > { %2951 = vmatmul.mubr.msk.bf16.vlgmr.msra.gmra.mxu1 %vm713_vm0, %v909_v27 }
 0x3aa   : > { %2963 = vmatpush3.bf16.xpose.msra.mxu1 %v1145_v29  ;;  %2966 = vmatprep.mubr.msk.bf16.mxu1 %vm713_vm0, %v1128_v28 }
 0x3ab   : > { %3019 = vmatprep.subr.msk.bf16.mxu1 %vm713_vm0, %v1132_v31 }
 0x3b2   : > { %2965 = vmatpush3.bf16.xpose.msra.mxu1 %v1142_v32 }
 0x3b9   : > { %2967 = vmatmul.mubr.msk.bf16.vlgmr.msra.gmra.mxu1 %vm713_vm0, %v1130_v33 }
 0x459   : > { %v3527_v34 = vpop.f32.mrf.mxu1 }
 0x45b   : > { %v3529_v35 = vpop.f32.mrf.mxu1 }
 0x45d   : > { %v3531_v38 = vpop.f32.mrf.mxu1 }
 0x45f   : > { %v3533_v39 = vpop.f32.mrf.mxu1 }
 0x469   : > { %v2952_v40 = vpop.f32.mrf.mxu1 }
 0x46a   : > { %v979_v63 = vmul.f32 0.17677669, %v2952_v40 }
 0x46b   : > { %v962_v41 = vpop.f32.mrf.mxu1 }
 0x46c   : > { %v977_v62 = vmul.f32 0.17677669, %v962_v41 }
 0x46d   : > { %v2953_v44 = vpop.f32.mrf.mxu1 }
 0x46e   : > { %v981_v0 = vsel %vm708_vm1, %v977_v62, -1e+30  ;;  %v980_v22 = vmul.f32 0.17677669, %v2953_v44 }
 0x46f   : > { %v965_v45 = vpop.f32.mrf.mxu1 }
 0x470   : > { %v978_v21 = vmul.f32 0.17677669, %v965_v45  ;;  %v984_v3 = vsel %vm708_vm1, %v980_v22, -1e+30 }
 0x471   : > { %v994_v5 = vsel %vm713_vm0, %v984_v3, -inf }
 0x479   : > { %v2968_v46 = vpop.f32.mrf.mxu1 }
 0x47a   : > { %v1198_v47 = vmul.f32 0.17677669, %v2968_v46 }
 0x47b   : > { %v1181_v48 = vpop.f32.mrf.mxu1 }
 0x47c   : > { %v1196_v49 = vmul.f32 0.17677669, %v1181_v48  ;;  %v1202_v50 = vsel %vm708_vm1, %v1198_v47, -1e+30 }
 0x47d   : > { %v2969_v51 = vpop.f32.mrf.mxu1  ;;  %v1210_v52 = vsel %vm713_vm0, %v1202_v50, -inf }
 0x47e   : > { %v1199_v53 = vmul.f32 0.17677669, %v2969_v51  ;;  %1211 = vmax.xlane.f32.xlu0 %v1210_v52  ;;  %v1200_v54 = vsel %vm708_vm1, %v1196_v49, -1e+30 }
 0x47f   : > { %v1184_v55 = vpop.f32.mrf.mxu1  ;;  %v1204_v57 = vsel %vm713_vm0, %v1200_v54, -inf }
 0x480   : > { %v1197_v56 = vmul.f32 0.17677669, %v1184_v55  ;;  %v1203_v58 = vsel %vm708_vm1, %v1199_v53, -1e+30 }
 0x481   : > { %v1213_v61 = vsel %vm713_vm0, %v1203_v58, -inf }
 0x482   : > { %1205 = vmax.xlane.f32.xlu0 %v1204_v57  ;;  %v1201_v14 = vsel %vm708_vm1, %v1197_v56, -1e+30 }
 0x483   : > { %v1207_v59 = vsel %vm713_vm0, %v1201_v14, -inf }
 0x484   : > { %1208 = vmax.xlane.f32.xlu1 %v1207_v59 }
 0x486   : > { %1214 = vmax.xlane.f32.xlu0 %v1213_v61 }
 0x495   : > { %1350 = vrot.lane.b32.xlu1 %v3451_v36, %s3161_s14  ;;  %v3561_v36 = vsel %vm708_vm1, %v978_v21, -1e+30 }
 0x499   : > { %1348 = vrot.lane.b32.xlu1 %v3454_v37, %s3161_s14  ;;  %v985_v37 = vsel %vm713_vm0, %v981_v0, -inf }
 0x49c   : > { %1260 = vrot.lane.b32.xlu0 %v3442_v26, %s3160_s29 }
 0x49d   : > { %1346 = vrot.lane.b32.xlu1 %v3464_v42, %s3161_s14  ;;  %v3566_v42 = vsel %vm708_vm1, %v979_v63, -1e+30 }
 0x49e   : > { %v991_v2 = vsel %vm713_vm0, %v3566_v42, -inf }
 0x4a0   : > { %1344 = vrot.lane.b32.xlu0 %v3437_v13, %s3161_s14  ;;  %v988_v13 = vsel %vm713_vm0, %v3561_v36, -inf }
 0x4bf   : > { %986 = vmax.xlane.f32.xlu0 %v985_v37 }
 0x4c1   : > { %989 = vmax.xlane.f32.xlu1 %v988_v13 }
 0x4c3   : > { %992 = vmax.xlane.f32.xlu0 %v991_v2 }
 0x4c7   : > { %995 = vmax.xlane.f32.xlu0 %v994_v5 }
 0x4d2   : > { %1041 = vrot.lane.b32.xlu1 %v3446_v30, %s3159_s28 }
 0x4d6   : > { %1477 = vrot.lane.b32.xlu1 %v3442_v26, %s3161_s14 }
 0x507   : > { %v1212_v6 = vpop.xlane.xlu0 %1211 }
 0x508   : > { %v1218_v8 = vsub.f32 %v1202_v50, %v1212_v6 }
 0x50a   : > { %v1224_v24 = vmul.f32 1.442695, %v1218_v8 }
 0x50b   : > { %v1206_v11 = vpop.xlane.xlu0 %1205 }
 0x50c   : > { %v1216_v12 = vsub.f32 %v1200_v54, %v1206_v11 }
 0x50d   : > { %v1209_v19 = vpop.xlane.xlu1 %1208 }
 0x50e   : > { %v1220_v20 = vmul.f32 1.442695, %v1216_v12  ;;  %v1217_v23 = vsub.f32 %v1201_v14, %v1209_v19 }
 0x50f   : > { %v1215_v25 = vpop.xlane.xlu0 %1214 }
 0x510   : > { %v1222_v27 = vmul.f32 1.442695, %v1217_v23  ;;  %v1219_v28 = vsub.f32 %v1203_v58, %v1215_v25  ;;  %3050 = vpow2.f32 %v1220_v20 }
 0x511   : > { %v1351_v32 = vpop.permute.xlu1 %1350 }
 0x512   : > { %3052 = vpow2.f32 %v1222_v27  ;;  %v1226_v29 = vmul.f32 1.442695, %v1219_v28  ;;  %v1362_v47 = vsel %vm713_vm0, %v1351_v32, 0 }
 0x513   : > { %3054 = vpow2.f32 %v1224_v24  ;;  %v1261_v31 = vpop.permute.xlu0 %1260 }
 0x514   : > { %3056 = vpow2.f32 %v1226_v29  ;;  %2970 = vmatprep.subr.bf16.mxu1 %v1261_v31 }
 0x515   : > { %2971 = vmatpush3.bf16.msra.mxu1 %v1261_v31  ;;  %v1349_v49 = vpop.permute.xlu1 %1348 }
 0x516   : > { %2972 = vmatprep.subr.bf16.mxu1 %v1259_v7  ;;  %v1359_v50 = vsel %vm713_vm0, %v1349_v49, 0 }
 0x517   : > { %v1345_v48 = vpop.permute.xlu0 %1344 }
 0x519   : > { %2973 = vmatpush3.bf16.msra.mxu1 %v1259_v7  ;;  %v1347_v51 = vpop.permute.xlu1 %1346 }
 0x51a   : > { %3020 = vmatprep.subr.msk.bf16.mxu1 %vm713_vm0, %v1351_v32 }
 0x51d   : > { %v3580_v33 = vpop.eup %3050 }
 0x51f   : > { %v3582_v40 = vpop.eup %3052 }
 0x520   : > { %v3584_v41 = vpop.eup %3054  ;;  %v1256_v44 = vpack.c.bf16 %v3582_v40, %v3580_v33 }
 0x521   : > { %v3588_v45 = vpop.eup %3056 }
 0x522   : > { %2974 = vmatprep.mubr.msk.bf16.mxu1 %vm713_vm0, %v1256_v44  ;;  %v1257_v46 = vpack.c.bf16 %v3588_v45, %v3584_v41 }
 0x524   : > { %2975 = vmatmul.mubr.msk.bf16.vlgmr.msra.gmra.mxu1 %vm713_vm0, %v1257_v46 }
 0x525   : > { %2979 = vmatpush3.bf16.xpose.msra.mxu1 %v1362_v47  ;;  %2982 = vmatprep.mubr.msk.bf16.mxu1 %vm713_vm0, %v1345_v48 }
 0x526   : > { %3021 = vmatprep.subr.msk.bf16.mxu1 %vm713_vm0, %v1349_v49  ;;  %v1231_v49 = vsel %vm713_vm0, %v3582_v40, 0.0 }
 0x52d   : > { %2981 = vmatpush3.bf16.xpose.msra.mxu1 %v1359_v50  ;;  %v1234_v50 = vsel %vm713_vm0, %v3584_v41, 0.0 }
 0x534   : > { %2983 = vmatmul.mubr.msk.bf16.vlgmr.msra.gmra.mxu1 %vm713_vm0, %v1347_v51 }
 0x535   : > { %1873 = vmatprep.mubr.bf16.mxu1 %v3158_v60 }
 0x548   : > { %v987_v52 = vpop.xlane.xlu0 %986 }
 0x549   : > { %v997_v53 = vsub.f32 %v981_v0, %v987_v52 }
 0x54a   : > { %v990_v54 = vpop.xlane.xlu1 %989 }
 0x54b   : > { %v1001_v55 = vmul.f32 1.442695, %v997_v53  ;;  %v998_v56 = vsub.f32 %v3561_v36, %v990_v54 }
 0x54c   : > { %v993_v57 = vpop.xlane.xlu0 %992 }
 0x54d   : > { %v1003_v14 = vmul.f32 1.442695, %v998_v56  ;;  %v999_v58 = vsub.f32 %v3566_v42, %v993_v57  ;;  %3058 = vpow2.f32 %v1001_v55 }
 0x54e   : > { %v1042_v51 = vpop.permute.xlu1 %1041 }
 0x54f   : > { %3060 = vpow2.f32 %v1003_v14  ;;  %v1005_v59 = vmul.f32 1.442695, %v999_v58 }
 0x550   : > { %v996_v61 = vpop.xlane.xlu0 %995 }
 0x551   : > { %v1000_v62 = vsub.f32 %v984_v3, %v996_v61  ;;  %3062 = vpow2.f32 %v1005_v59 }
 0x552   : > { %v1478_v52 = vpop.permute.xlu1 %1477 }
 0x553   : > { %v1007_v21 = vmul.f32 1.442695, %v1000_v62 }
 0x555   : > { %3064 = vpow2.f32 %v1007_v21 }
 0x55a   : > { %v3059_v63 = vpop.eup %3058 }
 0x55b   : > { %v1009_v46 = vsel %vm713_vm0, %v3059_v63, 0.0 }
 0x55c   : > { %v3061_v37 = vpop.eup %3060 }
 0x55d   : > { %v1037_v22 = vpack.c.bf16 %v3061_v37, %v3059_v63  ;;  %v1012_v48 = vsel %vm713_vm0, %v3061_v37, 0.0 }
 0x55e   : > { %v3603_v0 = vpop.eup %3062 }
 0x55f   : > { %2958 = vmatprep.mubr.msk.bf16.mxu0 %vm713_vm0, %v1037_v22  ;;  %v1015_v47 = vsel %vm713_vm0, %v3603_v0, 0.0 }
 0x562   : > { %v3605_v36 = vpop.eup %3064 }
 0x563   : > { %v1038_v42 = vpack.c.bf16 %v3605_v36, %v3603_v0  ;;  %v1018_v43 = vsel %vm713_vm0, %v3605_v36, 0.0  ;;  %v809_v36 = vsel %vm713_vm0, %v3502_v9, 0.0 }
 0x5e4   : > { %v3609_v13 = vpop.f32.mrf.mxu1 }
 0x5e6   : > { %v3611_v2 = vpop.f32.mrf.mxu1 }
 0x5e8   : > { %v3613_v3 = vpop.f32.mrf.mxu1 }
 0x5ea   : > { %v3615_v5 = vpop.f32.mrf.mxu1 }
 0x5f4   : > { %v2984_v6 = vpop.f32.mrf.mxu1 }
 0x5f5   : > { %v1415_v7 = vmul.f32 0.17677669, %v2984_v6 }
 0x5f6   : > { %v1398_v8 = vpop.f32.mrf.mxu1 }
 0x5f7   : > { %v1413_v11 = vmul.f32 0.17677669, %v1398_v8  ;;  %v1419_v12 = vsel %vm708_vm1, %v1415_v7, -1e+30 }
 0x5f8   : > { %v2985_v19 = vpop.f32.mrf.mxu1  ;;  %v1427_v20 = vsel %vm713_vm0, %v1419_v12, -inf }
 0x5f9   : > { %v1416_v23 = vmul.f32 0.17677669, %v2985_v19  ;;  %1428 = vmax.xlane.f32.xlu0 %v1427_v20  ;;  %v1417_v24 = vsel %vm708_vm1, %v1413_v11, -1e+30  ;;  %v812_v19 = vsel %vm713_vm0, %v3504_v10, 0.0  ;;  %v818_v20 = vsel %vm713_vm0, %v3510_v17, 0.0 }
 0x5fa   : > { %v1401_v25 = vpop.f32.mrf.mxu1  ;;  %v1421_v29 = vsel %vm713_vm0, %v1417_v24, -inf }
 0x5fb   : > { %v1414_v27 = vmul.f32 0.17677669, %v1401_v25  ;;  %v1420_v28 = vsel %vm708_vm1, %v1416_v23, -1e+30 }
 0x5fc   : > { %v1430_v31 = vsel %vm713_vm0, %v1420_v28, -inf }
 0x5fd   : > { %1422 = vmax.xlane.f32.xlu0 %v1421_v29  ;;  %1431 = vmax.xlane.f32.xlu1 %v1430_v31  ;;  %v1418_v32 = vsel %vm708_vm1, %v1414_v27, -1e+30 }
 0x5fe   : > { %v1424_v44 = vsel %vm713_vm0, %v1418_v32, -inf }
 0x601   : > { %1425 = vmax.xlane.f32.xlu1 %v1424_v44 }
 0x612   : > { %1475 = vrot.lane.b32.xlu1 %v3446_v30, %s3161_s14  ;;  %v1237_v30 = vsel %vm713_vm0, %v3588_v45, 0.0 }
 0x613   : > { %1043 = vrot.lane.b32.xlu0 %v3442_v26, %s3159_s28  ;;  %v1228_v26 = vsel %vm713_vm0, %v3580_v33, 0.0 }
 0x632   : > { %1010 = vadd.xlane.f32.xlu0 %v1009_v46 }
 0x636   : > { %1016 = vadd.xlane.f32.xlu0 %v1015_v47  ;;  %1013 = vadd.xlane.f32.xlu1 %v1012_v48 }
 0x63a   : > { %1019 = vadd.xlane.f32.xlu0 %v1018_v43  ;;  %1232 = vadd.xlane.f32.xlu1 %v1231_v49 }
 0x63e   : > { %1229 = vadd.xlane.f32.xlu0 %v1228_v26  ;;  %1238 = vadd.xlane.f32.xlu1 %v1237_v30 }
 0x642   : > { %1235 = vadd.xlane.f32.xlu0 %v1234_v50 }
 0x682   : > { %v1429_v53 = vpop.xlane.xlu0 %1428 }
 0x683   : > { %v1435_v54 = vsub.f32 %v1419_v12, %v1429_v53  ;;  %v815_v12 = vsel %vm713_vm0, %v3508_v16, 0.0 }
 0x685   : > { %v1441_v14 = vmul.f32 1.442695, %v1435_v54 }
 0x686   : > { %v1423_v55 = vpop.xlane.xlu0 %1422  ;;  %v1432_v40 = vpop.xlane.xlu1 %1431 }
 0x687   : > { %v1433_v56 = vsub.f32 %v1417_v24, %v1423_v55  ;;  %v1436_v57 = vsub.f32 %v1420_v28, %v1432_v40 }
 0x689   : > { %v1437_v58 = vmul.f32 1.442695, %v1433_v56  ;;  %v1443_v33 = vmul.f32 1.442695, %v1436_v57 }
 0x68a   : > { %v1044_v59 = vpop.permute.xlu0 %1043  ;;  %v1426_v61 = vpop.xlane.xlu1 %1425 }
 0x68b   : > { %3066 = vpow2.f32 %v1437_v58  ;;  %v1434_v45 = vsub.f32 %v1418_v32, %v1426_v61  ;;  %2954 = vmatprep.subr.bf16.mxu0 %v1044_v59 }
 0x68c   : > { %2955 = vmatpush3.bf16.msra.mxu0 %v1044_v59  ;;  %3068 = vpow2.f32 %v1441_v14 }
 0x68d   : > { %v1439_v41 = vmul.f32 1.442695, %v1434_v45  ;;  %2956 = vmatprep.subr.bf16.mxu0 %v1042_v51  ;;  %3070 = vpow2.f32 %v1443_v33 }
 0x68e   : > { %v1476_v62 = vpop.permute.xlu1 %1475 }
 0x68f   : > { %3072 = vpow2.f32 %v1439_v41 }
 0x690   : > { %2957 = vmatpush3.bf16.msra.mxu0 %v1042_v51 }
 0x691   : > { %2986 = vmatprep.subr.bf16.mxu0 %v1478_v52 }
 0x693   : > { %2959 = vmatmul.mubr.msk.bf16.vlgmr.msra.gmra.mxu0 %vm713_vm0, %v1038_v42 }
 0x694   : > { %2987 = vmatpush3.bf16.msra.mxu0 %v1478_v52 }
 0x695   : > { %2988 = vmatprep.subr.bf16.mxu0 %v1476_v62 }
 0x698   : > { %v3067_v21 = vpop.eup %3066  ;;  %2989 = vmatpush3.bf16.msra.mxu0 %v1476_v62 }
 0x699   : > { %v1445_v63 = vsel %vm713_vm0, %v3067_v21, 0.0  ;;  %v3069_v37 = vpop.eup %3068 }
 0x69a   : > { %1446 = vadd.xlane.f32.xlu0 %v1445_v63  ;;  %v3071_v22 = vpop.eup %3070  ;;  %v1451_v7 = vsel %vm713_vm0, %v3069_v37, 0.0 }
 0x69b   : > { %v1474_v0 = vpack.c.bf16 %v3071_v22, %v3069_v37  ;;  %v1454_v42 = vsel %vm713_vm0, %v3071_v22, 0.0  ;;  %v1580_v37 = vld [vmem:[%s4771_s5 + $0x78] sm:$0xff] }
 0x69c   : > { %v3073_v6 = vpop.eup %3072 }
 0x69d   : > { %v1448_v8 = vsel %vm713_vm0, %v3073_v6, 0.0  ;;  %v1473_v11 = vpack.c.bf16 %v3073_v6, %v3067_v21 }
 0x69e   : > { %1452 = vadd.xlane.f32.xlu0 %v1451_v7  ;;  %1449 = vadd.xlane.f32.xlu1 %v1448_v8 }
 0x69f   : > { %2990 = vmatprep.mubr.msk.bf16.mxu0 %vm713_vm0, %v1473_v11 }
 0x6a0   : > { %2991 = vmatmul.mubr.msk.bf16.vlgmr.msra.gmra.mxu0 %vm713_vm0, %v1474_v0 }
 0x6a2   : > { %810 = vadd.xlane.f32.xlu0 %v809_v36  ;;  %1455 = vadd.xlane.f32.xlu1 %v1454_v42 }
 0x6a6   : > { %816 = vadd.xlane.f32.xlu0 %v815_v12  ;;  %813 = vadd.xlane.f32.xlu1 %v812_v19  ;;  %v1577_v12 = vld [vmem:[%s4771_s5 + $0x60] sm:$0xff]  ;;  %v1578_v19 = vld [vmem:[%s4771_s5 + $0x68] sm:$0xff] }
 0x6aa   : > { %819 = vadd.xlane.f32.xlu1 %v818_v20 }
 0x6bb   : > { %v1011_v23 = vpop.xlane.xlu0 %1010 }
 0x6bf   : > { %v3665_v24 = vpop.xlane.xlu0 %1016  ;;  %v1014_v25 = vpop.xlane.xlu1 %1013 }
 0x6c3   : > { %v3667_v9 = vpop.xlane.xlu0 %1019  ;;  %v3669_v28 = vpop.xlane.xlu1 %1232 }
 0x6c7   : > { %v1230_v27 = vpop.xlane.xlu0 %1229  ;;  %v3671_v16 = vpop.xlane.xlu1 %1238 }
 0x6cb   : > { %v1236_v29 = vpop.xlane.xlu0 %1235 }
 0x723   : > { %v3673_v31 = vpop.xlane.xlu0 %1446 }
 0x727   : > { %v3675_v10 = vpop.xlane.xlu0 %1452  ;;  %v3677_v32 = vpop.xlane.xlu1 %1449 }
 0x72b   : > { %v811_v17 = vpop.xlane.xlu0 %810  ;;  %v3679_v44 = vpop.xlane.xlu1 %1455 }
 0x72c   : > { %3074 = vrcp.f32 %v811_v17 }
 0x72f   : > { %v817_v46 = vpop.xlane.xlu0 %816  ;;  %v814_v47 = vpop.xlane.xlu1 %813 }
 0x730   : > { %3076 = vrcp.f32 %v817_v46 }
 0x731   : > { %3078 = vrcp.f32 %v814_v47 }
 0x733   : > { %v820_v48 = vpop.xlane.xlu1 %819 }
 0x734   : > { %3080 = vrcp.f32 %v820_v48 }
 0x735   : > { %3082 = vrcp.f32 %v1011_v23 }
 0x736   : > { %3084 = vrcp.f32 %v1230_v27 }
 0x737   : > { %3086 = vrcp.f32 %v1014_v25 }
 0x738   : > { %3088 = vrcp.f32 %v1236_v29 }
 0x739   : > { %v3075_v43 = vpop.eup %3074  ;;  %3090 = vrcp.f32 %v3665_v24 }
 0x73a   : > { %v825_v49 = vmul.f32 %v3075_v43, %v811_v17  ;;  %3092 = vrcp.f32 %v3667_v9 }
 0x73b   : > { %3094 = vrcp.f32 %v3673_v31 }
 0x73c   : > { %v829_v26 = vsub.f32 2.0, %v825_v49  ;;  %3096 = vrcp.f32 %v3669_v28 }
 0x73d   : > { %v3077_v30 = vpop.eup %3076  ;;  %3098 = vrcp.f32 %v3675_v10 }
 0x73e   : > { %v3079_v50 = vpop.eup %3078  ;;  %v833_v51 = vmul.f32 %v3075_v43, %v829_v26  ;;  %v827_v52 = vmul.f32 %v3077_v30, %v817_v46  ;;  %3100 = vrcp.f32 %v3671_v16  ;;  %v1575_v26 = vld [vmem:[%s4771_s5 + $0x50] sm:$0xff] }
 0x73f   : > { %v826_v53 = vmul.f32 %v3079_v50, %v814_v47  ;;  %3102 = vrcp.f32 %v3677_v32 }
 0x740   : > { %v831_v54 = vsub.f32 2.0, %v827_v52  ;;  %v896_v55 = vmul.f32 %v3529_v35, %v833_v51  ;;  %3104 = vrcp.f32 %v3679_v44 }
 0x741   : > { %v3081_v40 = vpop.eup %3080  ;;  %v830_v56 = vsub.f32 2.0, %v826_v53 }
 0x742   : > { %v835_v57 = vmul.f32 %v3077_v30, %v831_v54  ;;  %v828_v14 = vmul.f32 %v3081_v40, %v820_v48  ;;  %900 = vst.msk [vmem:[#allocation2] sm:$0xff] %vm713_vm0, %v896_v55  ;;  %v3083_v41 = vpop.eup %3082  ;;  %v1576_v30 = vld [vmem:[%s4771_s5 + $0x58] sm:$0xff] }
 0x743   : > { %v834_v58 = vmul.f32 %v3079_v50, %v830_v56  ;;  %v3085_v62 = vpop.eup %3084  ;;  %v1588_v52 = vpack.c.bf16 %v1576_v30, %v1575_v26 }
 0x744   : > { %v832_v33 = vsub.f32 2.0, %v828_v14  ;;  %v898_v59 = vmul.f32 %v3527_v34, %v835_v57  ;;  %v1025_v34 = vmul.f32 %v3083_v41, %v1011_v23  ;;  %v3087_v21 = vpop.eup %3086 }
 0x745   : > { %v897_v61 = vmul.f32 %v3533_v39, %v834_v58  ;;  %v1244_v39 = vmul.f32 %v3085_v62, %v1230_v27  ;;  %v3089_v63 = vpop.eup %3088  ;;  %v1026_v7 = vmul.f32 %v3087_v21, %v1014_v25  ;;  %v1589_v25 = vpack.c.bf16 %v1578_v19, %v1577_v12 }
 0x746   : > { %v836_v45 = vmul.f32 %v3081_v40, %v832_v33  ;;  %902 = vst.msk [vmem:[#allocation2 + $0x10] sm:$0xff] %vm713_vm0, %v898_v59  ;;  %v3091_v22 = vpop.eup %3090  ;;  %v1029_v6 = vsub.f32 2.0, %v1025_v34  ;;  %v1246_v0 = vmul.f32 %v3089_v63, %v1236_v29  ;;  %v1574_v33 = vld [vmem:[%s4771_s5 + $0x48] sm:$0xff]  ;;  %v1571_v34 = vld [vmem:[%s4771_s5 + $0x30] sm:$0xff] }
 0x747   : > { %901 = vst.msk [vmem:[#allocation2 + $0x8] sm:$0xff] %vm713_vm0, %v897_v61  ;;  %v1248_v11 = vsub.f32 2.0, %v1244_v39  ;;  %v1027_v36 = vmul.f32 %v3091_v22, %v3665_v24  ;;  %v1030_v20 = vsub.f32 2.0, %v1026_v7  ;;  %v3093_v27 = vpop.eup %3092 }
 0x748   : > { %v899_v35 = vmul.f32 %v3531_v38, %v836_v45  ;;  %v1579_v38 = vld [vmem:[%s4771_s5 + $0x70] sm:$0xff]  ;;  %v1033_v23 = vmul.f32 %v3083_v41, %v1029_v6  ;;  %v3095_v17 = vpop.eup %3094  ;;  %v1250_v24 = vsub.f32 2.0, %v1246_v0  ;;  %v1028_v50 = vmul.f32 %v3093_v27, %v3667_v9  ;;  %v1573_v9 = vld [vmem:[%s4771_s5 + $0x40] sm:$0xff]  ;;  %v1570_v0 = vld [vmem:[%s4771_s5 + $0x28] sm:$0xff] }
 0x749   : > { %v1590_v8 = vpack.c.bf16 %v1580_v37, %v1579_v38  ;;  %v1252_v46 = vmul.f32 %v3085_v62, %v1248_v11  ;;  %v3097_v48 = vpop.eup %3096  ;;  %v1031_v43 = vsub.f32 2.0, %v1027_v36  ;;  %v1034_v51 = vmul.f32 %v3087_v21, %v1030_v20  ;;  %v1572_v21 = vld [vmem:[%s4771_s5 + $0x38] sm:$0xff]  ;;  %v1569_v11 = vld [vmem:[%s4771_s5 + $0x20] sm:$0xff] }
 0x74a   : > { %903 = vst.msk [vmem:[#allocation2 + $0x18] sm:$0xff] %vm713_vm0, %v899_v35  ;;  %v1461_v53 = vmul.f32 %v3095_v17, %v3673_v31  ;;  %v3099_v55 = vpop.eup %3098  ;;  %v1245_v40 = vmul.f32 %v3097_v48, %v3669_v28  ;;  %v1254_v56 = vmul.f32 %v3089_v63, %v1250_v24  ;;  %v1032_v31 = vsub.f32 2.0, %v1028_v50 }
 0x74b   : > { %2994 = vmatprep.subr.bf16.mxu0 %v1590_v8  ;;  %v1319_v14 = vmul.f32 %v3611_v2, %v1252_v46  ;;  %v3101_v58 = vpop.eup %3100  ;;  %v1035_v59 = vmul.f32 %v3091_v22, %v1031_v43  ;;  %v1587_v28 = vpack.c.bf16 %v1574_v33, %v1573_v9  ;;  %v1463_v2 = vmul.f32 %v3099_v55, %v3675_v10 }
 0x74c   : > { %2995 = vmatpush3.bf16.msra.mxu0 %v1590_v8  ;;  %v1465_v61 = vsub.f32 2.0, %v1461_v53  ;;  %v1249_v45 = vsub.f32 2.0, %v1245_v40  ;;  %v1247_v35 = vmul.f32 %v3101_v58, %v3671_v16  ;;  %v1321_v62 = vmul.f32 %v3609_v13, %v1254_v56  ;;  %v3103_v63 = vpop.eup %3102 }
 0x74d   : > { %2996 = vmatprep.subr.bf16.mxu0 %v1589_v25  ;;  %v1036_v39 = vmul.f32 %v3093_v27, %v1032_v31  ;;  %v1586_v16 = vpack.c.bf16 %v1572_v21, %v1571_v34  ;;  %v1467_v38 = vsub.f32 2.0, %v1463_v2  ;;  %v1462_v36 = vmul.f32 %v3103_v63, %v3677_v32  ;;  %v3105_v12 = vpop.eup %3104  ;;  %v1568_v32 = vld [vmem:[%s4771_s5 + $0x18] sm:$0xff]  ;;  %v2778_v21 = vld [vmem:[%s4772_s6] ss:$0 sm:$0xff] }
 0x74e   : > { %v1469_v13 = vmul.f32 %v3095_v17, %v1465_v61  ;;  %v1253_v37 = vmul.f32 %v3097_v48, %v1249_v45  ;;  %v1251_v22 = vsub.f32 2.0, %v1247_v35  ;;  %v1565_v17 = vld [vmem:[%s4771_s5] sm:$0xff]  ;;  %v1464_v24 = vmul.f32 %v3105_v12, %v3679_v44 }
 0x74f   : > { %v1471_v19 = vmul.f32 %v3099_v55, %v1467_v38  ;;  %v1466_v46 = vsub.f32 2.0, %v1462_v36  ;;  %v1782_v36 = vld [vmem:[%s4775_s9 + $0x1e8] sm:$0xff] }
 0x750   : > { %2997 = vmatpush3.bf16.msra.mxu0 %v1589_v25  ;;  %v1255_v20 = vmul.f32 %v3101_v58, %v1251_v22  ;;  %v1468_v26 = vsub.f32 2.0, %v1464_v24 }
 0x751   : > { %2998 = vmatprep.subr.bf16.mxu0 %v1588_v52  ;;  %v1470_v30 = vmul.f32 %v3103_v63, %v1466_v46 }
 0x752   : > { %v1322_v43 = vmul.f32 %v3613_v3, %v1255_v20  ;;  %v1472_v50 = vmul.f32 %v3105_v12, %v1468_v26  ;;  %v1777_v20 = vld [vmem:[%s4775_s9 + $0x1c0] sm:$0xff] }
 0x753   : > { %v2960_v42 = vpop.f32.mrf.mxu0 }
 0x754   : > { %2999 = vmatpush3.bf16.msra.mxu0 %v1588_v52  ;;  %v1104_v41 = vmul.f32 %v2960_v42, %v1035_v59  ;;  %v1585_v42 = vpack.c.bf16 %v1570_v0, %v1569_v11  ;;  %v1778_v0 = vld [vmem:[%s4775_s9 + $0x1c8] sm:$0xff] }
 0x755   : > { %v1087_v29 = vpop.f32.mrf.mxu0  ;;  %3000 = vmatprep.subr.bf16.mxu0 %v1587_v28  ;;  %v1816_v12 = vpack.c.bf16 %v1782_v36, %v1778_v0  ;;  %v1760_v36 = vld [vmem:[%s4775_s9 + $0x138] sm:$0xff] }
 0x756   : > { %v1102_v47 = vmul.f32 %v1087_v29, %v1033_v23  ;;  %v1320_v23 = vmul.f32 %v3615_v5, %v1253_v37  ;;  %v1567_v29 = vld [vmem:[%s4771_s5 + $0x10] sm:$0xff] }
 0x757   : > { %v2961_v49 = vpop.f32.mrf.mxu0  ;;  %v1584_v5 = vpack.c.bf16 %v1568_v32, %v1567_v29  ;;  %v1779_v29 = vld [vmem:[%s4775_s9 + $0x1d0] sm:$0xff]  ;;  %1841 = vmatprep.subr.bf16.mxu1 %v1816_v12  ;;  %v1757_v12 = vld [vmem:[%s4775_s9 + $0x120] sm:$0xff] }
 0x758   : > { %1110 = vrot.lane.b32.xlu0 %v1102_v47, %s3161_s14  ;;  %3001 = vmatpush3.bf16.msra.mxu0 %v1587_v28  ;;  %v1105_v6 = vmul.f32 %v2961_v49, %v1036_v39  ;;  %v1566_v47 = vld [vmem:[%s4771_s5 + $0x8] sm:$0xff]  ;;  %v1783_v32 = vld [vmem:[%s4775_s9 + $0x1f0] sm:$0xff] }
 0x759   : > { %v1090_v54 = vpop.f32.mrf.mxu0  ;;  %3002 = vmatprep.subr.bf16.mxu0 %v1586_v16  ;;  %v1583_v48 = vpack.c.bf16 %v1566_v47, %v1565_v17  ;;  %v1817_v17 = vpack.c.bf16 %v1783_v32, %v1779_v29  ;;  %v1746_v29 = vld [vmem:[%s4775_s9 + $0xc8] sm:$0xff] }
 0x75a   : > { %v1103_v57 = vmul.f32 %v1090_v54, %v1034_v51  ;;  %v1750_v32 = vld [vmem:[%s4775_s9 + $0xe8] sm:$0xff] }
 0x75c   : > { %1327 = vrot.lane.b32.xlu0 %v1319_v14, %s3160_s29  ;;  %1112 = vrot.lane.b32.xlu1 %v1103_v57, %s3161_s14 }
 0x75d   : > { %3003 = vmatpush3.bf16.msra.mxu0 %v1586_v16 }
 0x75e   : > { %3004 = vmatprep.subr.bf16.mxu0 %v1585_v42 }
 0x760   : > { %1331 = vrot.lane.b32.xlu0 %v1321_v62, %s3160_s29  ;;  %v2992_v10 = vpop.f32.mrf.mxu0  ;;  %1114 = vrot.lane.b32.xlu1 %v1104_v41, %s3161_s14  ;;  %v3146_v62 = vld [vmem:[%s3248_s30] sm:$0xff] }
 0x761   : > { %v1538_v25 = vmul.f32 %v2992_v10, %v1471_v19  ;;  %3005 = vmatpush3.bf16.msra.mxu0 %v1585_v42  ;;  %v3147_v10 = vld [vmem:[%s3248_s30 + $0x10] sm:$0xff]  ;;  %v1780_v42 = vld [vmem:[%s4775_s9 + $0x1d8] sm:$0xff] }
 0x762   : > { %v1521_v7 = vpop.f32.mrf.mxu0  ;;  %3006 = vmatprep.subr.bf16.mxu0 %v1584_v5  ;;  %v1784_v19 = vld [vmem:[%s4775_s9 + $0x1f8] sm:$0xff] }
 0x763   : > { %v1536_v8 = vmul.f32 %v1521_v7, %v1469_v13  ;;  %v3148_v13 = vld [vmem:[%s3248_s30 + $0x8] sm:$0xff] }
 0x764   : > { %1116 = vrot.lane.b32.xlu1 %v1105_v6, %s3161_s14  ;;  %v2993_v27 = vpop.f32.mrf.mxu0  ;;  %v3149_v6 = vld [vmem:[%s3248_s30 + $0x18] sm:$0xff] }
 0x765   : > { %1544 = vrot.lane.b32.xlu0 %v1536_v8, %s3159_s28  ;;  %3007 = vmatpush3.bf16.msra.mxu0 %v1584_v5  ;;  %v1539_v51 = vmul.f32 %v2993_v27, %v1472_v50 }
 0x766   : > { %v1524_v49 = vpop.f32.mrf.mxu0  ;;  %3008 = vmatprep.subr.bf16.mxu0 %v1583_v48 }
 0x767   : > { %v1537_v44 = vmul.f32 %v1524_v49, %v1470_v30 }
 0x768   : > { %1329 = vrot.lane.b32.xlu1 %v1320_v23, %s3160_s29  ;;  %v1781_v23 = vld [vmem:[%s4775_s9 + $0x1e0] sm:$0xff] }
 0x769   : > { %1548 = vrot.lane.b32.xlu0 %v1538_v25, %s3159_s28  ;;  %3009 = vmatpush3.bf16.msra.mxu0 %v1583_v48  ;;  %v1818_v25 = vpack.c.bf16 %v1784_v19, %v1780_v42  ;;  %v1815_v27 = vpack.c.bf16 %v1781_v23, %v1777_v20  ;;  %v1753_v42 = vld [vmem:[%s4775_s9 + $0x100] sm:$0xff]  ;;  %v1755_v23 = vld [vmem:[%s4775_s9 + $0x110] sm:$0xff] }
 0x76a   : > { %v1803_v20 = vpack.c.bf16 %v1757_v12, %v1753_v42  ;;  %v1723_v42 = vld [vmem:[%s4775_s9 + $0x10] sm:$0xff] }
 0x76b   : > { %1894 = vmatprep.subr.bf16.mxu0 %v1818_v25  ;;  %1842 = vmatpush1.bf16.msra.mxu1 %v1815_v27  ;;  %v1759_v25 = vld [vmem:[%s4775_s9 + $0x130] sm:$0xff] }
 0x76c   : > { %1333 = vrot.lane.b32.xlu1 %v1322_v43, %s3160_s29  ;;  %v1805_v27 = vpack.c.bf16 %v1759_v25, %v1755_v23  ;;  %v1727_v12 = vld [vmem:[%s4775_s9 + $0x30] sm:$0xff] }
 0x770   : > { %1546 = vrot.lane.b32.xlu1 %v1537_v44, %s3159_s28 }
 0x774   : > { %1550 = vrot.lane.b32.xlu1 %v1539_v51, %s3159_s28 }
 0x7ca   : > { %v1111_v52 = vpop.permute.xlu0 %1110 }
 0x7cb   : > { %1123 = vst.msk [vmem:[#allocation2] sm:$0xff] %vm1122_vm2, %v1111_v52 }
 0x7ce   : > { %v1328_v3 = vpop.permute.xlu0 %1327  ;;  %v1113_v53 = vpop.permute.xlu1 %1112 }
 0x7cf   : > { %1340 = vst.msk [vmem:[#allocation2] sm:$0xff] %vm1339_vm3, %v1328_v3 }
 0x7d0   : > { %1124 = vst.msk [vmem:[#allocation2 + $0x8] sm:$0xff] %vm1122_vm2, %v1113_v53 }
 0x7d2   : > { %v1332_v54 = vpop.permute.xlu0 %1331  ;;  %v1115_v55 = vpop.permute.xlu1 %1114 }
 0x7d3   : > { %1125 = vst.msk [vmem:[#allocation2 + $0x10] sm:$0xff] %vm1122_vm2, %v1115_v55  ;;  %v1770_v55 = vld [vmem:[%s4775_s9 + $0x188] sm:$0xff] }
 0x7d4   : > { %1342 = vst.msk [vmem:[#allocation2 + $0x10] sm:$0xff] %vm1339_vm3, %v1332_v54 }
 0x7d6   : > { %v1117_v40 = vpop.permute.xlu1 %1116 }
 0x7d7   : > { %1126 = vst.msk [vmem:[#allocation2 + $0x18] sm:$0xff] %vm1122_vm2, %v1117_v40  ;;  %v1545_v56 = vpop.permute.xlu0 %1544  ;;  %v1774_v40 = vld [vmem:[%s4775_s9 + $0x1a8] sm:$0xff] }
 0x7d8   : > { %1557 = vst.msk [vmem:[#allocation2] sm:$0xff] %vm1556_vm4, %v1545_v56  ;;  %v1772_v56 = vld [vmem:[%s4775_s9 + $0x198] sm:$0xff] }
 0x7da   : > { %v1330_v57 = vpop.permute.xlu1 %1329 }
 0x7db   : > { %1341 = vst.msk [vmem:[#allocation2 + $0x8] sm:$0xff] %vm1339_vm3, %v1330_v57  ;;  %v1549_v14 = vpop.permute.xlu0 %1548  ;;  %v1812_v57 = vpack.c.bf16 %v1774_v40, %v1770_v55  ;;  %v1744_v55 = vld [vmem:[%s4775_s9 + $0xb8] sm:$0xff] }
 0x7dc   : > { %1559 = vst.msk [vmem:[#allocation2 + $0x10] sm:$0xff] %vm1556_vm4, %v1549_v14  ;;  %v1776_v14 = vld [vmem:[%s4775_s9 + $0x1b8] sm:$0xff] }
 0x7dd   : > { %1843 = vmatprep.subr.bf16.mxu1 %v1812_v57  ;;  %v1737_v57 = vld [vmem:[%s4775_s9 + $0x80] sm:$0xff] }
 0x7de   : > { %v1334_v58 = vpop.permute.xlu1 %1333 }
 0x7df   : > { %1343 = vst.msk [vmem:[#allocation2 + $0x18] sm:$0xff] %vm1339_vm3, %v1334_v58  ;;  %v1561_v31 = vld [vmem:[#allocation2] sm:$0xff] }
 0x7e0   : > { %v1769_v58 = vld [vmem:[%s4775_s9 + $0x180] sm:$0xff] }
 0x7e2   : > { %v1547_v9 = vpop.permute.xlu1 %1546 }
 0x7e3   : > { %1558 = vst.msk [vmem:[#allocation2 + $0x8] sm:$0xff] %vm1556_vm4, %v1547_v9  ;;  %v1563_v61 = vld [vmem:[#allocation2 + $0x10] sm:$0xff]  ;;  %v1773_v9 = vld [vmem:[%s4775_s9 + $0x1a0] sm:$0xff] }
 0x7e6   : > { %v1551_v33 = vpop.permute.xlu1 %1550 }
 0x7e7   : > { %1560 = vst.msk [vmem:[#allocation2 + $0x18] sm:$0xff] %vm1556_vm4, %v1551_v33  ;;  %v1814_v33 = vpack.c.bf16 %v1776_v14, %v1772_v56  ;;  %v1741_v14 = vld [vmem:[%s4775_s9 + $0xa0] sm:$0xff] }
 0x7ea   : > { %v1562_v59 = vld [vmem:[#allocation2 + $0x8] sm:$0xff] }
 0x7eb   : > { %v1581_v28 = vpack.c.bf16 %v1562_v59, %v1561_v31  ;;  %v1811_v31 = vpack.c.bf16 %v1773_v9, %v1769_v58  ;;  %v1771_v59 = vld [vmem:[%s4775_s9 + $0x190] sm:$0xff]  ;;  %v1795_v9 = vpack.c.bf16 %v1741_v14, %v1737_v57 }
 0x7ec   : > { %v1739_v58 = vld [vmem:[%s4775_s9 + $0x90] sm:$0xff] }
 0x7ed   : > { %3010 = vmatprep.mubr.bf16.mxu0 %v1581_v28  ;;  %v1775_v28 = vld [vmem:[%s4775_s9 + $0x1b0] sm:$0xff]  ;;  %1844 = vmatpush1.bf16.msra.mxu1 %v1811_v31  ;;  %v1730_v31 = vld [vmem:[%s4775_s9 + $0x48] sm:$0xff] }
 0x7ee   : > { %v1564_v2 = vld [vmem:[#allocation2 + $0x18] sm:$0xff] }
 0x7ef   : > { %v1582_v45 = vpack.c.bf16 %v1564_v2, %v1563_v61  ;;  %v1813_v61 = vpack.c.bf16 %v1775_v28, %v1771_v59  ;;  %v1762_v2 = vld [vmem:[%s4775_s9 + $0x148] sm:$0xff] }
 0x7f0   : > { %v1734_v59 = vld [vmem:[%s4775_s9 + $0x68] sm:$0xff] }
 0x7f1   : > { %3011 = vmatmul.mubr.bf16.vlgmr.msra.gmra.mxu0 %v1582_v45  ;;  %v1766_v45 = vld [vmem:[%s4775_s9 + $0x168] sm:$0xff] }
 0x7f2   : > { %1926 = vmatprep.mubr.bf16.mxu0 %v3158_v60  ;;  %1895 = vmatpush1.bf16.msra.mxu0 %v1817_v17  ;;  %v1748_v17 = vld [vmem:[%s4775_s9 + $0xd8] sm:$0xff] }
 0x7f3   : > { %1896 = vmatprep.subr.bf16.mxu0 %v1814_v33  ;;  %v1743_v33 = vld [vmem:[%s4775_s9 + $0xb0] sm:$0xff] }
 0x7f4   : > { %v1797_v28 = vpack.c.bf16 %v1743_v33, %v1739_v58 }
 0x7f6   : > { %1897 = vmatpush1.bf16.msra.mxu0 %v1813_v61  ;;  %v1792_v61 = vpack.c.bf16 %v1734_v59, %v1730_v31 }
 0x8b1   : > { %v3012_v35 = vpop.f32.mrf.mxu0 }
 0x8b2   : > { %v1642_v16 = vadd.f32 %v3147_v10, %v3012_v35  ;;  %v1764_v35 = vld [vmem:[%s4775_s9 + $0x158] sm:$0xff] }
 0x8b3   : > { %v1625_v41 = vpop.f32.mrf.mxu0 }
 0x8b4   : > { %v1640_v34 = vadd.f32 %v3146_v62, %v1625_v41  ;;  %v3783_v22 = vadd.f32 %v2778_v21, %v1642_v16  ;;  %v1808_v41 = vpack.c.bf16 %v1766_v45, %v1762_v2  ;;  %v1768_v62 = vld [vmem:[%s4775_s9 + $0x178] sm:$0xff]  ;;  %v1763_v16 = vld [vmem:[%s4775_s9 + $0x150] sm:$0xff] }
 0x8b5   : > { %v3013_v39 = vpop.f32.mrf.mxu0  ;;  %v1732_v2 = vld [vmem:[%s4775_s9 + $0x58] sm:$0xff] }
 0x8b6   : > { %v3779_v63 = vadd.f32 %v2778_v21, %v1640_v34  ;;  %4794 = vst [vmem:[#allocation4_spill] sm:$0xff] %v3783_v22  ;;  %v1643_v7 = vadd.f32 %v3149_v6, %v3013_v39  ;;  %v1761_v34 = vld [vmem:[%s4775_s9 + $0x140] sm:$0xff]  ;;  %v1810_v39 = vpack.c.bf16 %v1768_v62, %v1764_v35  ;;  %1845 = vmatprep.subr.bf16.mxu1 %v1808_v41  ;;  %v1758_v6 = vld [vmem:[%s4775_s9 + $0x128] sm:$0xff]  ;;  %v1736_v45 = vld [vmem:[%s4775_s9 + $0x78] sm:$0xff] }
 0x8b7   : > { %v1628_v38 = vpop.f32.mrf.mxu0  ;;  %v1729_v35 = vld [vmem:[%s4775_s9 + $0x40] sm:$0xff]  ;;  %v1794_v41 = vpack.c.bf16 %v1736_v45, %v1732_v2 }
 0x8b8   : > { %4793 = vst [vmem:[#allocation3_spill] sm:$0xff] %v3779_v63  ;;  %v1641_v37 = vadd.f32 %v3148_v13, %v1628_v38  ;;  %1657 = vadd.xlane.f32.xlu0 %v3779_v63  ;;  %v3790_v11 = vadd.f32 %v2778_v21, %v1643_v7  ;;  %v1767_v38 = vld [vmem:[%s4775_s9 + $0x170] sm:$0xff]  ;;  %1898 = vmatprep.subr.bf16.mxu0 %v1810_v39  ;;  %v1756_v7 = vld [vmem:[%s4775_s9 + $0x118] sm:$0xff]  ;;  %v1733_v62 = vld [vmem:[%s4775_s9 + $0x60] sm:$0xff] }
 0x8b9   : > { %v1809_v13 = vpack.c.bf16 %v1767_v38, %v1763_v16  ;;  %v1806_v19 = vpack.c.bf16 %v1760_v36, %v1756_v7  ;;  %v1791_v39 = vpack.c.bf16 %v1733_v62, %v1729_v35  ;;  %v1726_v16 = vld [vmem:[%s4775_s9 + $0x28] sm:$0xff]  ;;  %v1724_v38 = vld [vmem:[%s4775_s9 + $0x18] sm:$0xff]  ;;  %v1721_v7 = vld [vmem:[%s4775_s9] sm:$0xff] }
 0x8ba   : > { %v3786_v8 = vadd.f32 %v2778_v21, %v1641_v37  ;;  %4796 = vst [vmem:[#allocation6_spill] sm:$0xff] %v3790_v11  ;;  %v1765_v21 = vld [vmem:[%s4775_s9 + $0x160] sm:$0xff]  ;;  %v1754_v37 = vld [vmem:[%s4775_s9 + $0x108] sm:$0xff]  ;;  %v2506_v35 = vld [vmem:[%s4777_s11 + $0xf8] sm:$0xff] }
 0x8bb   : > { %v1807_v10 = vpack.c.bf16 %v1765_v21, %v1761_v34  ;;  %1899 = vmatpush1.bf16.msra.mxu0 %v1809_v13  ;;  %v1804_v0 = vpack.c.bf16 %v1758_v6, %v1754_v37  ;;  %v1731_v34 = vld [vmem:[%s4775_s9 + $0x50] sm:$0xff]  ;;  %v1728_v6 = vld [vmem:[%s4775_s9 + $0x38] sm:$0xff] }
 0x8bc   : > { %4795 = vst [vmem:[#allocation5_spill] sm:$0xff] %v3786_v8  ;;  %1661 = vadd.xlane.f32.xlu0 %v3783_v22  ;;  %1659 = vadd.xlane.f32.xlu1 %v3786_v8  ;;  %v1735_v21 = vld [vmem:[%s4775_s9 + $0x70] sm:$0xff]  ;;  %v1790_v36 = vpack.c.bf16 %v1728_v6, %v1724_v38  ;;  %v2522_v6 = vld [vmem:[%s4777_s11 + $0x178] sm:$0xff] }
 0x8bd   : > { %1846 = vmatpush1.bf16.msra.mxu1 %v1807_v10  ;;  %1900 = vmatprep.subr.bf16.mxu0 %v1806_v19  ;;  %v1722_v10 = vld [vmem:[%s4775_s9 + $0x8] sm:$0xff]  ;;  %v1793_v13 = vpack.c.bf16 %v1735_v21, %v1731_v34  ;;  %v2490_v34 = vld [vmem:[%s4777_s11 + $0x78] sm:$0xff] }
 0x8be   : > { %1847 = vmatprep.subr.bf16.mxu1 %v1804_v0  ;;  %v1788_v37 = vpack.c.bf16 %v1726_v16, %v1722_v10  ;;  %v1725_v0 = vld [vmem:[%s4775_s9 + $0x20] sm:$0xff] }
 0x8bf   : > { %1901 = vmatpush1.bf16.msra.mxu0 %v1805_v27  ;;  %v1787_v19 = vpack.c.bf16 %v1725_v0, %v1721_v7 }
 0x8c0   : > { %1663 = vadd.xlane.f32.xlu0 %v3790_v11 }
 0x8c1   : > { %1848 = vmatpush1.bf16.msra.mxu1 %v1803_v20  ;;  %v1789_v20 = vpack.c.bf16 %v1727_v12, %v1723_v42  ;;  %v2503_v42 = vld [vmem:[%s4777_s11 + $0xe0] sm:$0xff]  ;;  %v2504_v12 = vld [vmem:[%s4777_s11 + $0xe8] sm:$0xff] }
 0x941   : > { %v1658_v46 = vpop.xlane.xlu0 %1657 }
 0x942   : > { %v1665_v24 = vmul.f32 0.0078125, %v1658_v46  ;;  %v1800_v46 = vpack.c.bf16 %v1750_v32, %v1746_v29 }
 0x944   : > { %v3818_v5 = vsub.f32 %v3779_v63, %v1665_v24  ;;  %v1752_v24 = vld [vmem:[%s4775_s9 + $0xf8] sm:$0xff]  ;;  %1849 = vmatprep.subr.bf16.mxu1 %v1800_v46 }
 0x945   : > { %v1662_v47 = vpop.xlane.xlu0 %1661  ;;  %v1660_v48 = vpop.xlane.xlu1 %1659 }
 0x946   : > { %v1667_v43 = vmul.f32 0.0078125, %v1662_v47  ;;  %v1666_v49 = vmul.f32 0.0078125, %v1660_v48  ;;  %v1673_v26 = vmul.f32 %v3818_v5, %v3818_v5  ;;  %v1745_v47 = vld [vmem:[%s4775_s9 + $0xc0] sm:$0xff] }
 0x947   : > { %v1749_v48 = vld [vmem:[%s4775_s9 + $0xe0] sm:$0xff] }
 0x948   : > { %v3823_v30 = vsub.f32 %v3783_v22, %v1667_v43  ;;  %v3826_v44 = vsub.f32 %v3786_v8, %v1666_v49  ;;  %1677 = vadd.xlane.f32.xlu0 %v1673_v26  ;;  %v1802_v43 = vpack.c.bf16 %v1752_v24, %v1748_v17  ;;  %v1799_v49 = vpack.c.bf16 %v1749_v48, %v1745_v47  ;;  %v1747_v26 = vld [vmem:[%s4775_s9 + $0xd0] sm:$0xff] }
 0x949   : > { %v1664_v50 = vpop.xlane.xlu0 %1663 }
 0x94a   : > { %v1668_v51 = vmul.f32 0.0078125, %v1664_v50  ;;  %v1675_v52 = vmul.f32 %v3823_v30, %v3823_v30  ;;  %v1674_v3 = vmul.f32 %v3826_v44, %v3826_v44  ;;  %v1751_v50 = vld [vmem:[%s4775_s9 + $0xf0] sm:$0xff]  ;;  %1902 = vmatprep.subr.bf16.mxu0 %v1802_v43  ;;  %1850 = vmatpush1.bf16.msra.mxu1 %v1799_v49 }
 0x94c   : > { %v3833_v53 = vsub.f32 %v3790_v11, %v1668_v51  ;;  %1681 = vadd.xlane.f32.xlu0 %v1675_v52  ;;  %1679 = vadd.xlane.f32.xlu1 %v1674_v3  ;;  %v1738_v51 = vld [vmem:[%s4775_s9 + $0x88] sm:$0xff]  ;;  %v1801_v52 = vpack.c.bf16 %v1751_v50, %v1747_v26 }
 0x94d   : > { %v1742_v3 = vld [vmem:[%s4775_s9 + $0xa8] sm:$0xff] }
 0x94e   : > { %v1676_v54 = vmul.f32 %v3833_v53, %v3833_v53  ;;  %v1796_v40 = vpack.c.bf16 %v1742_v3, %v1738_v51  ;;  %1903 = vmatpush1.bf16.msra.mxu0 %v1801_v52  ;;  %v2779_v51 = vld [vmem:[%s4773_s7] ss:$0 sm:$0xff] }
 0x950   : > { %1683 = vadd.xlane.f32.xlu1 %v1676_v54  ;;  %v1740_v54 = vld [vmem:[%s4775_s9 + $0x98] sm:$0xff]  ;;  %1851 = vmatprep.subr.bf16.mxu1 %v1796_v40  ;;  %v2780_v40 = vld [vmem:[%s4774_s8] ss:$0 sm:$0xff] }
 0x951   : > { %v1798_v56 = vpack.c.bf16 %v1744_v55, %v1740_v54  ;;  %1852 = vmatpush1.bf16.msra.mxu1 %v1795_v9 }
 0x952   : > { %1853 = vmatprep.subr.bf16.mxu1 %v1792_v61 }
 0x953   : > { %1904 = vmatprep.subr.bf16.mxu0 %v1798_v56 }
 0x954   : > { %1905 = vmatpush1.bf16.msra.mxu0 %v1797_v28 }
 0x955   : > { %1906 = vmatprep.subr.bf16.mxu0 %v1794_v41  ;;  %1854 = vmatpush1.bf16.msra.mxu1 %v1791_v39  ;;  %v2537_v41 = vld [vmem:[%s4777_s11 + $0x1f0] sm:$0xff] }
 0x956   : > { %1855 = vmatprep.subr.bf16.mxu1 %v1788_v37  ;;  %v2521_v37 = vld [vmem:[%s4777_s11 + $0x170] sm:$0xff] }
 0x958   : > { %1907 = vmatpush1.bf16.msra.mxu0 %v1793_v13 }
 0x959   : > { %1908 = vmatprep.subr.bf16.mxu0 %v1790_v36  ;;  %1856 = vmatpush1.bf16.msra.mxu1 %v1787_v19 }
 0x95c   : > { %1909 = vmatpush1.bf16.msra.mxu0 %v1789_v20 }
 0x9d1   : > { %v1678_v23 = vpop.xlane.xlu0 %1677 }
 0x9d2   : > { %v1685_v25 = vmul.f32 0.0078125, %v1678_v23 }
 0x9d4   : > { %v1689_v27 = vadd.f32 1e-06, %v1685_v25 }
 0x9d5   : > { %v1682_v29 = vpop.xlane.xlu0 %1681  ;;  %v1680_v32 = vpop.xlane.xlu1 %1679 }
 0x9d6   : > { %3106 = vrsqrt.f32 %v1689_v27  ;;  %v1687_v17 = vmul.f32 0.0078125, %v1682_v29  ;;  %v1686_v46 = vmul.f32 0.0078125, %v1680_v32  ;;  %v2561_v27 = vpack.c.bf16 %v2504_v12, %v2503_v42 }
 0x9d8   : > { %v1690_v24 = vadd.f32 1e-06, %v1686_v46  ;;  %v1691_v47 = vadd.f32 1e-06, %v1687_v17 }
 0x9d9   : > { %v1684_v48 = vpop.xlane.xlu1 %1683 }
 0x9da   : > { %v1688_v43 = vmul.f32 0.0078125, %v1684_v48  ;;  %3108 = vrsqrt.f32 %v1690_v24 }
 0x9db   : > { %3110 = vrsqrt.f32 %v1691_v47 }
 0x9dc   : > { %v1692_v49 = vadd.f32 1e-06, %v1688_v43 }
 0x9de   : > { %3112 = vrsqrt.f32 %v1692_v49 }
 0x9e3   : > { %v3107_v26 = vpop.eup %3106 }
 0x9e4   : > { %v1697_v50 = vmul.f32 %v3107_v26, %v3818_v5 }
 0x9e6   : > { %v1707_v54 = vmul.f32 %v2779_v51, %v1697_v50 }
 0x9e7   : > { %v3109_v52 = vpop.eup %3108 }
 0x9e8   : > { %v1698_v3 = vmul.f32 %v3109_v52, %v3826_v44  ;;  %v3111_v55 = vpop.eup %3110  ;;  %v1717_v58 = vadd.f32 %v2780_v40, %v1707_v54 }
 0x9e9   : > { %v1699_v5 = vmul.f32 %v3111_v55, %v3823_v30  ;;  %v1835_v30 = vsub.s32 3, %v3426_v15  ;;  %v2570_v15 = vpack.c.bf16 %v2522_v6, %v2521_v37 }
 0x9ea   : > { %v1708_v57 = vmul.f32 %v2779_v51, %v1698_v3 }
 0x9eb   : > { %v3113_v56 = vpop.eup %3112  ;;  %v1709_v59 = vmul.f32 %v2779_v51, %v1699_v5 }
 0x9ec   : > { %v1700_v14 = vmul.f32 %v3113_v56, %v3833_v53  ;;  %v1718_v9 = vadd.f32 %v2780_v40, %v1708_v57  ;;  %v1819_v53 = vld [vmem:[%s4776_s10] sm:$0xf] }
 0x9ed   : > { %v1719_v28 = vadd.f32 %v2780_v40, %v1709_v59  ;;  %v4023_v2 = vrot.slane %v1819_v53, %v591_v1  ;;  %v4027_v45 = vrot.slane %v1819_v53, %v599_v4  ;;  %v2538_v1 = vld [vmem:[%s4777_s11 + $0x1f8] sm:$0xff]  ;;  %v2489_v4 = vld [vmem:[%s4777_s11 + $0x70] sm:$0xff]  ;;  %v4049_v10 = vrot.slane %v1819_v53, %v595_v18 }
 0x9ee   : > { %v1785_v33 = vpack.c.bf16 %v1718_v9, %v1717_v58  ;;  %v1710_v31 = vmul.f32 %v2779_v51, %v1700_v14  ;;  %v4051_v16 = vrot.slane %v1819_v53, %v1835_v30  ;;  %v2578_v38 = vpack.c.bf16 %v2538_v1, %v2537_v41 }
 0x9ef   : > { %v2554_v13 = vpack.c.bf16 %v2490_v34, %v2489_v4 }
 0x9f0   : > { %1874 = vmatmul.mubr.bf16.vlgmr.msra.gmra.mxu1 %v1785_v33  ;;  %1927 = vmatmul.mubr.bf16.vlgmr.msra.gmra.mxu0 %v1785_v33  ;;  %v1720_v44 = vadd.f32 %v2780_v40, %v1710_v31 }
 0x9f1   : > { %1883 = vmatprep.mubr.bf16.mxu1 %v3158_v60  ;;  %1936 = vmatprep.mubr.bf16.mxu0 %v3158_v60  ;;  %v2505_v60 = vld [vmem:[%s4777_s11 + $0xf0] sm:$0xff] }
 0x9f2   : > { %v1786_v61 = vpack.c.bf16 %v1720_v44, %v1719_v28  ;;  %v2562_v62 = vpack.c.bf16 %v2506_v35, %v2505_v60  ;;  %2882 = vmatprep.subr.bf16.mxu0 %v2578_v38 }
 0x9f3   : > { %2883 = vmatpush3.bf16.msra.mxu0 %v2570_v15 }
 0x9f4   : > { %2854 = vmatprep.subr.bf16.mxu1 %v2562_v62 }
 0x9f5   : > { %2855 = vmatpush3.bf16.msra.mxu1 %v2554_v13 }
 0x9f6   : > { %2856 = vmatprep.subr.bf16.mxu1 %v2561_v27 }
 0x9f8   : > { %1884 = vmatmul.mubr.bf16.gmra.mxu1 %v1786_v61  ;;  %1937 = vmatmul.mubr.bf16.gmra.mxu0 %v1786_v61 }
 0xab0   : > { %v1875_v21 = vpop.f32.mrf.mxu1  ;;  %v1928_v39 = vpop.f32.mrf.mxu0 }
 0xab1   : > { %v4060_v7 = vadd.f32 %v1875_v21, %v4023_v2  ;;  %v4063_v0 = vadd.f32 %v1928_v39, %v4027_v45 }
 0xab2   : > { %v1877_v18 = vpop.f32.mrf.mxu1  ;;  %v1930_v36 = vpop.f32.mrf.mxu0 }
 0xab3   : > { %v1963_v19 = vmul.f32 0.70710677, %v4060_v7  ;;  %v1965_v20 = vmul.f32 0.70710677, %v4063_v0  ;;  %v4074_v23 = vadd.f32 %v1877_v18, %v4049_v10  ;;  %v4077_v25 = vadd.f32 %v1930_v36, %v4051_v16 }
 0xab4   : > { %v1879_v49 = vpop.f32.mrf.mxu1  ;;  %v1932_v44 = vpop.f32.mrf.mxu0 }
 0xab5   : > { %v4079_v29 = vclamps-f32 %v1963_v19, 4.0  ;;  %v4081_v32 = vclamps-f32 %v1965_v20, 4.0  ;;  %v1964_v17 = vmul.f32 0.70710677, %v4074_v23  ;;  %v1966_v48 = vmul.f32 0.70710677, %v4077_v25 }
 0xab6   : > { %v4104_v3 = vadd.f32 %v1879_v49, %v4023_v2  ;;  %v4124_v1 = vadd.f32 %v1932_v44, %v4027_v45  ;;  %v1881_v20 = vpop.f32.mrf.mxu1 }
 0xab7   : > { %v4086_v46 = vmul.f32 %v4079_v29, %v4079_v29  ;;  %v4090_v24 = vmul.f32 %v4081_v32, %v4081_v32  ;;  %v4092_v47 = vclamps-f32 %v1964_v17, 4.0  ;;  %v4101_v52 = vclamps-f32 %v1966_v48, 4.0 }
 0xab8   : > { %v1967_v58 = vmul.f32 0.70710677, %v4104_v3  ;;  %v1969_v18 = vmul.f32 0.70710677, %v4124_v1 }
 0xab9   : > { %v2219_v43 = vmul.f32 -1.45660715e-05, %v4086_v46  ;;  %v2221_v26 = vmul.f32 -1.45660715e-05, %v4090_v24  ;;  %v4099_v50 = vmul.f32 %v4092_v47, %v4092_v47  ;;  %v2027_v54 = vmul.f32 -2.7261424e-10, %v4086_v46 }
 0xaba   : > { %v2029_v55 = vmul.f32 -2.7261424e-10, %v4090_v24  ;;  %v4112_v14 = vmul.f32 %v4101_v52, %v4101_v52  ;;  %v4118_v53 = vclamps-f32 %v1967_v58, 4.0 }
 0xabb   : > { %v2235_v51 = vadd.f32 -0.00021337405, %v2219_v43  ;;  %v2237_v40 = vadd.f32 -0.00021337405, %v2221_v26  ;;  %v2220_v56 = vmul.f32 -1.45660715e-05, %v4099_v50 }
 0xabc   : > { %v2043_v9 = vadd.f32 2.7706815e-08, %v2027_v54  ;;  %v2045_v5 = vadd.f32 2.7706815e-08, %v2029_v55  ;;  %v2028_v33 = vmul.f32 -2.7261424e-10, %v4099_v50  ;;  %v4130_v39 = vmul.f32 %v4118_v53, %v4118_v53 }
 0xabd   : > { %v2251_v57 = vmul.f32 %v2235_v51, %v4086_v46  ;;  %v2253_v31 = vmul.f32 %v2237_v40, %v4090_v24  ;;  %v2236_v59 = vadd.f32 -0.00021337405, %v2220_v56  ;;  %v2222_v61 = vmul.f32 -1.45660715e-05, %v4112_v14 }
 0xabe   : > { %v2059_v30 = vmul.f32 %v2043_v9, %v4086_v46  ;;  %v2061_v60 = vmul.f32 %v2045_v5, %v4090_v24  ;;  %v2044_v35 = vadd.f32 2.7706815e-08, %v2028_v33  ;;  %v2030_v62 = vmul.f32 -2.7261424e-10, %v4112_v14 }
 0xabf   : > { %v2267_v28 = vadd.f32 -0.001682827, %v2251_v57  ;;  %v2269_v41 = vadd.f32 -0.001682827, %v2253_v31  ;;  %v2252_v4 = vmul.f32 %v2236_v59, %v4099_v50  ;;  %v2238_v21 = vadd.f32 -0.00021337405, %v2222_v61 }
 0xac0   : > { %v2075_v38 = vadd.f32 -2.101024e-06, %v2059_v30  ;;  %v2077_v13 = vadd.f32 -2.101024e-06, %v2061_v60  ;;  %v2060_v37 = vmul.f32 %v2044_v35, %v4099_v50  ;;  %v2046_v15 = vadd.f32 2.7706815e-08, %v2030_v62 }
 0xac1   : > { %v2283_v34 = vmul.f32 %v2267_v28, %v4086_v46  ;;  %v2285_v6 = vmul.f32 %v2269_v41, %v4090_v24  ;;  %v2268_v36 = vadd.f32 -0.001682827, %v2252_v4  ;;  %v2254_v12 = vmul.f32 %v2238_v21, %v4112_v14  ;;  %v1934_v4 = vpop.f32.mrf.mxu0 }
 0xac2   : > { %v2223_v19 = vmul.f32 -1.45660715e-05, %v4130_v39  ;;  %v2091_v27 = vmul.f32 %v2075_v38, %v4086_v46  ;;  %v2093_v17 = vmul.f32 %v2077_v13, %v4090_v24  ;;  %v2076_v48 = vadd.f32 -2.101024e-06, %v2060_v37 }
 0xac3   : > { %v2299_v42 = vadd.f32 -0.0073733293, %v2283_v34  ;;  %v2301_v43 = vadd.f32 -0.0073733293, %v2285_v6  ;;  %v2062_v49 = vmul.f32 %v2046_v15, %v4112_v14  ;;  %v4140_v51 = vclamps-f32 %v1969_v18, 4.0 }
 0xac4   : > { %v2239_v26 = vadd.f32 -0.00021337405, %v2223_v19  ;;  %v2284_v54 = vmul.f32 %v2268_v36, %v4099_v50  ;;  %v4144_v55 = vadd.f32 %v1881_v20, %v4049_v10  ;;  %v2270_v56 = vadd.f32 -0.001682827, %v2254_v12 }
 0xac5   : > { %v2315_v40 = vmul.f32 %v2299_v42, %v4086_v46  ;;  %v2031_v57 = vmul.f32 -2.7261424e-10, %v4130_v39  ;;  %v4150_v58 = vmul.f32 %v4140_v51, %v4140_v51  ;;  %v2107_v9 = vadd.f32 -5.6925062e-05, %v2091_v27 }
 0xac6   : > { %v2092_v5 = vmul.f32 %v2076_v48, %v4099_v50  ;;  %v2109_v33 = vadd.f32 -5.6925062e-05, %v2093_v17  ;;  %v2317_v31 = vmul.f32 %v2301_v43, %v4090_v24  ;;  %v2078_v59 = vadd.f32 -2.101024e-06, %v2062_v49 }
 0xac7   : > { %v2255_v44 = vmul.f32 %v2239_v26, %v4130_v39  ;;  %v2300_v28 = vadd.f32 -0.0073733293, %v2284_v54  ;;  %v2225_v61 = vmul.f32 -1.45660715e-05, %v4150_v58  ;;  %v1968_v30 = vmul.f32 0.70710677, %v4144_v55 }
 0xac8   : > { %v4157_v60 = vadd.f32 -0.014264739, %v2315_v40  ;;  %v2286_v35 = vmul.f32 %v2270_v56, %v4112_v14  ;;  %v2047_v41 = vadd.f32 2.7706815e-08, %v2031_v57  ;;  %v2033_v62 = vmul.f32 -2.7261424e-10, %v4150_v58 }
 0xac9   : > { %v2123_v34 = vmul.f32 %v2107_v9, %v4086_v46  ;;  %v2108_v21 = vadd.f32 -5.6925062e-05, %v2092_v5  ;;  %v2241_v38 = vadd.f32 -0.00021337405, %v2225_v61  ;;  %v2125_v13 = vmul.f32 %v2109_v33, %v4090_v24 }
 0xaca   : > { %v4163_v37 = vadd.f32 -0.014264739, %v2317_v31  ;;  %v2094_v6 = vmul.f32 %v2078_v59, %v4112_v14  ;;  %v2271_v15 = vadd.f32 -0.001682827, %v2255_v44  ;;  %v2316_v18 = vmul.f32 %v2300_v28, %v4099_v50 }
 0xacb   : > { %v2257_v36 = vmul.f32 %v2241_v38, %v4150_v58  ;;  %v4168_v42 = vclamps-f32 %v1968_v30, 4.0  ;;  %v4171_v12 = vadd.f32 %v1934_v4, %v4051_v16  ;;  %3114 = vrcp.f32 %v4157_v60 }
 0xacc   : > { %v2302_v19 = vadd.f32 -0.0073733293, %v2286_v35  ;;  %v2063_v20 = vmul.f32 %v2047_v41, %v4130_v39  ;;  %v2049_v27 = vadd.f32 2.7706815e-08, %v2033_v62  ;;  %v2139_v17 = vadd.f32 -0.00073499064, %v2123_v34  ;;  %v1885_v35 = vpop.f32.mrf.mxu1 }
 0xacd   : > { %v2124_v48 = vmul.f32 %v2108_v21, %v4099_v50  ;;  %v2273_v43 = vadd.f32 -0.001682827, %v2257_v36  ;;  %v2141_v49 = vadd.f32 -0.00073499064, %v2125_v13  ;;  %3116 = vrcp.f32 %v4163_v37 }
 0xace   : > { %v2110_v26 = vadd.f32 -5.6925062e-05, %v2094_v6  ;;  %v2287_v54 = vmul.f32 %v2271_v15, %v4130_v39  ;;  %v4178_v40 = vadd.f32 -0.014264739, %v2316_v18  ;;  %v4183_v57 = vmul.f32 %v4168_v42, %v4168_v42 }
 0xacf   : > { %v2289_v56 = vmul.f32 %v2273_v43, %v4150_v58  ;;  %v2318_v9 = vmul.f32 %v2302_v19, %v4112_v14  ;;  %v2079_v5 = vadd.f32 -2.101024e-06, %v2063_v20  ;;  %v2065_v33 = vmul.f32 %v2049_v27, %v4150_v58 }
 0xad0   : > { %v1970_v31 = vmul.f32 0.70710677, %v4171_v12  ;;  %v2155_v59 = vmul.f32 %v2139_v17, %v4086_v46  ;;  %v2140_v44 = vadd.f32 -0.00073499064, %v2124_v48  ;;  %v2157_v28 = vmul.f32 %v2141_v49, %v4090_v24 }
 0xad1   : > { %v2126_v61 = vmul.f32 %v2110_v26, %v4112_v14  ;;  %v2303_v30 = vadd.f32 -0.0073733293, %v2287_v54  ;;  %v4192_v41 = vmul.f32 0.5, %v4060_v7  ;;  %3118 = vrcp.f32 %v4178_v40 }
 0xad2   : > { %v2305_v62 = vadd.f32 -0.0073733293, %v2289_v56  ;;  %v2032_v4 = vmul.f32 -2.7261424e-10, %v4183_v57  ;;  %v4196_v34 = vadd.f32 -0.014264739, %v2318_v9  ;;  %v2095_v21 = vmul.f32 %v2079_v5, %v4130_v39 }
 0xad3   : > { %v2081_v38 = vadd.f32 -2.101024e-06, %v2065_v33  ;;  %v4199_v13 = vclamps-f32 %v1970_v31, 4.0  ;;  %v2171_v6 = vadd.f32 -0.0029546001, %v2155_v59  ;;  %v4202_v15 = vmul.f32 0.5, %v4063_v0 }
 0xad4   : > { %v2156_v18 = vmul.f32 %v2140_v44, %v4099_v50  ;;  %v4206_v7 = vadd.f32 %v1885_v35, %v4023_v2  ;;  %v2173_v36 = vadd.f32 -0.0029546001, %v2157_v28  ;;  %v4209_v19 = vmul.f32 0.5, %v4074_v23 }
 0xad5   : > { %v2142_v20 = vadd.f32 -0.00073499064, %v2126_v61  ;;  %v2319_v27 = vmul.f32 %v2303_v30, %v4130_v39  ;;  %v4213_v17 = vmul.f32 0.5, %v4077_v25  ;;  %v4216_v48 = vmul.f32 0.5, %v4104_v3 }
 0xad6   : > { %4797 = vst [vmem:[#allocation7_spill] sm:$0xff] %v4206_v7  ;;  %v2321_v0 = vmul.f32 %v2305_v62, %v4150_v58  ;;  %v2048_v43 = vadd.f32 2.7706815e-08, %v2032_v4  ;;  %3120 = vrcp.f32 %v4196_v34  ;;  %v2111_v49 = vadd.f32 -5.6925062e-05, %v2095_v21 }
 0xad7   : > { %v2097_v26 = vmul.f32 %v2081_v38, %v4150_v58  ;;  %v4223_v23 = vmul.f32 %v4199_v13, %v4199_v13  ;;  %v2187_v56 = vmul.f32 %v2171_v6, %v4086_v46  ;;  %v2172_v25 = vadd.f32 -0.0029546001, %v2156_v18 }
 0xad8   : > { %v3115_v54 = vpop.eup %3114  ;;  %v2224_v9 = vmul.f32 -1.45660715e-05, %v4183_v57  ;;  %v1971_v3 = vmul.f32 0.70710677, %v4206_v7  ;;  %v2189_v5 = vmul.f32 %v2173_v36, %v4090_v24  ;;  %v2158_v33 = vmul.f32 %v2142_v20, %v4112_v14 }
 0xad9   : > { %v4230_v31 = vadd.f32 -0.014264739, %v2319_v27  ;;  %v2034_v59 = vmul.f32 -2.7261424e-10, %v4223_v23  ;;  %v4233_v28 = vadd.f32 -0.014264739, %v2321_v0  ;;  %v2064_v61 = vmul.f32 %v2048_v43, %v4183_v57 }
 0xada   : > { %v3117_v44 = vpop.eup %3116  ;;  %v2226_v46 = vmul.f32 -1.45660715e-05, %v4223_v23  ;;  %v4237_v30 = vclamps-f32 %v1971_v3, 4.0  ;;  %v2363_v35 = vmul.f32 %v3115_v54, %v4157_v60  ;;  %v2127_v62 = vmul.f32 %v2111_v49, %v4130_v39  ;;  %v1938_v60 = vpop.f32.mrf.mxu0 }
 0xadb   : > { %v2113_v24 = vadd.f32 -5.6925062e-05, %v2097_v26  ;;  %v2050_v4 = vadd.f32 2.7706815e-08, %v2034_v59  ;;  %v2203_v21 = vadd.f32 -0.016096033, %v2187_v56  ;;  %v2188_v38 = vmul.f32 %v2172_v25, %v4099_v50 }
 0xadc   : > { %v2240_v6 = vadd.f32 -0.00021337405, %v2224_v9  ;;  %v4244_v18 = vmul.f32 %v4237_v30, %v4237_v30  ;;  %v2365_v36 = vmul.f32 %v3117_v44, %v4163_v37  ;;  %v2174_v20 = vadd.f32 -0.0029546001, %v2158_v33 }
 0xadd   : > { %3122 = vrcp.f32 %v4230_v31  ;;  %v2066_v27 = vmul.f32 %v2050_v4, %v4223_v23  ;;  %v2080_v0 = vadd.f32 -2.101024e-06, %v2064_v61  ;;  %v2242_v43 = vadd.f32 -0.00021337405, %v2226_v46 }
 0xade   : > { %3124 = vrcp.f32 %v4233_v28  ;;  %v2035_v49 = vmul.f32 -2.7261424e-10, %v4244_v18  ;;  %v3119_v50 = vpop.eup %3118  ;;  %v2379_v26 = vsub.f32 2.0, %v2363_v35  ;;  %v2143_v56 = vadd.f32 -0.00073499064, %v2127_v62 }
 0xadf   : > { %v4252_v25 = vmul.f32 0.5, %v4124_v1  ;;  %v2129_v37 = vmul.f32 %v2113_v24, %v4150_v58  ;;  %v2411_v9 = vmul.f32 %v4079_v29, %v2203_v21  ;;  %v2205_v3 = vadd.f32 -0.016096033, %v2189_v5 }
 0xae0   : > { %v2256_v33 = vmul.f32 %v2240_v6, %v4183_v57  ;;  %v4258_v59 = vadd.f32 %v1938_v60, %v4027_v45  ;;  %v2190_v61 = vmul.f32 %v2174_v20, %v4112_v14  ;;  %v4262_v46 = vmul.f32 0.5, %v4144_v55 }
 0xae1   : > { %v2082_v35 = vadd.f32 -2.101024e-06, %v2066_v27  ;;  %v2051_v62 = vadd.f32 2.7706815e-08, %v2035_v49  ;;  %v2381_v4 = vsub.f32 2.0, %v2365_v36  ;;  %v2096_v11 = vmul.f32 %v2080_v0, %v4183_v57 }
 0xae2   : > { %4798 = vst [vmem:[#allocation8_spill] sm:$0xff] %v4258_v59  ;;  %v2204_v1 = vadd.f32 -0.016096033, %v2188_v38  ;;  %v2258_v24 = vmul.f32 %v2242_v43, %v4223_v23  ;;  %v2395_v29 = vmul.f32 %v3115_v54, %v2379_v26  ;;  %v2364_v5 = vmul.f32 %v3119_v50, %v4178_v40 }
 0xae3   : > { %v2159_v21 = vmul.f32 %v2143_v56, %v4130_v39  ;;  %v2145_v6 = vadd.f32 -0.00073499064, %v2129_v37  ;;  %v4268_v60 = vpop.eup %3120  ;;  %v2413_v14 = vmul.f32 %v4081_v32, %v2205_v3  ;;  %v2272_v55 = vadd.f32 -0.001682827, %v2256_v33  ;;  %v1887_v56 = vpop.f32.mrf.mxu1 }
 0xae4   : > { %v2227_v20 = vmul.f32 -1.45660715e-05, %v4244_v18  ;;  %v1973_v36 = vmul.f32 0.70710677, %v4258_v59  ;;  %v2206_v38 = vadd.f32 -0.016096033, %v2190_v61  ;;  %v2098_v54 = vmul.f32 %v2082_v35, %v4223_v23  ;;  %v1940_v61 = vpop.f32.mrf.mxu0 }
 0xae5   : > { %v4274_v27 = vmul.f32 0.5, %v4171_v12  ;;  %v2067_v40 = vmul.f32 %v2051_v62, %v4244_v18  ;;  %v2397_v0 = vmul.f32 %v3117_v44, %v2381_v4  ;;  %v2412_v43 = vmul.f32 %v4092_v47, %v2204_v1 }
 0xae6   : > { %v2112_v49 = vadd.f32 -5.6925062e-05, %v2096_v11  ;;  %v2274_v26 = vadd.f32 -0.001682827, %v2258_v24  ;;  %v2427_v32 = vmul.f32 %v2411_v9, %v2395_v29  ;;  %v2380_v37 = vsub.f32 2.0, %v2364_v5 }
 0xae7   : > { %v2366_v3 = vmul.f32 %v4268_v60, %v4196_v34  ;;  %v2175_v33 = vadd.f32 -0.0029546001, %v2159_v21  ;;  %v2161_v12 = vmul.f32 %v2145_v6, %v4150_v58  ;;  %v2288_v22 = vmul.f32 %v2272_v55, %v4183_v57 }
 0xae8   : > { %v2243_v35 = vadd.f32 -0.00021337405, %v2227_v20  ;;  %v4283_v8 = vclamps-f32 %v1973_v36, 4.0  ;;  %v2414_v44 = vmul.f32 %v4101_v52, %v2206_v38  ;;  %v2114_v47 = vadd.f32 -5.6925062e-05, %v2098_v54 }
 0xae9   : > { %v2083_v11 = vadd.f32 -2.101024e-06, %v2067_v40  ;;  %v4287_v62 = vadd.f32 %v1887_v56, %v4049_v10  ;;  %v2429_v4 = vmul.f32 %v2413_v14, %v2397_v0  ;;  %v2128_v34 = vmul.f32 %v2112_v49, %v4183_v57 }
 0xaea   : > { %4799 = vst [vmem:[#allocation9_spill] sm:$0xff] %v4283_v8  ;;  %v3123_v9 = vpop.eup %3122  ;;  %v2290_v1 = vmul.f32 %v2274_v26, %v4223_v23  ;;  %v4292_v24 = vadd.f32 %v1940_v61, %v4051_v16  ;;  %v4294_v5 = vadd.f32 1.0, %v2427_v32  ;;  %v2396_v21 = vmul.f32 %v3119_v50, %v2380_v37 }
 0xaeb   : > { %v3125_v29 = vpop.eup %3124  ;;  %v2382_v6 = vsub.f32 2.0, %v2366_v3  ;;  %v2191_v52 = vmul.f32 %v2175_v33, %v4130_v39  ;;  %v2177_v55 = vadd.f32 -0.0029546001, %v2161_v12  ;;  %v2304_v20 = vadd.f32 -0.0073733293, %v2288_v22 }
 0xaec   : > { %4800 = vst [vmem:[#allocation10_spill] sm:$0xff] %v4292_v24  ;;  %v2259_v36 = vmul.f32 %v2243_v35, %v4244_v18  ;;  %v4300_v14 = vmul.f32 %v4283_v8, %v4283_v8  ;;  %v2367_v38 = vmul.f32 %v3123_v9, %v4230_v31  ;;  %v2130_v54 = vmul.f32 %v2114_v47, %v4223_v23 }
 0xaed   : > { %v2099_v40 = vmul.f32 %v2083_v11, %v4244_v18  ;;  %v1972_v0 = vmul.f32 0.70710677, %v4287_v62  ;;  %v2369_v50 = vmul.f32 %v3125_v29, %v4233_v28  ;;  %v2144_v49 = vadd.f32 -0.00073499064, %v2128_v34 }
 0xaee   : > { %v2306_v39 = vadd.f32 -0.0073733293, %v2290_v1  ;;  %v1974_v22 = vmul.f32 0.70710677, %v4292_v24  ;;  %v4308_v26 = vadd.f32 1.0, %v2429_v4  ;;  %v2428_v56 = vmul.f32 %v2412_v43, %v2396_v21  ;;  %v2499_v24 = vld [vmem:[%s4777_s11 + $0xc0] sm:$0xff] }
 0xaef   : > { %v2207_v32 = vadd.f32 -0.016096033, %v2191_v52  ;;  %v4310_v37 = vclamps-f32 %v1972_v0, 4.0  ;;  %v2193_v31 = vmul.f32 %v2177_v55, %v4150_v58  ;;  %v2320_v3 = vmul.f32 %v2304_v20, %v4183_v57 }
 0xaf0   : > { %v2275_v33 = vadd.f32 -0.001682827, %v2259_v36  ;;  %v2037_v61 = vmul.f32 -2.7261424e-10, %v4300_v14  ;;  %v2383_v12 = vsub.f32 2.0, %v2367_v38  ;;  %v2385_v11 = vsub.f32 2.0, %v2369_v50 }
 0xaf1   : > { %v2146_v35 = vadd.f32 -0.00073499064, %v2130_v54  ;;  %v2115_v28 = vadd.f32 -5.6925062e-05, %v2099_v40  ;;  %v4317_v47 = vmul.f32 %v4310_v37, %v4310_v37  ;;  %v2160_v43 = vmul.f32 %v2144_v49, %v4183_v57 }
 0xaf2   : > { %v2322_v4 = vmul.f32 %v2306_v39, %v4223_v23  ;;  %v4321_v34 = vclamps-f32 %v1974_v22, 4.0  ;;  %v2398_v58 = vmul.f32 %v4268_v60, %v2382_v6  ;;  %v2229_v1 = vmul.f32 -1.45660715e-05, %v4300_v14 }
 0xaf3   : > { %v2036_v21 = vmul.f32 -2.7261424e-10, %v4317_v47  ;;  %v2228_v52 = vmul.f32 -1.45660715e-05, %v4317_v47  ;;  %v2209_v55 = vadd.f32 -0.016096033, %v2193_v31  ;;  %v2291_v36 = vmul.f32 %v2275_v33, %v4244_v18 }
 0xaf4   : > { %4801 = vst [vmem:[#allocation11_spill] sm:$0xff] %v4321_v34  ;;  %v4327_v20 = vadd.f32 -0.014264739, %v2320_v3  ;;  %v2053_v38 = vadd.f32 2.7706815e-08, %v2037_v61  ;;  %v2399_v54 = vmul.f32 %v3123_v9, %v2383_v12  ;;  %v2162_v40 = vmul.f32 %v2146_v35, %v4223_v23 }
 0xaf5   : > { %v2131_v0 = vmul.f32 %v2115_v28, %v4244_v18  ;;  %v2244_v50 = vadd.f32 -0.00021337405, %v2228_v52  ;;  %v2415_v60 = vmul.f32 %v4118_v53, %v2207_v32  ;;  %v2176_v6 = vadd.f32 -0.0029546001, %v2160_v43  ;;  %v1889_v43 = vpop.f32.mrf.mxu1 }
 0xaf6   : > { %v4333_v49 = vadd.f32 -0.014264739, %v2322_v4  ;;  %v4337_v39 = vmul.f32 %v4321_v34, %v4321_v34  ;;  %v2401_v22 = vmul.f32 %v3125_v29, %v2385_v11  ;;  %v2245_v31 = vadd.f32 -0.00021337405, %v2229_v1 }
 0xaf7   : > { %v2052_v3 = vadd.f32 2.7706815e-08, %v2036_v21  ;;  %v2260_v33 = vmul.f32 %v2244_v50, %v4317_v47  ;;  %v2430_v9 = vmul.f32 %v2414_v44, %v2398_v58  ;;  %3126 = vrcp.f32 %v4327_v20  ;;  %v1942_v21 = vpop.f32.mrf.mxu0 }
 0xaf8   : > { %v2307_v61 = vadd.f32 -0.0073733293, %v2291_v36  ;;  %v2069_v12 = vmul.f32 %v2053_v38, %v4300_v14  ;;  %v2431_v35 = vmul.f32 %v2415_v60, %v2399_v54  ;;  %v2417_v53 = vmul.f32 %v4140_v51, %v2209_v55 }
 0xaf9   : > { %v2178_v32 = vadd.f32 -0.0029546001, %v2162_v40  ;;  %v2147_v28 = vadd.f32 -0.00073499064, %v2131_v0  ;;  %v2444_v4 = vadd.f32 1.0, %v2428_v56  ;;  %v2192_v52 = vmul.f32 %v2176_v6, %v4183_v57  ;;  %v1944_v63 = vpop.f32.mrf.mxu0 }
 0xafa   : > { %3128 = vrcp.f32 %v4333_v49  ;;  %v2230_v29 = vmul.f32 -1.45660715e-05, %v4337_v39  ;;  %v2433_v11 = vmul.f32 %v2417_v53, %v2401_v22  ;;  %v2261_v44 = vmul.f32 %v2245_v31, %v4300_v14  ;;  %v1891_v22 = vpop.f32.mrf.mxu1 }
 0xafb   : > { %v2068_v58 = vmul.f32 %v2052_v3, %v4317_v47  ;;  %v2276_v1 = vadd.f32 -0.001682827, %v2260_v33  ;;  %v2446_v36 = vadd.f32 1.0, %v2430_v9  ;;  %v2323_v51 = vmul.f32 %v2307_v61, %v4244_v18 }
 0xafc   : > { %v2085_v55 = vadd.f32 -2.101024e-06, %v2069_v12  ;;  %v4350_v38 = vadd.f32 %v1889_v43, %v4023_v2  ;;  %v4354_v57 = vmul.f32 %v4294_v5, %v4192_v41  ;;  %v2447_v56 = vadd.f32 1.0, %v2431_v35 }
 0xafd   : > { %v2194_v54 = vmul.f32 %v2178_v32, %v4223_v23  ;;  %v2163_v40 = vmul.f32 %v2147_v28, %v4244_v18  ;;  %v4359_v0 = vmul.f32 %v2444_v4, %v4209_v19  ;;  %v2208_v50 = vadd.f32 -0.016096033, %v2192_v52 }
 0xafe   : > { %v2246_v60 = vadd.f32 -0.00021337405, %v2230_v29  ;;  %v4362_v6 = vadd.f32 %v1942_v21, %v4027_v45  ;;  %v2449_v2 = vadd.f32 1.0, %v2433_v11  ;;  %v2277_v31 = vadd.f32 -0.001682827, %v2261_v44 }
 0xaff   : > { %v2084_v3 = vadd.f32 -2.101024e-06, %v2068_v58  ;;  %v2292_v41 = vmul.f32 %v2276_v1, %v4317_v47  ;;  %v4366_v5 = vmul.f32 %v2446_v36, %v4213_v17  ;;  %v4368_v23 = vadd.f32 -0.014264739, %v2323_v51 }
 0xb00   : > { %4802 = vst [vmem:[#allocation12_spill] sm:$0xff] %v4362_v6  ;;  %v2101_v33 = vmul.f32 %v2085_v55, %v4300_v14  ;;  %v1975_v19 = vmul.f32 0.70710677, %v4350_v38  ;;  %v4373_v9 = vmul.f32 %v2447_v56, %v4216_v48  ;;  %v2210_v45 = vadd.f32 -0.016096033, %v2194_v54 }
 0xb01   : > { %v2179_v61 = vadd.f32 -0.0029546001, %v2163_v40  ;;  %v4376_v12 = vadd.f32 %v1891_v22, %v4049_v10  ;;  %v4379_v35 = vmul.f32 %v4168_v42, %v2208_v50  ;;  %v2262_v17 = vmul.f32 %v2246_v60, %v4337_v39 }
 0xb02   : > { %v4382_v53 = vclamps-f32 %v1975_v19, 4.0  ;;  %v1977_v32 = vmul.f32 0.70710677, %v4362_v6  ;;  %v4386_v28 = vmul.f32 %v2449_v2, %v4252_v25  ;;  %v2293_v48 = vmul.f32 %v2277_v31, %v4300_v14  ;;  %v2500_v6 = vld [vmem:[%s4777_s11 + $0xc8] sm:$0xff] }
 0xb03   : > { %v2100_v43 = vmul.f32 %v2084_v3, %v4317_v47  ;;  %v2308_v4 = vadd.f32 -0.0073733293, %v2292_v41  ;;  %3130 = vrcp.f32 %v4368_v23  ;;  %v2117_v10 = vadd.f32 -5.6925062e-05, %v2101_v33 }
 0xb04   : > { %v4393_v42 = vmul.f32 %v4382_v53, %v4382_v53  ;;  %v4395_v52 = vclamps-f32 %v1977_v32, 4.0  ;;  %v3127_v29 = vpop.eup %3126  ;;  %v4398_v11 = vmul.f32 %v4199_v13, %v2210_v45  ;;  %v2195_v25 = vmul.f32 %v2179_v61, %v4244_v18 }
 0xb05   : > { %v2038_v44 = vmul.f32 -2.7261424e-10, %v4337_v39  ;;  %v1976_v58 = vmul.f32 0.70710677, %v4376_v12  ;;  %v2278_v1 = vadd.f32 -0.001682827, %v2262_v17  ;;  %v2324_v13 = vmul.f32 %v2308_v4, %v4317_v47 }
 0xb06   : > { %4803 = vst [vmem:[#allocation13_spill] sm:$0xff] %v4395_v52  ;;  %v2039_v21 = vmul.f32 -2.7261424e-10, %v4393_v42  ;;  %v2231_v36 = vmul.f32 -1.45660715e-05, %v4393_v42  ;;  %v4407_v51 = vmul.f32 %v4395_v52, %v4395_v52  ;;  %v2368_v18 = vmul.f32 %v3127_v29, %v4327_v20 }
 0xb07   : > { %v3129_v55 = vpop.eup %3128  ;;  %v2309_v56 = vadd.f32 -0.0073733293, %v2293_v48  ;;  %v2116_v54 = vadd.f32 -5.6925062e-05, %v2100_v43  ;;  %v4410_v40 = vclamps-f32 %v1976_v58, 4.0  ;;  %v2133_v2 = vmul.f32 %v2117_v10, %v4300_v14 }
 0xb08   : > { %v2055_v50 = vadd.f32 2.7706815e-08, %v2039_v21  ;;  %v2247_v60 = vadd.f32 -0.00021337405, %v2231_v36  ;;  %v2041_v22 = vmul.f32 -2.7261424e-10, %v4407_v51  ;;  %v2370_v33 = vmul.f32 %v3129_v55, %v4333_v49 }
 0xb09   : > { %v2054_v31 = vadd.f32 2.7706815e-08, %v2038_v44  ;;  %v2233_v3 = vmul.f32 -1.45660715e-05, %v4407_v51  ;;  %v4418_v41 = vmul.f32 %v4410_v40, %v4410_v40  ;;  %v2294_v19 = vmul.f32 %v2278_v1, %v4337_v39 }
 0xb0a   : > { %v2071_v45 = vmul.f32 %v2055_v50, %v4393_v42  ;;  %v2263_v20 = vmul.f32 %v2247_v60, %v4393_v42  ;;  %v2325_v61 = vmul.f32 %v2309_v56, %v4300_v14  ;;  %v4425_v17 = vadd.f32 -0.014264739, %v2324_v13 }
 0xb0b   : > { %v2249_v32 = vadd.f32 -0.00021337405, %v2233_v3  ;;  %v2040_v48 = vmul.f32 -2.7261424e-10, %v4418_v41  ;;  %v2384_v43 = vsub.f32 2.0, %v2368_v18  ;;  %v2132_v4 = vmul.f32 %v2116_v54, %v4317_v47 }
 0xb0c   : > { %v2279_v10 = vadd.f32 -0.001682827, %v2263_v20  ;;  %v2057_v44 = vadd.f32 2.7706815e-08, %v2041_v22  ;;  %v2087_v58 = vadd.f32 -2.101024e-06, %v2071_v45  ;;  %v2070_v50 = vmul.f32 %v2054_v31, %v4337_v39 }
 0xb0d   : > { %v2265_v49 = vmul.f32 %v2249_v32, %v4407_v51  ;;  %v2056_v1 = vadd.f32 2.7706815e-08, %v2040_v48  ;;  %v2232_v21 = vmul.f32 -1.45660715e-05, %v4418_v41  ;;  %v2386_v36 = vsub.f32 2.0, %v2370_v33 }
 0xb0e   : > { %v2310_v56 = vadd.f32 -0.0073733293, %v2294_v19  ;;  %v2295_v13 = vmul.f32 %v2279_v10, %v4393_v42  ;;  %3132 = vrcp.f32 %v4425_v17  ;;  %v2211_v3 = vadd.f32 -0.016096033, %v2195_v25 }
 0xb0f   : > { %v2281_v60 = vadd.f32 -0.001682827, %v2265_v49  ;;  %v2072_v18 = vmul.f32 %v2056_v1, %v4418_v41  ;;  %v2248_v54 = vadd.f32 -0.00021337405, %v2232_v21  ;;  %v2149_v22 = vadd.f32 -0.00073499064, %v2133_v2 }
 0xb10   : > { %v2311_v45 = vadd.f32 -0.0073733293, %v2295_v13  ;;  %v2073_v20 = vmul.f32 %v2057_v44, %v4407_v51  ;;  %v4436_v32 = vpop.eup %3130  ;;  %v2400_v48 = vmul.f32 %v3127_v29, %v2384_v43  ;;  %v2148_v33 = vadd.f32 -0.00073499064, %v2132_v4 }
 0xb11   : > { %v2103_v31 = vmul.f32 %v2087_v58, %v4393_v42  ;;  %v2088_v19 = vadd.f32 -2.101024e-06, %v2072_v18  ;;  %v4439_v10 = vadd.f32 -0.014264739, %v2325_v61  ;;  %v2297_v1 = vmul.f32 %v2281_v60, %v4407_v51 }
 0xb12   : > { %v2327_v49 = vmul.f32 %v2311_v45, %v4393_v42  ;;  %v2264_v25 = vmul.f32 %v2248_v54, %v4418_v41  ;;  %v2402_v2 = vmul.f32 %v3129_v55, %v2386_v36  ;;  %v2086_v21 = vadd.f32 -2.101024e-06, %v2070_v50 }
 0xb13   : > { %v2326_v44 = vmul.f32 %v2310_v56, %v4337_v39  ;;  %v2104_v13 = vmul.f32 %v2088_v19, %v4418_v41  ;;  %v2089_v43 = vadd.f32 -2.101024e-06, %v2073_v20  ;;  %v4449_v58 = vadd.f32 %v1944_v63, %v4051_v16  ;;  %v2487_v19 = vld [vmem:[%s4777_s11 + $0x60] sm:$0xff] }
 0xb14   : > { %v4446_v29 = vadd.f32 -0.014264739, %v2327_v49  ;;  %v2280_v4 = vadd.f32 -0.001682827, %v2264_v25  ;;  %v2432_v61 = vmul.f32 %v4379_v35, %v2400_v48  ;;  %v2164_v18 = vmul.f32 %v2148_v33, %v4317_v47  ;;  %v2535_v35 = vld [vmem:[%s4777_s11 + $0x1e0] sm:$0xff]  ;;  %v2488_v49 = vld [vmem:[%s4777_s11 + $0x68] sm:$0xff] }
 0xb15   : > { %4804 = vst [vmem:[#allocation14_spill] sm:$0xff] %v4449_v58  ;;  %v2119_v60 = vadd.f32 -5.6925062e-05, %v2103_v31  ;;  %v2120_v45 = vadd.f32 -5.6925062e-05, %v2104_v13  ;;  %v4454_v55 = vmul.f32 %v4237_v30, %v2211_v3  ;;  %v2434_v56 = vmul.f32 %v4398_v11, %v2402_v2  ;;  %v2536_v30 = vld [vmem:[%s4777_s11 + $0x1e8] sm:$0xff] }
 0xb16   : > { %3134 = vrcp.f32 %v4446_v29  ;;  %v2313_v36 = vadd.f32 -0.0073733293, %v2297_v1  ;;  %v2296_v50 = vmul.f32 %v2280_v4, %v4418_v41  ;;  %v4460_v54 = vmul.f32 %v2149_v22, %v4300_v14  ;;  %v2519_v1 = vld [vmem:[%s4777_s11 + $0x160] sm:$0xff]  ;;  %v2520_v13 = vld [vmem:[%s4777_s11 + $0x168] sm:$0xff]  ;;  %v2502_v4 = vld [vmem:[%s4777_s11 + $0xd8] sm:$0xff] }
 0xb17   : > { %v2102_v63 = vmul.f32 %v2086_v21, %v4337_v39  ;;  %v2136_v16 = vmul.f32 %v2120_v45, %v4418_v41  ;;  %v4470_v3 = vadd.f32 -0.014264739, %v2326_v44  ;;  %v2105_v20 = vmul.f32 %v2089_v43, %v4407_v51  ;;  %v2501_v43 = vld [vmem:[%s4777_s11 + $0xd0] sm:$0xff] }
 0xb18   : > { %v2312_v11 = vadd.f32 -0.0073733293, %v2296_v50  ;;  %v1978_v22 = vmul.f32 0.70710677, %v4449_v58  ;;  %v4474_v48 = vadd.f32 1.0, %v2432_v61  ;;  %3136 = vrcp.f32 %v4439_v10  ;;  %v2534_v50 = vld [vmem:[%s4777_s11 + $0x1d8] sm:$0xff] }
 0xb19   : > { %v2180_v33 = vadd.f32 -0.0029546001, %v2164_v18  ;;  %v2135_v31 = vmul.f32 %v2119_v60, %v4393_v42  ;;  %v2329_v25 = vmul.f32 %v2313_v36, %v4407_v51  ;;  %v2152_v2 = vadd.f32 -0.00073499064, %v2136_v16  ;;  %v2533_v36 = vld [vmem:[%s4777_s11 + $0x1d0] sm:$0xff] }
 0xb1a   : > { %v2328_v21 = vmul.f32 %v2312_v11, %v4418_v41  ;;  %v4489_v44 = vclamps-f32 %v1978_v22, 4.0  ;;  %v4500_v61 = vadd.f32 1.0, %v2434_v56  ;;  %v4504_v18 = vmul.f32 %v4436_v32, %v4368_v23  ;;  %v2485_v16 = vld [vmem:[%s4777_s11 + $0x50] sm:$0xff] }
 0xb1b   : > { %v2118_v60 = vadd.f32 -5.6925062e-05, %v2102_v63  ;;  %v2577_v45 = vpack.c.bf16 %v2536_v30, %v2535_v35  ;;  %v4515_v56 = vpop.eup %3132  ;;  %3138 = vrcp.f32 %v4470_v3  ;;  %v2121_v23 = vadd.f32 -5.6925062e-05, %v2105_v20  ;;  %v2486_v35 = vld [vmem:[%s4777_s11 + $0x58] sm:$0xff]  ;;  %v2517_v30 = vld [vmem:[%s4777_s11 + $0x150] sm:$0xff] }
 0xb1c   : > { %4805 = vst [vmem:[#allocation15_spill] sm:$0xff] %v4489_v44  ;;  %v4518_v11 = vadd.f32 -0.014264739, %v2328_v21  ;;  %v4522_v63 = vmul.f32 %v4489_v44, %v4489_v44  ;;  %v2196_v22 = vmul.f32 %v2180_v33, %v4317_v47  ;;  %v2151_v59 = vadd.f32 -0.00073499064, %v2135_v31  ;;  %v2518_v21 = vld [vmem:[%s4777_s11 + $0x158] sm:$0xff] }
 0xb1d   : > { %2884 = vmatprep.subr.bf16.mxu0 %v2577_v45  ;;  %v2553_v58 = vpack.c.bf16 %v2488_v49, %v2487_v19  ;;  %v2569_v20 = vpack.c.bf16 %v2520_v13, %v2519_v1  ;;  %v4540_v44 = vadd.f32 -0.014264739, %v2329_v25  ;;  %v2168_v47 = vmul.f32 %v2152_v2, %v4418_v41  ;;  %v2531_v31 = vld [vmem:[%s4777_s11 + $0x1c0] sm:$0xff]  ;;  %v2532_v19 = vld [vmem:[%s4777_s11 + $0x1c8] sm:$0xff] }
 0xb1e   : > { %3140 = vrcp.f32 %v4518_v11  ;;  %v2042_v33 = vmul.f32 -2.7261424e-10, %v4522_v63  ;;  %v4553_v49 = vmul.f32 %v4515_v56, %v4425_v17  ;;  %v2234_v1 = vmul.f32 -1.45660715e-05, %v4522_v63  ;;  %v2483_v13 = vld [vmem:[%s4777_s11 + $0x40] sm:$0xff]  ;;  %v2484_v45 = vld [vmem:[%s4777_s11 + $0x48] sm:$0xff] }
 0xb1f   : > { %2857 = vmatpush3.bf16.msra.mxu1 %v2553_v58  ;;  %2885 = vmatpush3.bf16.msra.mxu0 %v2569_v20  ;;  %v2560_v25 = vpack.c.bf16 %v2502_v4, %v2501_v43  ;;  %v2576_v2 = vpack.c.bf16 %v2534_v50, %v2533_v36  ;;  %v2137_v8 = vmul.f32 %v2121_v23, %v4407_v51  ;;  %v2515_v58 = vld [vmem:[%s4777_s11 + $0x140] sm:$0xff]  ;;  %v2516_v43 = vld [vmem:[%s4777_s11 + $0x148] sm:$0xff]  ;;  %v2497_v4 = vld [vmem:[%s4777_s11 + $0xb0] sm:$0xff]  ;;  %3142 = vrcp.f32 %v4540_v44 }
 0xb20   : > { %v2058_v34 = vadd.f32 2.7706815e-08, %v2042_v33  ;;  %v2552_v52 = vpack.c.bf16 %v2486_v35, %v2485_v16  ;;  %v2568_v17 = vpack.c.bf16 %v2518_v21, %v2517_v30  ;;  %v2167_v36 = vmul.f32 %v2151_v59, %v4393_v42  ;;  %v2498_v35 = vld [vmem:[%s4777_s11 + $0xb8] sm:$0xff]  ;;  %v2529_v30 = vld [vmem:[%s4777_s11 + $0x1b0] sm:$0xff] }
 0xb21   : > { %v2250_v50 = vadd.f32 -0.00021337405, %v2234_v1  ;;  %2858 = vmatprep.subr.bf16.mxu1 %v2560_v25  ;;  %2886 = vmatprep.subr.bf16.mxu0 %v2576_v2  ;;  %v2559_v23 = vpack.c.bf16 %v2500_v6, %v2499_v24  ;;  %v2575_v16 = vpack.c.bf16 %v2532_v19, %v2531_v31  ;;  %v2530_v20 = vld [vmem:[%s4777_s11 + $0x1b8] sm:$0xff]  ;;  %v2134_v21 = vmul.f32 %v2118_v60, %v4337_v39  ;;  %v4588_v6 = vld [vmem:[%s4777_s11 + $0x30] sm:$0xff]  ;;  %v2495_v2 = vld [vmem:[%s4777_s11 + $0xa0] sm:$0xff] }
 0xb22   : > { %v2184_v59 = vadd.f32 -0.0029546001, %v2168_v47  ;;  %v2074_v24 = vmul.f32 %v2058_v34, %v4522_v63  ;;  %v2482_v33 = vld [vmem:[%s4777_s11 + $0x38] sm:$0xff]  ;;  %v2212_v19 = vadd.f32 -0.016096033, %v2196_v22  ;;  %v2551_v60 = vpack.c.bf16 %v2484_v45, %v2483_v13  ;;  %v2513_v34 = vld [vmem:[%s4777_s11 + $0x130] sm:$0xff] }
 0xb23   : > { %v4593_v31 = vpop.eup %3134  ;;  %v2266_v1 = vmul.f32 %v2250_v50, %v4522_v63  ;;  %2859 = vmatpush3.bf16.msra.mxu1 %v2552_v52  ;;  %2887 = vmatpush3.bf16.msra.mxu0 %v2568_v17  ;;  %v2567_v47 = vpack.c.bf16 %v2516_v43, %v2515_v58  ;;  %v2514_v25 = vld [vmem:[%s4777_s11 + $0x138] sm:$0xff]  ;;  %v2388_v22 = vsub.f32 2.0, %v4553_v49  ;;  %v2558_v52 = vpack.c.bf16 %v2498_v35, %v2497_v4  ;;  %v2496_v45 = vld [vmem:[%s4777_s11 + $0xa8] sm:$0xff]  ;;  %v2527_v17 = vld [vmem:[%s4777_s11 + $0x1a0] sm:$0xff] }
 0xb24   : > { %v2090_v7 = vadd.f32 -2.101024e-06, %v2074_v24  ;;  %2860 = vmatprep.subr.bf16.mxu1 %v2559_v23  ;;  %2888 = vmatprep.subr.bf16.mxu0 %v2575_v16  ;;  %v2574_v13 = vpack.c.bf16 %v2530_v20, %v2529_v30  ;;  %v2528_v58 = vld [vmem:[%s4777_s11 + $0x1a8] sm:$0xff]  ;;  %v4617_v49 = vmul.f32 %v4474_v48, %v4262_v46  ;;  %v2183_v43 = vadd.f32 -0.0029546001, %v2167_v36  ;;  %v4634_v46 = vld [vmem:[%s4777_s11 + $0x20] sm:$0xff] }
 0xb25   : > { %v2153_v50 = vadd.f32 -0.00073499064, %v2137_v8  ;;  %v2282_v4 = vadd.f32 -0.001682827, %v2266_v1  ;;  %v4619_v23 = vpop.eup %3136  ;;  %v4623_v16 = vmul.f32 %v4500_v61, %v4274_v27  ;;  %v4627_v35 = vmul.f32 %v4593_v31, %v4446_v29  ;;  %v2480_v29 = vld [vmem:[%s4777_s11 + $0x28] sm:$0xff] }
 0xb26   : > { %v2200_v30 = vmul.f32 %v2184_v59, %v4418_v41  ;;  %v2106_v20 = vmul.f32 %v2090_v7, %v4522_v63  ;;  %v2150_v8 = vadd.f32 -0.00073499064, %v2134_v21  ;;  %v2550_v27 = vpack.c.bf16 %v2482_v33, %v4588_v6  ;;  %v2511_v7 = vld [vmem:[%s4777_s11 + $0x120] sm:$0xff]  ;;  %v2512_v41 = vld [vmem:[%s4777_s11 + $0x128] sm:$0xff]  ;;  %v2493_v6 = vld [vmem:[%s4777_s11 + $0x90] sm:$0xff] }
 0xb27   : > { %v2298_v48 = vmul.f32 %v2282_v4, %v4522_v63  ;;  %2861 = vmatpush3.bf16.msra.mxu1 %v2551_v60  ;;  %2889 = vmatpush3.bf16.msra.mxu0 %v2567_v47  ;;  %v2566_v61 = vpack.c.bf16 %v2514_v25, %v2513_v34  ;;  %v2420_v36 = vmul.f32 %v4310_v37, %v2212_v19  ;;  %v2494_v33 = vld [vmem:[%s4777_s11 + $0x98] sm:$0xff]  ;;  %v2525_v34 = vld [vmem:[%s4777_s11 + $0x190] sm:$0xff] }
 0xb28   : > { %v2122_v21 = vadd.f32 -5.6925062e-05, %v2106_v20  ;;  %2862 = vmatprep.subr.bf16.mxu1 %v2558_v52  ;;  %2890 = vmatprep.subr.bf16.mxu0 %v2574_v13  ;;  %v2557_v59 = vpack.c.bf16 %v2496_v45, %v2495_v2  ;;  %v2573_v24 = vpack.c.bf16 %v2528_v58, %v2527_v17  ;;  %v4654_v1 = vpop.eup %3138  ;;  %v2404_v60 = vmul.f32 %v4515_v56, %v2388_v22  ;;  %v2526_v25 = vld [vmem:[%s4777_s11 + $0x198] sm:$0xff] }
 0xb29   : > { %v2199_v47 = vmul.f32 %v2183_v43, %v4393_v42  ;;  %v2169_v37 = vmul.f32 %v2153_v50, %v4407_v51  ;;  %v2314_v19 = vadd.f32 -0.0073733293, %v2298_v48  ;;  %v2216_v2 = vadd.f32 -0.016096033, %v2200_v30  ;;  %v2477_v42 = vld [vmem:[%s4777_s11 + $0x10] sm:$0xff]  ;;  %v2478_v43 = vld [vmem:[%s4777_s11 + $0x18] sm:$0xff] }
 0xb2a   : > { %v2138_v52 = vmul.f32 %v2122_v21, %v4522_v63  ;;  %v2549_v13 = vpack.c.bf16 %v2480_v29, %v4634_v46  ;;  %v2565_v45 = vpack.c.bf16 %v2512_v41, %v2511_v7  ;;  %v2391_v22 = vsub.f32 2.0, %v4627_v35  ;;  %v2509_v50 = vld [vmem:[%s4777_s11 + $0x110] sm:$0xff]  ;;  %v2510_v4 = vld [vmem:[%s4777_s11 + $0x118] sm:$0xff]  ;;  %v2491_v48 = vld [vmem:[%s4777_s11 + $0x80] sm:$0xff] }
 0xb2b   : > { %v3141_v56 = vpop.eup %3140  ;;  %v2330_v17 = vmul.f32 %v2314_v19, %v4522_v63  ;;  %2863 = vmatpush3.bf16.msra.mxu1 %v2550_v27  ;;  %2891 = vmatpush3.bf16.msra.mxu0 %v2566_v61  ;;  %v2556_v58 = vpack.c.bf16 %v2494_v33, %v2493_v6  ;;  %v2540_v35 = vpack.c.bf16 %v4617_v49, %v4359_v0  ;;  %v1956_v30 = vmul.f32 0.5, %v4287_v62  ;;  %v2492_v27 = vld [vmem:[%s4777_s11 + $0x88] sm:$0xff]  ;;  %v2523_v61 = vld [vmem:[%s4777_s11 + $0x180] sm:$0xff] }
 0xb2c   : > { %v2376_v20 = vmul.f32 %v3141_v56, %v4518_v11  ;;  %2864 = vmatprep.subr.bf16.mxu1 %v2557_v59  ;;  %2892 = vmatprep.subr.bf16.mxu0 %v2573_v24  ;;  %v2572_v46 = vpack.c.bf16 %v2526_v25, %v2525_v34  ;;  %v2542_v62 = vpack.c.bf16 %v4623_v16, %v4366_v5  ;;  %v2387_v0 = vsub.f32 2.0, %v4504_v18  ;;  %v2524_v7 = vld [vmem:[%s4777_s11 + $0x188] sm:$0xff]  ;;  %v3143_v6 = vpop.eup %3142 }
 0xb2d   : > { %v2166_v11 = vmul.f32 %v2150_v8, %v4337_v39  ;;  %v2154_v49 = vadd.f32 -0.00073499064, %v2138_v52  ;;  %v4698_v29 = vadd.f32 -0.014264739, %v2330_v17  ;;  %2611 = vmatprep.mubr.bf16.mxu1 %v2540_v35  ;;  %v2436_v41 = vmul.f32 %v2420_v36, %v2404_v60  ;;  %v2475_v8 = vld [vmem:[%s4777_s11] sm:$0xff]  ;;  %v2508_v19 = vld [vmem:[%s4777_s11 + $0x108] sm:$0xff] }
 0xb2e   : > { %v2215_v21 = vadd.f32 -0.016096033, %v2199_v47  ;;  %v2392_v59 = vsub.f32 2.0, %v2376_v20  ;;  %v2424_v24 = vmul.f32 %v4410_v40, %v2216_v2  ;;  %2660 = vmatprep.mubr.bf16.mxu0 %v2542_v62  ;;  %v2407_v5 = vmul.f32 %v4593_v31, %v2391_v22  ;;  %v2476_v31 = vld [vmem:[%s4777_s11 + $0x8] sm:$0xff]  ;;  %v2507_v47 = vld [vmem:[%s4777_s11 + $0x100] sm:$0xff] }
 0xb2f   : > { %3144 = vrcp.f32 %v4698_v29  ;;  %2865 = vmatpush3.bf16.msra.mxu1 %v2549_v13  ;;  %2893 = vmatpush3.bf16.msra.mxu0 %v2565_v45  ;;  %v2548_v18 = vpack.c.bf16 %v2478_v43, %v2477_v42  ;;  %v2564_v16 = vpack.c.bf16 %v2510_v4, %v2509_v50  ;;  %v2185_v33 = vadd.f32 -0.0029546001, %v2169_v37 }
 0xb30   : > { %v2408_v36 = vmul.f32 %v3141_v56, %v2392_v59  ;;  %2866 = vmatprep.subr.bf16.mxu1 %v2556_v58  ;;  %2894 = vmatprep.subr.bf16.mxu0 %v2572_v46  ;;  %v2555_v60 = vpack.c.bf16 %v2492_v27, %v2491_v48  ;;  %v2571_v40 = vpack.c.bf16 %v2524_v7, %v2523_v61  ;;  %v2181_v37 = vadd.f32 -0.0029546001, %v4460_v54  ;;  %v4808_v59 = vld [vmem:[#allocation11_spill] sm:$0xff] }
 0xb31   : > { %v2403_v34 = vmul.f32 %v4436_v32, %v2387_v0  ;;  %v2182_v25 = vadd.f32 -0.0029546001, %v2166_v11  ;;  %v2170_v2 = vmul.f32 %v2154_v49, %v4522_v63  ;;  %v2452_v52 = vadd.f32 1.0, %v2436_v41  ;;  %v4807_v41 = vld [vmem:[#allocation13_spill] sm:$0xff] }
 0xb32   : > { %v2423_v13 = vmul.f32 %v4382_v53, %v2215_v21  ;;  %v2377_v45 = vmul.f32 %v3143_v6, %v4540_v44  ;;  %v2440_v42 = vmul.f32 %v2424_v24, %v2408_v36  ;;  %v2374_v56 = vmul.f32 %v4654_v1, %v4470_v3 }
 0xb33   : > { %v1960_v22 = vmul.f32 0.5, %v4376_v12  ;;  %2867 = vmatpush3.bf16.msra.mxu1 %v2548_v18  ;;  %2895 = vmatpush3.bf16.msra.mxu0 %v2564_v16  ;;  %v2547_v17 = vpack.c.bf16 %v2476_v31, %v2475_v8  ;;  %v2563_v32 = vpack.c.bf16 %v2508_v19, %v2507_v47  ;;  %v2373_v54 = vmul.f32 %v4619_v23, %v4439_v10 }
 0xb34   : > { %v2439_v58 = vmul.f32 %v2423_v13, %v2407_v5  ;;  %v2201_v43 = vmul.f32 %v2185_v33, %v4407_v51  ;;  %v2456_v50 = vadd.f32 1.0, %v2440_v42  ;;  %2868 = vmatprep.subr.bf16.mxu1 %v2555_v60  ;;  %2896 = vmatprep.subr.bf16.mxu0 %v2571_v40  ;;  %v2461_v53 = vmul.f32 %v4308_v26, %v4202_v15  ;;  %v4810_v40 = vld [vmem:[#allocation15_spill] sm:$0xff]  ;;  %v4814_v42 = vld [vmem:[#allocation8_spill] sm:$0xff] }
 0xb35   : > { %v2197_v3 = vmul.f32 %v2181_v37, %v4300_v14  ;;  %v2198_v12 = vmul.f32 %v2182_v25, %v4337_v39  ;;  %v2186_v44 = vadd.f32 -0.0029546001, %v2170_v2  ;;  %v2435_v4 = vmul.f32 %v4454_v55, %v2403_v34  ;;  %v4811_v37 = vld [vmem:[#allocation12_spill] sm:$0xff]  ;;  %v4812_v2 = vld [vmem:[#allocation10_spill] sm:$0xff] }
 0xb36   : > { %v2468_v35 = vmul.f32 %v2452_v52, %v1956_v30  ;;  %v2393_v20 = vsub.f32 2.0, %v2377_v45  ;;  %v2472_v46 = vmul.f32 %v2456_v50, %v1960_v22  ;;  %v2539_v10 = vpack.c.bf16 %v4373_v9, %v4354_v57  ;;  %v4813_v52 = vld [vmem:[#allocation14_spill] sm:$0xff] }
 0xb37   : > { %v2541_v51 = vpack.c.bf16 %v4386_v28, %v2461_v53  ;;  %v2390_v48 = vsub.f32 2.0, %v2374_v56  ;;  %2869 = vmatpush3.bf16.msra.mxu1 %v2547_v17  ;;  %2897 = vmatpush3.bf16.msra.mxu0 %v2563_v32  ;;  %v2389_v27 = vsub.f32 2.0, %v2373_v54  ;;  %v2455_v15 = vadd.f32 1.0, %v2439_v58  ;;  %v4806_v28 = vld [vmem:[#allocation7_spill] sm:$0xff] }
 0xb38   : > { %v2217_v26 = vadd.f32 -0.016096033, %v2201_v43  ;;  %v2544_v14 = vpack.c.bf16 %v2472_v46, %v2468_v35  ;;  %v2214_v61 = vadd.f32 -0.016096033, %v2198_v12  ;;  %v2202_v39 = vmul.f32 %v2186_v44, %v4522_v63 }
 0xb39   : > { %v2451_v62 = vadd.f32 1.0, %v2435_v4  ;;  %v2213_v55 = vadd.f32 -0.016096033, %v2197_v3  ;;  %v1959_v30 = vmul.f32 0.5, %v4350_v38  ;;  %v2409_v0 = vmul.f32 %v3143_v6, %v2393_v20  ;;  %v4809_v6 = vld [vmem:[#allocation9_spill] sm:$0xff] }
 0xb3a   : > { %2612 = vmatmul.mubr.bf16.vlgmr.msra.gmra.mxu1 %v2539_v10  ;;  %2661 = vmatmul.mubr.bf16.vlgmr.msra.gmra.mxu0 %v2541_v51  ;;  %v2406_v57 = vmul.f32 %v4654_v1, %v2390_v48  ;;  %v1955_v11 = vmul.f32 0.5, %v4806_v28  ;;  %v2405_v49 = vmul.f32 %v4619_v23, %v2389_v27  ;;  %v2425_v21 = vmul.f32 %v4807_v41, %v2217_v26  ;;  %v2797_v10 = vld [vmem:[%s4778_s12] ss:$0 sm:$0xff] }
 0xb3b   : > { %2619 = vmatprep.mubr.bf16.mxu1 %v2544_v14  ;;  %v2471_v7 = vmul.f32 %v2455_v15, %v1959_v30  ;;  %v2422_v63 = vmul.f32 %v4808_v59, %v2214_v61  ;;  %v2218_v24 = vadd.f32 -0.016096033, %v2202_v39  ;;  %v2421_v18 = vmul.f32 %v4809_v6, %v2213_v55  ;;  %v4815_v27 = vld [vmem:[#allocation3_spill] sm:$0xff]  ;;  %v4816_v55 = vld [vmem:[#allocation5_spill] sm:$0xff] }
 0xb3c   : > { %v3145_v9 = vpop.eup %3144  ;;  %v2467_v38 = vmul.f32 %v2451_v62, %v1955_v11  ;;  %v2441_v16 = vmul.f32 %v2425_v21, %v2409_v0  ;;  %v1961_v25 = vmul.f32 0.5, %v4811_v37  ;;  %v1962_v13 = vmul.f32 0.5, %v4813_v52 }
 0xb3d   : > { %v2378_v5 = vmul.f32 %v3145_v9, %v4698_v29  ;;  %v2438_v8 = vmul.f32 %v2422_v63, %v2406_v57  ;;  %v2437_v33 = vmul.f32 %v2421_v18, %v2405_v49  ;;  %v2426_v31 = vmul.f32 %v4810_v40, %v2218_v24 }
 0xb3e   : > { %v2543_v36 = vpack.c.bf16 %v2471_v7, %v2467_v38  ;;  %v2457_v23 = vadd.f32 1.0, %v2441_v16  ;;  %v1958_v29 = vmul.f32 0.5, %v4812_v2  ;;  %v1957_v56 = vmul.f32 0.5, %v4814_v42 }
 0xb3f   : > { %v2394_v1 = vsub.f32 2.0, %v2378_v5  ;;  %v2454_v47 = vadd.f32 1.0, %v2438_v8  ;;  %v2453_v34 = vadd.f32 1.0, %v2437_v33  ;;  %v4817_v5 = vld [vmem:[#allocation4_spill] sm:$0xff]  ;;  %v4818_v8 = vld [vmem:[#allocation6_spill] sm:$0xff] }
 0xb40   : > { %v2473_v22 = vmul.f32 %v2457_v23, %v1961_v25 }
 0xb41   : > { %v2410_v60 = vmul.f32 %v3145_v9, %v2394_v1  ;;  %v2470_v17 = vmul.f32 %v2454_v47, %v1958_v29  ;;  %v2469_v54 = vmul.f32 %v2453_v34, %v1957_v56 }
 0xb42   : > { %2620 = vmatmul.mubr.bf16.gmra.mxu1 %v2543_v36 }
 0xb43   : > { %v2442_v19 = vmul.f32 %v2426_v31, %v2410_v60  ;;  %v2545_v43 = vpack.c.bf16 %v2473_v22, %v2469_v54 }
 0xb45   : > { %v2458_v45 = vadd.f32 1.0, %v2442_v19 }
 0xb47   : > { %v2474_v32 = vmul.f32 %v2458_v45, %v1962_v13 }
 0xb49   : > { %v2546_v58 = vpack.c.bf16 %v2474_v32, %v2470_v17 }
 0xb4b   : > { %2668 = vmatprep.mubr.bf16.mxu0 %v2546_v58 }
 0xb4c   : > { %2669 = vmatmul.mubr.bf16.gmra.mxu0 %v2545_v43 }
 0xbfa   : > { %v2870_v50 = vpop.f32.mrf.mxu1  ;;  %v2898_v53 = vpop.f32.mrf.mxu0 }
 0xbfc   : > { %v2871_v3 = vpop.f32.mrf.mxu1  ;;  %v2899_v12 = vpop.f32.mrf.mxu0 }
 0xbfd   : > { %v2872_v44 = vadd.f32 %v2871_v3, %v2870_v50  ;;  %v2900_v4 = vadd.f32 %v2899_v12, %v2898_v53 }
 0xbfe   : > { %v2873_v35 = vpop.f32.mrf.mxu1  ;;  %v2901_v20 = vpop.f32.mrf.mxu0 }
 0xbff   : > { %v2663_v46 = vadd.f32 %v2900_v4, %v2872_v44 }
 0xc00   : > { %v2874_v51 = vpop.f32.mrf.mxu1  ;;  %v2902_v48 = vpop.f32.mrf.mxu0 }
 0xc01   : > { %v2677_v15 = vadd.f32 %v2663_v46, %v4815_v27  ;;  %v2875_v26 = vadd.f32 %v2874_v51, %v2873_v35  ;;  %v2903_v14 = vadd.f32 %v2902_v48, %v2901_v20 }
 0xc02   : > { %v2876_v61 = vpop.f32.mrf.mxu1 }
 0xc03   : > { %v2688_v39 = vadd.f32 %v2797_v10, %v2677_v15  ;;  %v2666_v62 = vadd.f32 %v2903_v14, %v2875_v26 }
 0xc04   : > { %v2877_v0 = vpop.f32.mrf.mxu1 }
 0xc05   : > { %2692 = vst [vmem:[%s440_s16] sm:$0xff] %v2688_v39  ;;  %v2678_v30 = vadd.f32 %v2666_v62, %v4816_v55  ;;  %v2878_v11 = vadd.f32 %v2877_v0, %v2876_v61 }
 0xc06   : > { %v2879_v9 = vpop.f32.mrf.mxu1 }
 0xc07   : > { %v2689_v57 = vadd.f32 %v2797_v10, %v2678_v30 }
 0xc08   : > { %v2880_v7 = vpop.f32.mrf.mxu1 }
 0xc09   : > { %2693 = vst [vmem:[%s440_s16 + $0x8] sm:$0xff] %v2689_v57  ;;  %v2881_v63 = vadd.f32 %v2880_v7, %v2879_v9 }
 0xc0c   : > { %v2904_v28 = vpop.f32.mrf.mxu0 }
 0xc0e   : > { %v2905_v49 = vpop.f32.mrf.mxu0 }
 0xc0f   : > { %v2906_v41 = vadd.f32 %v2905_v49, %v2904_v28 }
 0xc10   : > { %v2907_v21 = vpop.f32.mrf.mxu0 }
 0xc11   : > { %v2671_v59 = vadd.f32 %v2906_v41, %v2878_v11 }
 0xc12   : > { %v2908_v24 = vpop.f32.mrf.mxu0 }
 0xc13   : > { %v2679_v38 = vadd.f32 %v2671_v59, %v4817_v5  ;;  %v2909_v6 = vadd.f32 %v2908_v24, %v2907_v21 }
 0xc15   : > { %v2690_v18 = vadd.f32 %v2797_v10, %v2679_v38  ;;  %v2674_v16 = vadd.f32 %v2909_v6, %v2881_v63 }
 0xc17   : > { %2694 = vst [vmem:[%s440_s16 + $0x10] sm:$0xff] %v2690_v18  ;;  %v2680_v1 = vadd.f32 %v2674_v16, %v4818_v8 }
 0xc19   : > { %v2691_v33 = vadd.f32 %v2797_v10, %v2680_v1 }
 0xc1b   : > { %2695 = vst [vmem:[%s440_s16 + $0x18] sm:$0xff] %v2691_v33 }
 0xc1c PF: > { %s23_s25 = sadd.s32 1, %s3156_s25  }
 0xc1d   : > { %p20_p4 = scmp.ge.s32.totalorder %s23_s25, 4  }
 0xc1f   :  { %22 = sbr.rel (!%p20_p4) target bundleno = 1 (0x1), region = 102 }

</bundles_post_ra>
